<compile_context>
chip_gen: v7x
topology: tpu7x:2x2x1
jax: 0.10.0
libtpu: 0.0.40
codegen_flags: <defaults>
</compile_context>

<pallas_src>
import math

import jax
import jax.numpy as jnp
from jax import lax
from jax.experimental import pallas as pl
from jax.experimental.pallas import tpu as pltpu


# ---------------------------------------------------------------------------
# Pallas kernel: 2-layer GRU over time + mean over time, for one batch tile.
# ---------------------------------------------------------------------------
def _gru_agg_kernel(seq_ref, wih0_ref, whh0_ref, bih0_ref, bhh0_ref,
                    wih1_ref, whh1_ref, bih1_ref, bhh1_ref, o_ref):
    # seq_ref : (L, tS, Dp)  time-major tile of sequences (lane-dense Dp)
    # w*_ref  : (Dp, 3*Dp)   pre-transposed, gate-blocked [r | z | n]
    # b*_ref  : (1, 3*Dp)
    # o_ref   : (tS, Dp)     mean over time of the top-layer hidden state
    L, tS, Dp = seq_ref.shape
    H = Dp

    # Weights/biases: constant index_map -> DMA'd once; load once, reuse over time.
    wih0 = wih0_ref[...]
    whh0 = whh0_ref[...]
    wih1 = wih1_ref[...]
    whh1 = whh1_ref[...]
    # Hoist bias broadcasts out of the time loop (broadcast_in_dim is not CSE'd).
    bih0 = jnp.broadcast_to(bih0_ref[...], (tS, 3 * H))
    bhh0 = jnp.broadcast_to(bhh0_ref[...], (tS, 3 * H))
    bih1 = jnp.broadcast_to(bih1_ref[...], (tS, 3 * H))
    bhh1 = jnp.broadcast_to(bhh1_ref[...], (tS, 3 * H))

    def cell(x, h, wih, whh, bih, bhh):
        gi = jnp.dot(x, wih, preferred_element_type=jnp.float32) + bih
        gh = jnp.dot(h, whh, preferred_element_type=jnp.float32) + bhh
        r = jax.nn.sigmoid(gi[:, 0 * H:1 * H] + gh[:, 0 * H:1 * H])
        z = jax.nn.sigmoid(gi[:, 1 * H:2 * H] + gh[:, 1 * H:2 * H])
        n = jnp.tanh(gi[:, 2 * H:3 * H] + r * gh[:, 2 * H:3 * H])
        return (1.0 - z) * n + z * h

    def step(t, carry):
        h1, h2, acc = carry
        x_t = seq_ref[t]                       # dynamic load along leading (time) axis
        h1 = cell(x_t, h1, wih0, whh0, bih0, bhh0)
        h2 = cell(h1, h2, wih1, whh1, bih1, bhh1)
        return h1, h2, acc + h2

    zeros = jnp.zeros((tS, Dp), jnp.float32)
    _, _, acc = lax.fori_loop(0, L, step, (zeros, zeros, zeros), unroll=(L <= 16))

    # PyTorch .mean(dim=1) divides by the padded length L.
    o_ref[...] = acc * (1.0 / L)


def _gru_mean_pallas(seq_t, padded_params, tile_s):
    """seq_t: (L, S_pad, Dp) f32 time-major. Returns (S_pad, Dp) f32."""
    L, S_pad, Dp = seq_t.shape
    grid = (S_pad // tile_s,)

    w_spec = pl.BlockSpec((Dp, 3 * Dp), lambda i: (0, 0))   # resident across grid
    b_spec = pl.BlockSpec((1, 3 * Dp), lambda i: (0, 0))

    flops = 24 * L * S_pad * Dp * Dp            # 4 matmuls/step, 2*M*K*N each
    transcendentals = 6 * L * S_pad * Dp        # 2 sigmoid + 1 tanh per layer per elem
    bytes_accessed = 4 * (L * S_pad * Dp + 4 * Dp * 3 * Dp + 4 * 3 * Dp + S_pad * Dp)

    return pl.pallas_call(
        _gru_agg_kernel,
        out_shape=jax.ShapeDtypeStruct((S_pad, Dp), jnp.float32),
        grid=grid,
        in_specs=[pl.BlockSpec((L, tile_s, Dp), lambda i: (0, i, 0)),
                  w_spec, w_spec, b_spec, b_spec,
                  w_spec, w_spec, b_spec, b_spec],
        out_specs=pl.BlockSpec((tile_s, Dp), lambda i: (i, 0)),
        compiler_params=pltpu.CompilerParams(
            dimension_semantics=("parallel",)),
        cost_estimate=pl.CostEstimate(flops=flops,
                                      transcendentals=transcendentals,
                                      bytes_accessed=bytes_accessed),
    )(seq_t, *padded_params)


# ---------------------------------------------------------------------------
# Wrapper: preprocessing (JAX) + padding + Pallas GRU.
# ---------------------------------------------------------------------------
def _dense_time_sorted_sequences(x, index, timestamps, num_segments, max_len):
    """cat ts column -> to_dense_batch(sorted by index) -> per-group sort by ts -> drop ts."""
    N, D = x.shape
    S, L = num_segments, max_len

    xc = jnp.concatenate([timestamps.reshape(-1, 1).astype(jnp.float32),
                          x.astype(jnp.float32)], axis=1)          # (N, D+1)

    # TODO(synk): grouping/sorting below uses jnp argsort/scatter (no Pallas equivalent).
    sort_ids = jnp.argsort(index)                # stable; torch argsort may tie-break differently
    sidx = index[sort_ids]
    sx = xc[sort_ids]

    counts = jnp.zeros((S,), jnp.int32).at[index].add(1)
    starts = jnp.concatenate([jnp.zeros((1,), jnp.int32), jnp.cumsum(counts)[:-1]])
    pos = jnp.arange(N, dtype=jnp.int32) - starts[sidx]

    dense = jnp.zeros((S, L, D + 1), jnp.float32).at[sidx, pos].set(sx)

    # sort_wrt_time: sort each group's rows by timestamp (column 0), then drop it.
    order = jnp.argsort(dense[:, :, 0], axis=1)
    dense_sorted = jnp.take_along_axis(dense, order[:, :, None], axis=1)
    return dense_sorted[:, :, 1:]                                   # (S, L, D)


def _pad_gru_params(params, D, Dp):
    """PyTorch-layout (3H,K)/(3H,) -> transposed, lane-padded (Dp,3Dp)/(1,3Dp)."""
    def pw(w):
        K = w.shape[1]
        out = jnp.zeros((Dp, 3 * Dp), jnp.float32)
        for g in range(3):
            out = out.at[:K, g * Dp:g * Dp + D].set(w[g * D:(g + 1) * D, :].T)
        return out

    def pb(b):
        out = jnp.zeros((1, 3 * Dp), jnp.float32)
        for g in range(3):
            out = out.at[0, g * Dp:g * Dp + D].set(b[g * D:(g + 1) * D])
        return out

    return (pw(params["wih0"]), pw(params["whh0"]), pb(params["bih0"]), pb(params["bhh0"]),
            pw(params["wih1"]), pw(params["whh1"]), pb(params["bih1"]), pb(params["bhh1"]))


def gru_agg_forward(x, index, timestamps, params, num_segments, max_len, tile_s=8):
    """Full GRUAgg forward. x:(N,D) f32, index:(N,) int32, timestamps:(N,) f32."""
    N, D = x.shape
    S, L = num_segments, max_len

    seq = _dense_time_sorted_sequences(x, index, timestamps, S, L)   # (S, L, D)

    Dp = max(128, pl.cdiv(D, 128) * 128)          # lane-dense hidden/feature dim
    S_pad = pl.cdiv(S, tile_s) * tile_s           # sublane-friendly batch dim

    seq_p = jnp.zeros((S_pad, L, Dp), jnp.float32).at[:S, :, :D].set(seq)
    seq_t = jnp.transpose(seq_p, (1, 0, 2))       # (L, S_pad, Dp) time-major

    padded_params = _pad_gru_params(params, D, Dp)
    out_p = _gru_mean_pallas(seq_t, padded_params, tile_s)           # (S_pad, Dp)
    return jnp.squeeze(out_p[:S, :D])


# ---------------------------------------------------------------------------
# Pure-JAX reference (lax.scan GRU) for correctness checking.
# ---------------------------------------------------------------------------
def _reference_gru_mean(seq, params):
    def cell(x, h, wih, whh, bih, bhh):
        gi = x @ wih.T + bih
        gh = h @ whh.T + bhh
        i_r, i_z, i_n = jnp.split(gi, 3, axis=-1)
        h_r, h_z, h_n = jnp.split(gh, 3, axis=-1)
        r = jax.nn.sigmoid(i_r + h_r)
        z = jax.nn.sigmoid(i_z + h_z)
        n = jnp.tanh(i_n + r * h_n)
        return (1.0 - z) * n + z * h

    S, L, D = seq.shape
    h0 = jnp.zeros((S, D), jnp.float32)

    def step(carry, x_t):
        h1, h2 = carry
        h1 = cell(x_t, h1, params["wih0"], params["whh0"], params["bih0"], params["bhh0"])
        h2 = cell(h1, h2, params["wih1"], params["whh1"], params["bih1"], params["bhh1"])
        return (h1, h2), h2

    _, ys = lax.scan(step, (h0, h0), jnp.swapaxes(seq, 0, 1))        # ys: (L, S, D)
    return jnp.squeeze(ys.mean(axis=0))


if __name__ == "__main__":
    D = 66     # d_model (GRUAgg default)
    N = 24     # rows of x (edges)
    S = 6      # number of groups / segments (dense batch size)

    key = jax.random.PRNGKey(0)
    kx, kt, ki, kp = jax.random.split(key, 4)
    x = jax.random.normal(kx, (N, D), dtype=jnp.float32)
    timestamps = jax.random.uniform(kt, (N,), minval=1.0, maxval=100.0, dtype=jnp.float32)
    index = jax.random.randint(ki, (N,), 0, S, dtype=jnp.int32)

    # PyTorch default GRU init: U(-1/sqrt(H), 1/sqrt(H)), gates stacked [r|z|n].
    bound = 1.0 / math.sqrt(D)
    ks = jax.random.split(kp, 8)
    u = lambda k, s: jax.random.uniform(k, s, minval=-bound, maxval=bound, dtype=jnp.float32)
    params = {
        "wih0": u(ks[0], (3 * D, D)), "whh0": u(ks[1], (3 * D, D)),
        "bih0": u(ks[2], (3 * D,)),   "bhh0": u(ks[3], (3 * D,)),
        "wih1": u(ks[4], (3 * D, D)), "whh1": u(ks[5], (3 * D, D)),
        "bih1": u(ks[6], (3 * D,)),   "bhh1": u(ks[7], (3 * D,)),
    }

    # Dense length L = max group size (what to_dense_batch would produce) — static.
    counts = jnp.zeros((S,), jnp.int32).at[index].add(1)
    L = int(jnp.max(counts))

    out = gru_agg_forward(x, index, timestamps, params, num_segments=S, max_len=L)
    out = jax.block_until_ready(out)

    # Reference: identical preprocessing, pure-JAX 2-layer GRU + time-mean.
    seq = _dense_time_sorted_sequences(x, index, timestamps, S, L)
    ref = _reference_gru_mean(seq, params)

    assert out.shape == ref.shape, (out.shape, ref.shape)
    assert jnp.allclose(out, ref, atol=1e-4, rtol=1e-4), "mismatch vs reference"
    print("KERNEL_OK")
</pallas_src>

<mosaic_0001>
module attributes {stable_mosaic.version = 11 : i64} {
  func.func @_gru_agg_kernel(%arg0: i32, %arg1: memref<7x8x128xf32, #tpu.memory_space<vmem>>, %arg2: memref<128x384xf32, #tpu.memory_space<vmem>>, %arg3: memref<128x384xf32, #tpu.memory_space<vmem>>, %arg4: memref<1x384xf32, #tpu.memory_space<vmem>>, %arg5: memref<1x384xf32, #tpu.memory_space<vmem>>, %arg6: memref<128x384xf32, #tpu.memory_space<vmem>>, %arg7: memref<128x384xf32, #tpu.memory_space<vmem>>, %arg8: memref<1x384xf32, #tpu.memory_space<vmem>>, %arg9: memref<1x384xf32, #tpu.memory_space<vmem>>, %arg10: memref<8x128xf32, #tpu.memory_space<vmem>>) attributes {dimension_semantics = [#tpu.dimension_semantics<parallel>], iteration_bounds = array<i64: 1>, scalar_prefetch = 0 : i64, scratch_operands = 0 : i64, tpu.core_type = #tpu.core_type<tc>, window_params = [{transform_indices = @transform_0, window_bounds = array<i64: 7, 8, 128>}, {pipeline_mode = #tpu.pipeline_mode<synchronous>, transform_indices = @transform_1, window_bounds = array<i64: 128, 384>}, {pipeline_mode = #tpu.pipeline_mode<synchronous>, transform_indices = @transform_2, window_bounds = array<i64: 128, 384>}, {pipeline_mode = #tpu.pipeline_mode<synchronous>, transform_indices = @transform_3, window_bounds = array<i64: 1, 384>}, {pipeline_mode = #tpu.pipeline_mode<synchronous>, transform_indices = @transform_4, window_bounds = array<i64: 1, 384>}, {pipeline_mode = #tpu.pipeline_mode<synchronous>, transform_indices = @transform_5, window_bounds = array<i64: 128, 384>}, {pipeline_mode = #tpu.pipeline_mode<synchronous>, transform_indices = @transform_6, window_bounds = array<i64: 128, 384>}, {pipeline_mode = #tpu.pipeline_mode<synchronous>, transform_indices = @transform_7, window_bounds = array<i64: 1, 384>}, {pipeline_mode = #tpu.pipeline_mode<synchronous>, transform_indices = @transform_8, window_bounds = array<i64: 1, 384>}, {transform_indices = @transform_9, window_bounds = array<i64: 8, 128>}]} {
    %c0 = arith.constant 0 : index
    %c0_0 = arith.constant 0 : index
    %0 = vector.load %arg2[%c0, %c0_0] : memref<128x384xf32, #tpu.memory_space<vmem>>, vector<128x384xf32>
    %c0_1 = arith.constant 0 : index
    %c0_2 = arith.constant 0 : index
    %1 = vector.load %arg3[%c0_1, %c0_2] : memref<128x384xf32, #tpu.memory_space<vmem>>, vector<128x384xf32>
    %c0_3 = arith.constant 0 : index
    %c0_4 = arith.constant 0 : index
    %2 = vector.load %arg6[%c0_3, %c0_4] : memref<128x384xf32, #tpu.memory_space<vmem>>, vector<128x384xf32>
    %c0_5 = arith.constant 0 : index
    %c0_6 = arith.constant 0 : index
    %3 = vector.load %arg7[%c0_5, %c0_6] : memref<128x384xf32, #tpu.memory_space<vmem>>, vector<128x384xf32>
    %c0_7 = arith.constant 0 : index
    %c0_8 = arith.constant 0 : index
    %4 = vector.load %arg4[%c0_7, %c0_8] : memref<1x384xf32, #tpu.memory_space<vmem>>, vector<1x384xf32>
    %5 = vector.shape_cast %4 : vector<1x384xf32> to vector<1x384xf32>
    %6 = vector.broadcast %5 : vector<1x384xf32> to vector<8x384xf32>
    %c0_9 = arith.constant 0 : index
    %c0_10 = arith.constant 0 : index
    %7 = vector.load %arg5[%c0_9, %c0_10] : memref<1x384xf32, #tpu.memory_space<vmem>>, vector<1x384xf32>
    %8 = vector.shape_cast %7 : vector<1x384xf32> to vector<1x384xf32>
    %9 = vector.broadcast %8 : vector<1x384xf32> to vector<8x384xf32>
    %c0_11 = arith.constant 0 : index
    %c0_12 = arith.constant 0 : index
    %10 = vector.load %arg8[%c0_11, %c0_12] : memref<1x384xf32, #tpu.memory_space<vmem>>, vector<1x384xf32>
    %11 = vector.shape_cast %10 : vector<1x384xf32> to vector<1x384xf32>
    %12 = vector.broadcast %11 : vector<1x384xf32> to vector<8x384xf32>
    %c0_13 = arith.constant 0 : index
    %c0_14 = arith.constant 0 : index
    %13 = vector.load %arg9[%c0_13, %c0_14] : memref<1x384xf32, #tpu.memory_space<vmem>>, vector<1x384xf32>
    %14 = vector.shape_cast %13 : vector<1x384xf32> to vector<1x384xf32>
    %15 = vector.broadcast %14 : vector<1x384xf32> to vector<8x384xf32>
    %cst = arith.constant 0.000000e+00 : f32
    %16 = vector.broadcast %cst : f32 to vector<8x128xf32>
    %c0_i32 = arith.constant 0 : i32
    %17 = arith.index_cast %c0_i32 : i32 to index
    %c0_15 = arith.constant 0 : index
    %c0_16 = arith.constant 0 : index
    %18 = vector.load %arg1[%17, %c0_15, %c0_16] : memref<7x8x128xf32, #tpu.memory_space<vmem>>, vector<1x8x128xf32>
    %19 = vector.shape_cast %18 : vector<1x8x128xf32> to vector<8x128xf32>
    %cst_17 = arith.constant dense<0.000000e+00> : vector<8x384xf32>
    %20 = tpu.matmul %19, %0, %cst_17 {dimension_numbers = #tpu.dot_dimension_numbers<[1], [0], [0], [1], [0, 0, 1, 1], [], []>} : vector<8x128xf32>, vector<128x384xf32>, vector<8x384xf32> -> vector<8x384xf32>
    %21 = arith.addf %20, %6 : vector<8x384xf32>
    %cst_18 = arith.constant dense<0.000000e+00> : vector<8x384xf32>
    %22 = tpu.matmul %16, %1, %cst_18 {dimension_numbers = #tpu.dot_dimension_numbers<[1], [0], [0], [1], [0, 0, 1, 1], [], []>} : vector<8x128xf32>, vector<128x384xf32>, vector<8x384xf32> -> vector<8x384xf32>
    %23 = arith.addf %22, %9 : vector<8x384xf32>
    %24 = vector.extract_strided_slice %21 {offsets = [0, 0], sizes = [8, 128], strides = [1, 1]} : vector<8x384xf32> to vector<8x128xf32>
    %25 = vector.extract_strided_slice %23 {offsets = [0, 0], sizes = [8, 128], strides = [1, 1]} : vector<8x384xf32> to vector<8x128xf32>
    %26 = arith.addf %24, %25 : vector<8x128xf32>
    %27 = arith.negf %26 : vector<8x128xf32>
    %28 = math.exp %27 : vector<8x128xf32>
    %cst_19 = arith.constant 1.000000e+00 : f32
    %29 = vector.broadcast %cst_19 : f32 to vector<8x128xf32>
    %30 = arith.addf %29, %28 : vector<8x128xf32>
    %31 = arith.divf %29, %30 : vector<8x128xf32>
    %32 = vector.extract_strided_slice %21 {offsets = [0, 128], sizes = [8, 128], strides = [1, 1]} : vector<8x384xf32> to vector<8x128xf32>
    %33 = vector.extract_strided_slice %23 {offsets = [0, 128], sizes = [8, 128], strides = [1, 1]} : vector<8x384xf32> to vector<8x128xf32>
    %34 = arith.addf %32, %33 : vector<8x128xf32>
    %35 = arith.negf %34 : vector<8x128xf32>
    %36 = math.exp %35 : vector<8x128xf32>
    %cst_20 = arith.constant 1.000000e+00 : f32
    %37 = vector.broadcast %cst_20 : f32 to vector<8x128xf32>
    %38 = arith.addf %37, %36 : vector<8x128xf32>
    %39 = arith.divf %37, %38 : vector<8x128xf32>
    %40 = vector.extract_strided_slice %21 {offsets = [0, 256], sizes = [8, 128], strides = [1, 1]} : vector<8x384xf32> to vector<8x128xf32>
    %41 = vector.extract_strided_slice %23 {offsets = [0, 256], sizes = [8, 128], strides = [1, 1]} : vector<8x384xf32> to vector<8x128xf32>
    %42 = arith.mulf %31, %41 : vector<8x128xf32>
    %43 = arith.addf %40, %42 : vector<8x128xf32>
    %44 = math.tanh %43 : vector<8x128xf32>
    %cst_21 = arith.constant 1.000000e+00 : f32
    %45 = vector.broadcast %cst_21 : f32 to vector<8x128xf32>
    %46 = arith.subf %45, %39 : vector<8x128xf32>
    %47 = arith.mulf %46, %44 : vector<8x128xf32>
    %48 = arith.mulf %39, %16 : vector<8x128xf32>
    %49 = arith.addf %47, %48 : vector<8x128xf32>
    %cst_22 = arith.constant dense<0.000000e+00> : vector<8x384xf32>
    %50 = tpu.matmul %49, %2, %cst_22 {dimension_numbers = #tpu.dot_dimension_numbers<[1], [0], [0], [1], [0, 0, 1, 1], [], []>} : vector<8x128xf32>, vector<128x384xf32>, vector<8x384xf32> -> vector<8x384xf32>
    %51 = arith.addf %50, %12 : vector<8x384xf32>
    %cst_23 = arith.constant dense<0.000000e+00> : vector<8x384xf32>
    %52 = tpu.matmul %16, %3, %cst_23 {dimension_numbers = #tpu.dot_dimension_numbers<[1], [0], [0], [1], [0, 0, 1, 1], [], []>} : vector<8x128xf32>, vector<128x384xf32>, vector<8x384xf32> -> vector<8x384xf32>
    %53 = arith.addf %52, %15 : vector<8x384xf32>
    %54 = vector.extract_strided_slice %51 {offsets = [0, 0], sizes = [8, 128], strides = [1, 1]} : vector<8x384xf32> to vector<8x128xf32>
    %55 = vector.extract_strided_slice %53 {offsets = [0, 0], sizes = [8, 128], strides = [1, 1]} : vector<8x384xf32> to vector<8x128xf32>
    %56 = arith.addf %54, %55 : vector<8x128xf32>
    %57 = arith.negf %56 : vector<8x128xf32>
    %58 = math.exp %57 : vector<8x128xf32>
    %cst_24 = arith.constant 1.000000e+00 : f32
    %59 = vector.broadcast %cst_24 : f32 to vector<8x128xf32>
    %60 = arith.addf %59, %58 : vector<8x128xf32>
    %61 = arith.divf %59, %60 : vector<8x128xf32>
    %62 = vector.extract_strided_slice %51 {offsets = [0, 128], sizes = [8, 128], strides = [1, 1]} : vector<8x384xf32> to vector<8x128xf32>
    %63 = vector.extract_strided_slice %53 {offsets = [0, 128], sizes = [8, 128], strides = [1, 1]} : vector<8x384xf32> to vector<8x128xf32>
    %64 = arith.addf %62, %63 : vector<8x128xf32>
    %65 = arith.negf %64 : vector<8x128xf32>
    %66 = math.exp %65 : vector<8x128xf32>
    %cst_25 = arith.constant 1.000000e+00 : f32
    %67 = vector.broadcast %cst_25 : f32 to vector<8x128xf32>
    %68 = arith.addf %67, %66 : vector<8x128xf32>
    %69 = arith.divf %67, %68 : vector<8x128xf32>
    %70 = vector.extract_strided_slice %51 {offsets = [0, 256], sizes = [8, 128], strides = [1, 1]} : vector<8x384xf32> to vector<8x128xf32>
    %71 = vector.extract_strided_slice %53 {offsets = [0, 256], sizes = [8, 128], strides = [1, 1]} : vector<8x384xf32> to vector<8x128xf32>
    %72 = arith.mulf %61, %71 : vector<8x128xf32>
    %73 = arith.addf %70, %72 : vector<8x128xf32>
    %74 = math.tanh %73 : vector<8x128xf32>
    %cst_26 = arith.constant 1.000000e+00 : f32
    %75 = vector.broadcast %cst_26 : f32 to vector<8x128xf32>
    %76 = arith.subf %75, %69 : vector<8x128xf32>
    %77 = arith.mulf %76, %74 : vector<8x128xf32>
    %78 = arith.mulf %69, %16 : vector<8x128xf32>
    %79 = arith.addf %77, %78 : vector<8x128xf32>
    %80 = arith.addf %16, %79 : vector<8x128xf32>
    %c1_i32 = arith.constant 1 : i32
    %81 = arith.index_cast %c1_i32 : i32 to index
    %c0_27 = arith.constant 0 : index
    %c0_28 = arith.constant 0 : index
    %82 = vector.load %arg1[%81, %c0_27, %c0_28] : memref<7x8x128xf32, #tpu.memory_space<vmem>>, vector<1x8x128xf32>
    %83 = vector.shape_cast %82 : vector<1x8x128xf32> to vector<8x128xf32>
    %cst_29 = arith.constant dense<0.000000e+00> : vector<8x384xf32>
    %84 = tpu.matmul %83, %0, %cst_29 {dimension_numbers = #tpu.dot_dimension_numbers<[1], [0], [0], [1], [0, 0, 1, 1], [], []>} : vector<8x128xf32>, vector<128x384xf32>, vector<8x384xf32> -> vector<8x384xf32>
    %85 = arith.addf %84, %6 : vector<8x384xf32>
    %cst_30 = arith.constant dense<0.000000e+00> : vector<8x384xf32>
    %86 = tpu.matmul %49, %1, %cst_30 {dimension_numbers = #tpu.dot_dimension_numbers<[1], [0], [0], [1], [0, 0, 1, 1], [], []>} : vector<8x128xf32>, vector<128x384xf32>, vector<8x384xf32> -> vector<8x384xf32>
    %87 = arith.addf %86, %9 : vector<8x384xf32>
    %88 = vector.extract_strided_slice %85 {offsets = [0, 0], sizes = [8, 128], strides = [1, 1]} : vector<8x384xf32> to vector<8x128xf32>
    %89 = vector.extract_strided_slice %87 {offsets = [0, 0], sizes = [8, 128], strides = [1, 1]} : vector<8x384xf32> to vector<8x128xf32>
    %90 = arith.addf %88, %89 : vector<8x128xf32>
    %91 = arith.negf %90 : vector<8x128xf32>
    %92 = math.exp %91 : vector<8x128xf32>
    %cst_31 = arith.constant 1.000000e+00 : f32
    %93 = vector.broadcast %cst_31 : f32 to vector<8x128xf32>
    %94 = arith.addf %93, %92 : vector<8x128xf32>
    %95 = arith.divf %93, %94 : vector<8x128xf32>
    %96 = vector.extract_strided_slice %85 {offsets = [0, 128], sizes = [8, 128], strides = [1, 1]} : vector<8x384xf32> to vector<8x128xf32>
    %97 = vector.extract_strided_slice %87 {offsets = [0, 128], sizes = [8, 128], strides = [1, 1]} : vector<8x384xf32> to vector<8x128xf32>
    %98 = arith.addf %96, %97 : vector<8x128xf32>
    %99 = arith.negf %98 : vector<8x128xf32>
    %100 = math.exp %99 : vector<8x128xf32>
    %cst_32 = arith.constant 1.000000e+00 : f32
    %101 = vector.broadcast %cst_32 : f32 to vector<8x128xf32>
    %102 = arith.addf %101, %100 : vector<8x128xf32>
    %103 = arith.divf %101, %102 : vector<8x128xf32>
    %104 = vector.extract_strided_slice %85 {offsets = [0, 256], sizes = [8, 128], strides = [1, 1]} : vector<8x384xf32> to vector<8x128xf32>
    %105 = vector.extract_strided_slice %87 {offsets = [0, 256], sizes = [8, 128], strides = [1, 1]} : vector<8x384xf32> to vector<8x128xf32>
    %106 = arith.mulf %95, %105 : vector<8x128xf32>
    %107 = arith.addf %104, %106 : vector<8x128xf32>
    %108 = math.tanh %107 : vector<8x128xf32>
    %cst_33 = arith.constant 1.000000e+00 : f32
    %109 = vector.broadcast %cst_33 : f32 to vector<8x128xf32>
    %110 = arith.subf %109, %103 : vector<8x128xf32>
    %111 = arith.mulf %110, %108 : vector<8x128xf32>
    %112 = arith.mulf %103, %49 : vector<8x128xf32>
    %113 = arith.addf %111, %112 : vector<8x128xf32>
    %cst_34 = arith.constant dense<0.000000e+00> : vector<8x384xf32>
    %114 = tpu.matmul %113, %2, %cst_34 {dimension_numbers = #tpu.dot_dimension_numbers<[1], [0], [0], [1], [0, 0, 1, 1], [], []>} : vector<8x128xf32>, vector<128x384xf32>, vector<8x384xf32> -> vector<8x384xf32>
    %115 = arith.addf %114, %12 : vector<8x384xf32>
    %cst_35 = arith.constant dense<0.000000e+00> : vector<8x384xf32>
    %116 = tpu.matmul %79, %3, %cst_35 {dimension_numbers = #tpu.dot_dimension_numbers<[1], [0], [0], [1], [0, 0, 1, 1], [], []>} : vector<8x128xf32>, vector<128x384xf32>, vector<8x384xf32> -> vector<8x384xf32>
    %117 = arith.addf %116, %15 : vector<8x384xf32>
    %118 = vector.extract_strided_slice %115 {offsets = [0, 0], sizes = [8, 128], strides = [1, 1]} : vector<8x384xf32> to vector<8x128xf32>
    %119 = vector.extract_strided_slice %117 {offsets = [0, 0], sizes = [8, 128], strides = [1, 1]} : vector<8x384xf32> to vector<8x128xf32>
    %120 = arith.addf %118, %119 : vector<8x128xf32>
    %121 = arith.negf %120 : vector<8x128xf32>
    %122 = math.exp %121 : vector<8x128xf32>
    %cst_36 = arith.constant 1.000000e+00 : f32
    %123 = vector.broadcast %cst_36 : f32 to vector<8x128xf32>
    %124 = arith.addf %123, %122 : vector<8x128xf32>
    %125 = arith.divf %123, %124 : vector<8x128xf32>
    %126 = vector.extract_strided_slice %115 {offsets = [0, 128], sizes = [8, 128], strides = [1, 1]} : vector<8x384xf32> to vector<8x128xf32>
    %127 = vector.extract_strided_slice %117 {offsets = [0, 128], sizes = [8, 128], strides = [1, 1]} : vector<8x384xf32> to vector<8x128xf32>
    %128 = arith.addf %126, %127 : vector<8x128xf32>
    %129 = arith.negf %128 : vector<8x128xf32>
    %130 = math.exp %129 : vector<8x128xf32>
    %cst_37 = arith.constant 1.000000e+00 : f32
    %131 = vector.broadcast %cst_37 : f32 to vector<8x128xf32>
    %132 = arith.addf %131, %130 : vector<8x128xf32>
    %133 = arith.divf %131, %132 : vector<8x128xf32>
    %134 = vector.extract_strided_slice %115 {offsets = [0, 256], sizes = [8, 128], strides = [1, 1]} : vector<8x384xf32> to vector<8x128xf32>
    %135 = vector.extract_strided_slice %117 {offsets = [0, 256], sizes = [8, 128], strides = [1, 1]} : vector<8x384xf32> to vector<8x128xf32>
    %136 = arith.mulf %125, %135 : vector<8x128xf32>
    %137 = arith.addf %134, %136 : vector<8x128xf32>
    %138 = math.tanh %137 : vector<8x128xf32>
    %cst_38 = arith.constant 1.000000e+00 : f32
    %139 = vector.broadcast %cst_38 : f32 to vector<8x128xf32>
    %140 = arith.subf %139, %133 : vector<8x128xf32>
    %141 = arith.mulf %140, %138 : vector<8x128xf32>
    %142 = arith.mulf %133, %79 : vector<8x128xf32>
    %143 = arith.addf %141, %142 : vector<8x128xf32>
    %144 = arith.addf %80, %143 : vector<8x128xf32>
    %c2_i32 = arith.constant 2 : i32
    %145 = arith.index_cast %c2_i32 : i32 to index
    %c0_39 = arith.constant 0 : index
    %c0_40 = arith.constant 0 : index
    %146 = vector.load %arg1[%145, %c0_39, %c0_40] : memref<7x8x128xf32, #tpu.memory_space<vmem>>, vector<1x8x128xf32>
    %147 = vector.shape_cast %146 : vector<1x8x128xf32> to vector<8x128xf32>
    %cst_41 = arith.constant dense<0.000000e+00> : vector<8x384xf32>
    %148 = tpu.matmul %147, %0, %cst_41 {dimension_numbers = #tpu.dot_dimension_numbers<[1], [0], [0], [1], [0, 0, 1, 1], [], []>} : vector<8x128xf32>, vector<128x384xf32>, vector<8x384xf32> -> vector<8x384xf32>
    %149 = arith.addf %148, %6 : vector<8x384xf32>
    %cst_42 = arith.constant dense<0.000000e+00> : vector<8x384xf32>
    %150 = tpu.matmul %113, %1, %cst_42 {dimension_numbers = #tpu.dot_dimension_numbers<[1], [0], [0], [1], [0, 0, 1, 1], [], []>} : vector<8x128xf32>, vector<128x384xf32>, vector<8x384xf32> -> vector<8x384xf32>
    %151 = arith.addf %150, %9 : vector<8x384xf32>
    %152 = vector.extract_strided_slice %149 {offsets = [0, 0], sizes = [8, 128], strides = [1, 1]} : vector<8x384xf32> to vector<8x128xf32>
    %153 = vector.extract_strided_slice %151 {offsets = [0, 0], sizes = [8, 128], strides = [1, 1]} : vector<8x384xf32> to vector<8x128xf32>
    %154 = arith.addf %152, %153 : vector<8x128xf32>
    %155 = arith.negf %154 : vector<8x128xf32>
    %156 = math.exp %155 : vector<8x128xf32>
    %cst_43 = arith.constant 1.000000e+00 : f32
    %157 = vector.broadcast %cst_43 : f32 to vector<8x128xf32>
    %158 = arith.addf %157, %156 : vector<8x128xf32>
    %159 = arith.divf %157, %158 : vector<8x128xf32>
    %160 = vector.extract_strided_slice %149 {offsets = [0, 128], sizes = [8, 128], strides = [1, 1]} : vector<8x384xf32> to vector<8x128xf32>
    %161 = vector.extract_strided_slice %151 {offsets = [0, 128], sizes = [8, 128], strides = [1, 1]} : vector<8x384xf32> to vector<8x128xf32>
    %162 = arith.addf %160, %161 : vector<8x128xf32>
    %163 = arith.negf %162 : vector<8x128xf32>
    %164 = math.exp %163 : vector<8x128xf32>
    %cst_44 = arith.constant 1.000000e+00 : f32
    %165 = vector.broadcast %cst_44 : f32 to vector<8x128xf32>
    %166 = arith.addf %165, %164 : vector<8x128xf32>
    %167 = arith.divf %165, %166 : vector<8x128xf32>
    %168 = vector.extract_strided_slice %149 {offsets = [0, 256], sizes = [8, 128], strides = [1, 1]} : vector<8x384xf32> to vector<8x128xf32>
    %169 = vector.extract_strided_slice %151 {offsets = [0, 256], sizes = [8, 128], strides = [1, 1]} : vector<8x384xf32> to vector<8x128xf32>
    %170 = arith.mulf %159, %169 : vector<8x128xf32>
    %171 = arith.addf %168, %170 : vector<8x128xf32>
    %172 = math.tanh %171 : vector<8x128xf32>
    %cst_45 = arith.constant 1.000000e+00 : f32
    %173 = vector.broadcast %cst_45 : f32 to vector<8x128xf32>
    %174 = arith.subf %173, %167 : vector<8x128xf32>
    %175 = arith.mulf %174, %172 : vector<8x128xf32>
    %176 = arith.mulf %167, %113 : vector<8x128xf32>
    %177 = arith.addf %175, %176 : vector<8x128xf32>
    %cst_46 = arith.constant dense<0.000000e+00> : vector<8x384xf32>
    %178 = tpu.matmul %177, %2, %cst_46 {dimension_numbers = #tpu.dot_dimension_numbers<[1], [0], [0], [1], [0, 0, 1, 1], [], []>} : vector<8x128xf32>, vector<128x384xf32>, vector<8x384xf32> -> vector<8x384xf32>
    %179 = arith.addf %178, %12 : vector<8x384xf32>
    %cst_47 = arith.constant dense<0.000000e+00> : vector<8x384xf32>
    %180 = tpu.matmul %143, %3, %cst_47 {dimension_numbers = #tpu.dot_dimension_numbers<[1], [0], [0], [1], [0, 0, 1, 1], [], []>} : vector<8x128xf32>, vector<128x384xf32>, vector<8x384xf32> -> vector<8x384xf32>
    %181 = arith.addf %180, %15 : vector<8x384xf32>
    %182 = vector.extract_strided_slice %179 {offsets = [0, 0], sizes = [8, 128], strides = [1, 1]} : vector<8x384xf32> to vector<8x128xf32>
    %183 = vector.extract_strided_slice %181 {offsets = [0, 0], sizes = [8, 128], strides = [1, 1]} : vector<8x384xf32> to vector<8x128xf32>
    %184 = arith.addf %182, %183 : vector<8x128xf32>
    %185 = arith.negf %184 : vector<8x128xf32>
    %186 = math.exp %185 : vector<8x128xf32>
    %cst_48 = arith.constant 1.000000e+00 : f32
    %187 = vector.broadcast %cst_48 : f32 to vector<8x128xf32>
    %188 = arith.addf %187, %186 : vector<8x128xf32>
    %189 = arith.divf %187, %188 : vector<8x128xf32>
    %190 = vector.extract_strided_slice %179 {offsets = [0, 128], sizes = [8, 128], strides = [1, 1]} : vector<8x384xf32> to vector<8x128xf32>
    %191 = vector.extract_strided_slice %181 {offsets = [0, 128], sizes = [8, 128], strides = [1, 1]} : vector<8x384xf32> to vector<8x128xf32>
    %192 = arith.addf %190, %191 : vector<8x128xf32>
    %193 = arith.negf %192 : vector<8x128xf32>
    %194 = math.exp %193 : vector<8x128xf32>
    %cst_49 = arith.constant 1.000000e+00 : f32
    %195 = vector.broadcast %cst_49 : f32 to vector<8x128xf32>
    %196 = arith.addf %195, %194 : vector<8x128xf32>
    %197 = arith.divf %195, %196 : vector<8x128xf32>
    %198 = vector.extract_strided_slice %179 {offsets = [0, 256], sizes = [8, 128], strides = [1, 1]} : vector<8x384xf32> to vector<8x128xf32>
    %199 = vector.extract_strided_slice %181 {offsets = [0, 256], sizes = [8, 128], strides = [1, 1]} : vector<8x384xf32> to vector<8x128xf32>
    %200 = arith.mulf %189, %199 : vector<8x128xf32>
    %201 = arith.addf %198, %200 : vector<8x128xf32>
    %202 = math.tanh %201 : vector<8x128xf32>
    %cst_50 = arith.constant 1.000000e+00 : f32
    %203 = vector.broadcast %cst_50 : f32 to vector<8x128xf32>
    %204 = arith.subf %203, %197 : vector<8x128xf32>
    %205 = arith.mulf %204, %202 : vector<8x128xf32>
    %206 = arith.mulf %197, %143 : vector<8x128xf32>
    %207 = arith.addf %205, %206 : vector<8x128xf32>
    %208 = arith.addf %144, %207 : vector<8x128xf32>
    %c3_i32 = arith.constant 3 : i32
    %209 = arith.index_cast %c3_i32 : i32 to index
    %c0_51 = arith.constant 0 : index
    %c0_52 = arith.constant 0 : index
    %210 = vector.load %arg1[%209, %c0_51, %c0_52] : memref<7x8x128xf32, #tpu.memory_space<vmem>>, vector<1x8x128xf32>
    %211 = vector.shape_cast %210 : vector<1x8x128xf32> to vector<8x128xf32>
    %cst_53 = arith.constant dense<0.000000e+00> : vector<8x384xf32>
    %212 = tpu.matmul %211, %0, %cst_53 {dimension_numbers = #tpu.dot_dimension_numbers<[1], [0], [0], [1], [0, 0, 1, 1], [], []>} : vector<8x128xf32>, vector<128x384xf32>, vector<8x384xf32> -> vector<8x384xf32>
    %213 = arith.addf %212, %6 : vector<8x384xf32>
    %cst_54 = arith.constant dense<0.000000e+00> : vector<8x384xf32>
    %214 = tpu.matmul %177, %1, %cst_54 {dimension_numbers = #tpu.dot_dimension_numbers<[1], [0], [0], [1], [0, 0, 1, 1], [], []>} : vector<8x128xf32>, vector<128x384xf32>, vector<8x384xf32> -> vector<8x384xf32>
    %215 = arith.addf %214, %9 : vector<8x384xf32>
    %216 = vector.extract_strided_slice %213 {offsets = [0, 0], sizes = [8, 128], strides = [1, 1]} : vector<8x384xf32> to vector<8x128xf32>
    %217 = vector.extract_strided_slice %215 {offsets = [0, 0], sizes = [8, 128], strides = [1, 1]} : vector<8x384xf32> to vector<8x128xf32>
    %218 = arith.addf %216, %217 : vector<8x128xf32>
    %219 = arith.negf %218 : vector<8x128xf32>
    %220 = math.exp %219 : vector<8x128xf32>
    %cst_55 = arith.constant 1.000000e+00 : f32
    %221 = vector.broadcast %cst_55 : f32 to vector<8x128xf32>
    %222 = arith.addf %221, %220 : vector<8x128xf32>
    %223 = arith.divf %221, %222 : vector<8x128xf32>
    %224 = vector.extract_strided_slice %213 {offsets = [0, 128], sizes = [8, 128], strides = [1, 1]} : vector<8x384xf32> to vector<8x128xf32>
    %225 = vector.extract_strided_slice %215 {offsets = [0, 128], sizes = [8, 128], strides = [1, 1]} : vector<8x384xf32> to vector<8x128xf32>
    %226 = arith.addf %224, %225 : vector<8x128xf32>
    %227 = arith.negf %226 : vector<8x128xf32>
    %228 = math.exp %227 : vector<8x128xf32>
    %cst_56 = arith.constant 1.000000e+00 : f32
    %229 = vector.broadcast %cst_56 : f32 to vector<8x128xf32>
    %230 = arith.addf %229, %228 : vector<8x128xf32>
    %231 = arith.divf %229, %230 : vector<8x128xf32>
    %232 = vector.extract_strided_slice %213 {offsets = [0, 256], sizes = [8, 128], strides = [1, 1]} : vector<8x384xf32> to vector<8x128xf32>
    %233 = vector.extract_strided_slice %215 {offsets = [0, 256], sizes = [8, 128], strides = [1, 1]} : vector<8x384xf32> to vector<8x128xf32>
    %234 = arith.mulf %223, %233 : vector<8x128xf32>
    %235 = arith.addf %232, %234 : vector<8x128xf32>
    %236 = math.tanh %235 : vector<8x128xf32>
    %cst_57 = arith.constant 1.000000e+00 : f32
    %237 = vector.broadcast %cst_57 : f32 to vector<8x128xf32>
    %238 = arith.subf %237, %231 : vector<8x128xf32>
    %239 = arith.mulf %238, %236 : vector<8x128xf32>
    %240 = arith.mulf %231, %177 : vector<8x128xf32>
    %241 = arith.addf %239, %240 : vector<8x128xf32>
    %cst_58 = arith.constant dense<0.000000e+00> : vector<8x384xf32>
    %242 = tpu.matmul %241, %2, %cst_58 {dimension_numbers = #tpu.dot_dimension_numbers<[1], [0], [0], [1], [0, 0, 1, 1], [], []>} : vector<8x128xf32>, vector<128x384xf32>, vector<8x384xf32> -> vector<8x384xf32>
    %243 = arith.addf %242, %12 : vector<8x384xf32>
    %cst_59 = arith.constant dense<0.000000e+00> : vector<8x384xf32>
    %244 = tpu.matmul %207, %3, %cst_59 {dimension_numbers = #tpu.dot_dimension_numbers<[1], [0], [0], [1], [0, 0, 1, 1], [], []>} : vector<8x128xf32>, vector<128x384xf32>, vector<8x384xf32> -> vector<8x384xf32>
    %245 = arith.addf %244, %15 : vector<8x384xf32>
    %246 = vector.extract_strided_slice %243 {offsets = [0, 0], sizes = [8, 128], strides = [1, 1]} : vector<8x384xf32> to vector<8x128xf32>
    %247 = vector.extract_strided_slice %245 {offsets = [0, 0], sizes = [8, 128], strides = [1, 1]} : vector<8x384xf32> to vector<8x128xf32>
    %248 = arith.addf %246, %247 : vector<8x128xf32>
    %249 = arith.negf %248 : vector<8x128xf32>
    %250 = math.exp %249 : vector<8x128xf32>
    %cst_60 = arith.constant 1.000000e+00 : f32
    %251 = vector.broadcast %cst_60 : f32 to vector<8x128xf32>
    %252 = arith.addf %251, %250 : vector<8x128xf32>
    %253 = arith.divf %251, %252 : vector<8x128xf32>
    %254 = vector.extract_strided_slice %243 {offsets = [0, 128], sizes = [8, 128], strides = [1, 1]} : vector<8x384xf32> to vector<8x128xf32>
    %255 = vector.extract_strided_slice %245 {offsets = [0, 128], sizes = [8, 128], strides = [1, 1]} : vector<8x384xf32> to vector<8x128xf32>
    %256 = arith.addf %254, %255 : vector<8x128xf32>
    %257 = arith.negf %256 : vector<8x128xf32>
    %258 = math.exp %257 : vector<8x128xf32>
    %cst_61 = arith.constant 1.000000e+00 : f32
    %259 = vector.broadcast %cst_61 : f32 to vector<8x128xf32>
    %260 = arith.addf %259, %258 : vector<8x128xf32>
    %261 = arith.divf %259, %260 : vector<8x128xf32>
    %262 = vector.extract_strided_slice %243 {offsets = [0, 256], sizes = [8, 128], strides = [1, 1]} : vector<8x384xf32> to vector<8x128xf32>
    %263 = vector.extract_strided_slice %245 {offsets = [0, 256], sizes = [8, 128], strides = [1, 1]} : vector<8x384xf32> to vector<8x128xf32>
    %264 = arith.mulf %253, %263 : vector<8x128xf32>
    %265 = arith.addf %262, %264 : vector<8x128xf32>
    %266 = math.tanh %265 : vector<8x128xf32>
    %cst_62 = arith.constant 1.000000e+00 : f32
    %267 = vector.broadcast %cst_62 : f32 to vector<8x128xf32>
    %268 = arith.subf %267, %261 : vector<8x128xf32>
    %269 = arith.mulf %268, %266 : vector<8x128xf32>
    %270 = arith.mulf %261, %207 : vector<8x128xf32>
    %271 = arith.addf %269, %270 : vector<8x128xf32>
    %272 = arith.addf %208, %271 : vector<8x128xf32>
    %c4_i32 = arith.constant 4 : i32
    %273 = arith.index_cast %c4_i32 : i32 to index
    %c0_63 = arith.constant 0 : index
    %c0_64 = arith.constant 0 : index
    %274 = vector.load %arg1[%273, %c0_63, %c0_64] : memref<7x8x128xf32, #tpu.memory_space<vmem>>, vector<1x8x128xf32>
    %275 = vector.shape_cast %274 : vector<1x8x128xf32> to vector<8x128xf32>
    %cst_65 = arith.constant dense<0.000000e+00> : vector<8x384xf32>
    %276 = tpu.matmul %275, %0, %cst_65 {dimension_numbers = #tpu.dot_dimension_numbers<[1], [0], [0], [1], [0, 0, 1, 1], [], []>} : vector<8x128xf32>, vector<128x384xf32>, vector<8x384xf32> -> vector<8x384xf32>
    %277 = arith.addf %276, %6 : vector<8x384xf32>
    %cst_66 = arith.constant dense<0.000000e+00> : vector<8x384xf32>
    %278 = tpu.matmul %241, %1, %cst_66 {dimension_numbers = #tpu.dot_dimension_numbers<[1], [0], [0], [1], [0, 0, 1, 1], [], []>} : vector<8x128xf32>, vector<128x384xf32>, vector<8x384xf32> -> vector<8x384xf32>
    %279 = arith.addf %278, %9 : vector<8x384xf32>
    %280 = vector.extract_strided_slice %277 {offsets = [0, 0], sizes = [8, 128], strides = [1, 1]} : vector<8x384xf32> to vector<8x128xf32>
    %281 = vector.extract_strided_slice %279 {offsets = [0, 0], sizes = [8, 128], strides = [1, 1]} : vector<8x384xf32> to vector<8x128xf32>
    %282 = arith.addf %280, %281 : vector<8x128xf32>
    %283 = arith.negf %282 : vector<8x128xf32>
    %284 = math.exp %283 : vector<8x128xf32>
    %cst_67 = arith.constant 1.000000e+00 : f32
    %285 = vector.broadcast %cst_67 : f32 to vector<8x128xf32>
    %286 = arith.addf %285, %284 : vector<8x128xf32>
    %287 = arith.divf %285, %286 : vector<8x128xf32>
    %288 = vector.extract_strided_slice %277 {offsets = [0, 128], sizes = [8, 128], strides = [1, 1]} : vector<8x384xf32> to vector<8x128xf32>
    %289 = vector.extract_strided_slice %279 {offsets = [0, 128], sizes = [8, 128], strides = [1, 1]} : vector<8x384xf32> to vector<8x128xf32>
    %290 = arith.addf %288, %289 : vector<8x128xf32>
    %291 = arith.negf %290 : vector<8x128xf32>
    %292 = math.exp %291 : vector<8x128xf32>
    %cst_68 = arith.constant 1.000000e+00 : f32
    %293 = vector.broadcast %cst_68 : f32 to vector<8x128xf32>
    %294 = arith.addf %293, %292 : vector<8x128xf32>
    %295 = arith.divf %293, %294 : vector<8x128xf32>
    %296 = vector.extract_strided_slice %277 {offsets = [0, 256], sizes = [8, 128], strides = [1, 1]} : vector<8x384xf32> to vector<8x128xf32>
    %297 = vector.extract_strided_slice %279 {offsets = [0, 256], sizes = [8, 128], strides = [1, 1]} : vector<8x384xf32> to vector<8x128xf32>
    %298 = arith.mulf %287, %297 : vector<8x128xf32>
    %299 = arith.addf %296, %298 : vector<8x128xf32>
    %300 = math.tanh %299 : vector<8x128xf32>
    %cst_69 = arith.constant 1.000000e+00 : f32
    %301 = vector.broadcast %cst_69 : f32 to vector<8x128xf32>
    %302 = arith.subf %301, %295 : vector<8x128xf32>
    %303 = arith.mulf %302, %300 : vector<8x128xf32>
    %304 = arith.mulf %295, %241 : vector<8x128xf32>
    %305 = arith.addf %303, %304 : vector<8x128xf32>
    %cst_70 = arith.constant dense<0.000000e+00> : vector<8x384xf32>
    %306 = tpu.matmul %305, %2, %cst_70 {dimension_numbers = #tpu.dot_dimension_numbers<[1], [0], [0], [1], [0, 0, 1, 1], [], []>} : vector<8x128xf32>, vector<128x384xf32>, vector<8x384xf32> -> vector<8x384xf32>
    %307 = arith.addf %306, %12 : vector<8x384xf32>
    %cst_71 = arith.constant dense<0.000000e+00> : vector<8x384xf32>
    %308 = tpu.matmul %271, %3, %cst_71 {dimension_numbers = #tpu.dot_dimension_numbers<[1], [0], [0], [1], [0, 0, 1, 1], [], []>} : vector<8x128xf32>, vector<128x384xf32>, vector<8x384xf32> -> vector<8x384xf32>
    %309 = arith.addf %308, %15 : vector<8x384xf32>
    %310 = vector.extract_strided_slice %307 {offsets = [0, 0], sizes = [8, 128], strides = [1, 1]} : vector<8x384xf32> to vector<8x128xf32>
    %311 = vector.extract_strided_slice %309 {offsets = [0, 0], sizes = [8, 128], strides = [1, 1]} : vector<8x384xf32> to vector<8x128xf32>
    %312 = arith.addf %310, %311 : vector<8x128xf32>
    %313 = arith.negf %312 : vector<8x128xf32>
    %314 = math.exp %313 : vector<8x128xf32>
    %cst_72 = arith.constant 1.000000e+00 : f32
    %315 = vector.broadcast %cst_72 : f32 to vector<8x128xf32>
    %316 = arith.addf %315, %314 : vector<8x128xf32>
    %317 = arith.divf %315, %316 : vector<8x128xf32>
    %318 = vector.extract_strided_slice %307 {offsets = [0, 128], sizes = [8, 128], strides = [1, 1]} : vector<8x384xf32> to vector<8x128xf32>
    %319 = vector.extract_strided_slice %309 {offsets = [0, 128], sizes = [8, 128], strides = [1, 1]} : vector<8x384xf32> to vector<8x128xf32>
    %320 = arith.addf %318, %319 : vector<8x128xf32>
    %321 = arith.negf %320 : vector<8x128xf32>
    %322 = math.exp %321 : vector<8x128xf32>
    %cst_73 = arith.constant 1.000000e+00 : f32
    %323 = vector.broadcast %cst_73 : f32 to vector<8x128xf32>
    %324 = arith.addf %323, %322 : vector<8x128xf32>
    %325 = arith.divf %323, %324 : vector<8x128xf32>
    %326 = vector.extract_strided_slice %307 {offsets = [0, 256], sizes = [8, 128], strides = [1, 1]} : vector<8x384xf32> to vector<8x128xf32>
    %327 = vector.extract_strided_slice %309 {offsets = [0, 256], sizes = [8, 128], strides = [1, 1]} : vector<8x384xf32> to vector<8x128xf32>
    %328 = arith.mulf %317, %327 : vector<8x128xf32>
    %329 = arith.addf %326, %328 : vector<8x128xf32>
    %330 = math.tanh %329 : vector<8x128xf32>
    %cst_74 = arith.constant 1.000000e+00 : f32
    %331 = vector.broadcast %cst_74 : f32 to vector<8x128xf32>
    %332 = arith.subf %331, %325 : vector<8x128xf32>
    %333 = arith.mulf %332, %330 : vector<8x128xf32>
    %334 = arith.mulf %325, %271 : vector<8x128xf32>
    %335 = arith.addf %333, %334 : vector<8x128xf32>
    %336 = arith.addf %272, %335 : vector<8x128xf32>
    %c5_i32 = arith.constant 5 : i32
    %337 = arith.index_cast %c5_i32 : i32 to index
    %c0_75 = arith.constant 0 : index
    %c0_76 = arith.constant 0 : index
    %338 = vector.load %arg1[%337, %c0_75, %c0_76] : memref<7x8x128xf32, #tpu.memory_space<vmem>>, vector<1x8x128xf32>
    %339 = vector.shape_cast %338 : vector<1x8x128xf32> to vector<8x128xf32>
    %cst_77 = arith.constant dense<0.000000e+00> : vector<8x384xf32>
    %340 = tpu.matmul %339, %0, %cst_77 {dimension_numbers = #tpu.dot_dimension_numbers<[1], [0], [0], [1], [0, 0, 1, 1], [], []>} : vector<8x128xf32>, vector<128x384xf32>, vector<8x384xf32> -> vector<8x384xf32>
    %341 = arith.addf %340, %6 : vector<8x384xf32>
    %cst_78 = arith.constant dense<0.000000e+00> : vector<8x384xf32>
    %342 = tpu.matmul %305, %1, %cst_78 {dimension_numbers = #tpu.dot_dimension_numbers<[1], [0], [0], [1], [0, 0, 1, 1], [], []>} : vector<8x128xf32>, vector<128x384xf32>, vector<8x384xf32> -> vector<8x384xf32>
    %343 = arith.addf %342, %9 : vector<8x384xf32>
    %344 = vector.extract_strided_slice %341 {offsets = [0, 0], sizes = [8, 128], strides = [1, 1]} : vector<8x384xf32> to vector<8x128xf32>
    %345 = vector.extract_strided_slice %343 {offsets = [0, 0], sizes = [8, 128], strides = [1, 1]} : vector<8x384xf32> to vector<8x128xf32>
    %346 = arith.addf %344, %345 : vector<8x128xf32>
    %347 = arith.negf %346 : vector<8x128xf32>
    %348 = math.exp %347 : vector<8x128xf32>
    %cst_79 = arith.constant 1.000000e+00 : f32
    %349 = vector.broadcast %cst_79 : f32 to vector<8x128xf32>
    %350 = arith.addf %349, %348 : vector<8x128xf32>
    %351 = arith.divf %349, %350 : vector<8x128xf32>
    %352 = vector.extract_strided_slice %341 {offsets = [0, 128], sizes = [8, 128], strides = [1, 1]} : vector<8x384xf32> to vector<8x128xf32>
    %353 = vector.extract_strided_slice %343 {offsets = [0, 128], sizes = [8, 128], strides = [1, 1]} : vector<8x384xf32> to vector<8x128xf32>
    %354 = arith.addf %352, %353 : vector<8x128xf32>
    %355 = arith.negf %354 : vector<8x128xf32>
    %356 = math.exp %355 : vector<8x128xf32>
    %cst_80 = arith.constant 1.000000e+00 : f32
    %357 = vector.broadcast %cst_80 : f32 to vector<8x128xf32>
    %358 = arith.addf %357, %356 : vector<8x128xf32>
    %359 = arith.divf %357, %358 : vector<8x128xf32>
    %360 = vector.extract_strided_slice %341 {offsets = [0, 256], sizes = [8, 128], strides = [1, 1]} : vector<8x384xf32> to vector<8x128xf32>
    %361 = vector.extract_strided_slice %343 {offsets = [0, 256], sizes = [8, 128], strides = [1, 1]} : vector<8x384xf32> to vector<8x128xf32>
    %362 = arith.mulf %351, %361 : vector<8x128xf32>
    %363 = arith.addf %360, %362 : vector<8x128xf32>
    %364 = math.tanh %363 : vector<8x128xf32>
    %cst_81 = arith.constant 1.000000e+00 : f32
    %365 = vector.broadcast %cst_81 : f32 to vector<8x128xf32>
    %366 = arith.subf %365, %359 : vector<8x128xf32>
    %367 = arith.mulf %366, %364 : vector<8x128xf32>
    %368 = arith.mulf %359, %305 : vector<8x128xf32>
    %369 = arith.addf %367, %368 : vector<8x128xf32>
    %cst_82 = arith.constant dense<0.000000e+00> : vector<8x384xf32>
    %370 = tpu.matmul %369, %2, %cst_82 {dimension_numbers = #tpu.dot_dimension_numbers<[1], [0], [0], [1], [0, 0, 1, 1], [], []>} : vector<8x128xf32>, vector<128x384xf32>, vector<8x384xf32> -> vector<8x384xf32>
    %371 = arith.addf %370, %12 : vector<8x384xf32>
    %cst_83 = arith.constant dense<0.000000e+00> : vector<8x384xf32>
    %372 = tpu.matmul %335, %3, %cst_83 {dimension_numbers = #tpu.dot_dimension_numbers<[1], [0], [0], [1], [0, 0, 1, 1], [], []>} : vector<8x128xf32>, vector<128x384xf32>, vector<8x384xf32> -> vector<8x384xf32>
    %373 = arith.addf %372, %15 : vector<8x384xf32>
    %374 = vector.extract_strided_slice %371 {offsets = [0, 0], sizes = [8, 128], strides = [1, 1]} : vector<8x384xf32> to vector<8x128xf32>
    %375 = vector.extract_strided_slice %373 {offsets = [0, 0], sizes = [8, 128], strides = [1, 1]} : vector<8x384xf32> to vector<8x128xf32>
    %376 = arith.addf %374, %375 : vector<8x128xf32>
    %377 = arith.negf %376 : vector<8x128xf32>
    %378 = math.exp %377 : vector<8x128xf32>
    %cst_84 = arith.constant 1.000000e+00 : f32
    %379 = vector.broadcast %cst_84 : f32 to vector<8x128xf32>
    %380 = arith.addf %379, %378 : vector<8x128xf32>
    %381 = arith.divf %379, %380 : vector<8x128xf32>
    %382 = vector.extract_strided_slice %371 {offsets = [0, 128], sizes = [8, 128], strides = [1, 1]} : vector<8x384xf32> to vector<8x128xf32>
    %383 = vector.extract_strided_slice %373 {offsets = [0, 128], sizes = [8, 128], strides = [1, 1]} : vector<8x384xf32> to vector<8x128xf32>
    %384 = arith.addf %382, %383 : vector<8x128xf32>
    %385 = arith.negf %384 : vector<8x128xf32>
    %386 = math.exp %385 : vector<8x128xf32>
    %cst_85 = arith.constant 1.000000e+00 : f32
    %387 = vector.broadcast %cst_85 : f32 to vector<8x128xf32>
    %388 = arith.addf %387, %386 : vector<8x128xf32>
    %389 = arith.divf %387, %388 : vector<8x128xf32>
    %390 = vector.extract_strided_slice %371 {offsets = [0, 256], sizes = [8, 128], strides = [1, 1]} : vector<8x384xf32> to vector<8x128xf32>
    %391 = vector.extract_strided_slice %373 {offsets = [0, 256], sizes = [8, 128], strides = [1, 1]} : vector<8x384xf32> to vector<8x128xf32>
    %392 = arith.mulf %381, %391 : vector<8x128xf32>
    %393 = arith.addf %390, %392 : vector<8x128xf32>
    %394 = math.tanh %393 : vector<8x128xf32>
    %cst_86 = arith.constant 1.000000e+00 : f32
    %395 = vector.broadcast %cst_86 : f32 to vector<8x128xf32>
    %396 = arith.subf %395, %389 : vector<8x128xf32>
    %397 = arith.mulf %396, %394 : vector<8x128xf32>
    %398 = arith.mulf %389, %335 : vector<8x128xf32>
    %399 = arith.addf %397, %398 : vector<8x128xf32>
    %400 = arith.addf %336, %399 : vector<8x128xf32>
    %c6_i32 = arith.constant 6 : i32
    %401 = arith.index_cast %c6_i32 : i32 to index
    %c0_87 = arith.constant 0 : index
    %c0_88 = arith.constant 0 : index
    %402 = vector.load %arg1[%401, %c0_87, %c0_88] : memref<7x8x128xf32, #tpu.memory_space<vmem>>, vector<1x8x128xf32>
    %403 = vector.shape_cast %402 : vector<1x8x128xf32> to vector<8x128xf32>
    %cst_89 = arith.constant dense<0.000000e+00> : vector<8x384xf32>
    %404 = tpu.matmul %403, %0, %cst_89 {dimension_numbers = #tpu.dot_dimension_numbers<[1], [0], [0], [1], [0, 0, 1, 1], [], []>} : vector<8x128xf32>, vector<128x384xf32>, vector<8x384xf32> -> vector<8x384xf32>
    %405 = arith.addf %404, %6 : vector<8x384xf32>
    %cst_90 = arith.constant dense<0.000000e+00> : vector<8x384xf32>
    %406 = tpu.matmul %369, %1, %cst_90 {dimension_numbers = #tpu.dot_dimension_numbers<[1], [0], [0], [1], [0, 0, 1, 1], [], []>} : vector<8x128xf32>, vector<128x384xf32>, vector<8x384xf32> -> vector<8x384xf32>
    %407 = arith.addf %406, %9 : vector<8x384xf32>
    %408 = vector.extract_strided_slice %405 {offsets = [0, 0], sizes = [8, 128], strides = [1, 1]} : vector<8x384xf32> to vector<8x128xf32>
    %409 = vector.extract_strided_slice %407 {offsets = [0, 0], sizes = [8, 128], strides = [1, 1]} : vector<8x384xf32> to vector<8x128xf32>
    %410 = arith.addf %408, %409 : vector<8x128xf32>
    %411 = arith.negf %410 : vector<8x128xf32>
    %412 = math.exp %411 : vector<8x128xf32>
    %cst_91 = arith.constant 1.000000e+00 : f32
    %413 = vector.broadcast %cst_91 : f32 to vector<8x128xf32>
    %414 = arith.addf %413, %412 : vector<8x128xf32>
    %415 = arith.divf %413, %414 : vector<8x128xf32>
    %416 = vector.extract_strided_slice %405 {offsets = [0, 128], sizes = [8, 128], strides = [1, 1]} : vector<8x384xf32> to vector<8x128xf32>
    %417 = vector.extract_strided_slice %407 {offsets = [0, 128], sizes = [8, 128], strides = [1, 1]} : vector<8x384xf32> to vector<8x128xf32>
    %418 = arith.addf %416, %417 : vector<8x128xf32>
    %419 = arith.negf %418 : vector<8x128xf32>
    %420 = math.exp %419 : vector<8x128xf32>
    %cst_92 = arith.constant 1.000000e+00 : f32
    %421 = vector.broadcast %cst_92 : f32 to vector<8x128xf32>
    %422 = arith.addf %421, %420 : vector<8x128xf32>
    %423 = arith.divf %421, %422 : vector<8x128xf32>
    %424 = vector.extract_strided_slice %405 {offsets = [0, 256], sizes = [8, 128], strides = [1, 1]} : vector<8x384xf32> to vector<8x128xf32>
    %425 = vector.extract_strided_slice %407 {offsets = [0, 256], sizes = [8, 128], strides = [1, 1]} : vector<8x384xf32> to vector<8x128xf32>
    %426 = arith.mulf %415, %425 : vector<8x128xf32>
    %427 = arith.addf %424, %426 : vector<8x128xf32>
    %428 = math.tanh %427 : vector<8x128xf32>
    %cst_93 = arith.constant 1.000000e+00 : f32
    %429 = vector.broadcast %cst_93 : f32 to vector<8x128xf32>
    %430 = arith.subf %429, %423 : vector<8x128xf32>
    %431 = arith.mulf %430, %428 : vector<8x128xf32>
    %432 = arith.mulf %423, %369 : vector<8x128xf32>
    %433 = arith.addf %431, %432 : vector<8x128xf32>
    %cst_94 = arith.constant dense<0.000000e+00> : vector<8x384xf32>
    %434 = tpu.matmul %433, %2, %cst_94 {dimension_numbers = #tpu.dot_dimension_numbers<[1], [0], [0], [1], [0, 0, 1, 1], [], []>} : vector<8x128xf32>, vector<128x384xf32>, vector<8x384xf32> -> vector<8x384xf32>
    %435 = arith.addf %434, %12 : vector<8x384xf32>
    %cst_95 = arith.constant dense<0.000000e+00> : vector<8x384xf32>
    %436 = tpu.matmul %399, %3, %cst_95 {dimension_numbers = #tpu.dot_dimension_numbers<[1], [0], [0], [1], [0, 0, 1, 1], [], []>} : vector<8x128xf32>, vector<128x384xf32>, vector<8x384xf32> -> vector<8x384xf32>
    %437 = arith.addf %436, %15 : vector<8x384xf32>
    %438 = vector.extract_strided_slice %435 {offsets = [0, 0], sizes = [8, 128], strides = [1, 1]} : vector<8x384xf32> to vector<8x128xf32>
    %439 = vector.extract_strided_slice %437 {offsets = [0, 0], sizes = [8, 128], strides = [1, 1]} : vector<8x384xf32> to vector<8x128xf32>
    %440 = arith.addf %438, %439 : vector<8x128xf32>
    %441 = arith.negf %440 : vector<8x128xf32>
    %442 = math.exp %441 : vector<8x128xf32>
    %cst_96 = arith.constant 1.000000e+00 : f32
    %443 = vector.broadcast %cst_96 : f32 to vector<8x128xf32>
    %444 = arith.addf %443, %442 : vector<8x128xf32>
    %445 = arith.divf %443, %444 : vector<8x128xf32>
    %446 = vector.extract_strided_slice %435 {offsets = [0, 128], sizes = [8, 128], strides = [1, 1]} : vector<8x384xf32> to vector<8x128xf32>
    %447 = vector.extract_strided_slice %437 {offsets = [0, 128], sizes = [8, 128], strides = [1, 1]} : vector<8x384xf32> to vector<8x128xf32>
    %448 = arith.addf %446, %447 : vector<8x128xf32>
    %449 = arith.negf %448 : vector<8x128xf32>
    %450 = math.exp %449 : vector<8x128xf32>
    %cst_97 = arith.constant 1.000000e+00 : f32
    %451 = vector.broadcast %cst_97 : f32 to vector<8x128xf32>
    %452 = arith.addf %451, %450 : vector<8x128xf32>
    %453 = arith.divf %451, %452 : vector<8x128xf32>
    %454 = vector.extract_strided_slice %435 {offsets = [0, 256], sizes = [8, 128], strides = [1, 1]} : vector<8x384xf32> to vector<8x128xf32>
    %455 = vector.extract_strided_slice %437 {offsets = [0, 256], sizes = [8, 128], strides = [1, 1]} : vector<8x384xf32> to vector<8x128xf32>
    %456 = arith.mulf %445, %455 : vector<8x128xf32>
    %457 = arith.addf %454, %456 : vector<8x128xf32>
    %458 = math.tanh %457 : vector<8x128xf32>
    %cst_98 = arith.constant 1.000000e+00 : f32
    %459 = vector.broadcast %cst_98 : f32 to vector<8x128xf32>
    %460 = arith.subf %459, %453 : vector<8x128xf32>
    %461 = arith.mulf %460, %458 : vector<8x128xf32>
    %462 = arith.mulf %453, %399 : vector<8x128xf32>
    %463 = arith.addf %461, %462 : vector<8x128xf32>
    %464 = arith.addf %400, %463 : vector<8x128xf32>
    %c7_i32 = arith.constant 7 : i32
    %cst_99 = arith.constant 0.142857149 : f32
    %465 = vector.broadcast %cst_99 : f32 to vector<8x128xf32>
    %466 = arith.mulf %464, %465 : vector<8x128xf32>
    %c0_100 = arith.constant 0 : index
    %c0_101 = arith.constant 0 : index
    %467 = vector.load %arg10[%c0_100, %c0_101] : memref<8x128xf32, #tpu.memory_space<vmem>>, vector<8x128xf32>
    tpu.vector_store %arg10[%c0_100, %c0_101], %466 {strides = array<i32>} : memref<8x128xf32, #tpu.memory_space<vmem>>, vector<8x128xf32>,
    return
  }
  func.func @transform_0(%arg0: i32) -> (i32, i32, i32) {
    %c0_i32 = arith.constant 0 : i32
    %c0_i32_0 = arith.constant 0 : i32
    %c0_i32_1 = arith.constant 0 : i32
    return %c0_i32, %arg0, %c0_i32_0 : i32, i32, i32
  }
  func.func @transform_1(%arg0: i32) -> (i32, i32) {
    %c0_i32 = arith.constant 0 : i32
    %c0_i32_0 = arith.constant 0 : i32
    %c0_i32_1 = arith.constant 0 : i32
    return %c0_i32, %c0_i32_0 : i32, i32
  }
  func.func @transform_2(%arg0: i32) -> (i32, i32) {
    %c0_i32 = arith.constant 0 : i32
    %c0_i32_0 = arith.constant 0 : i32
    %c0_i32_1 = arith.constant 0 : i32
    return %c0_i32, %c0_i32_0 : i32, i32
  }
  func.func @transform_3(%arg0: i32) -> (i32, i32) {
    %c0_i32 = arith.constant 0 : i32
    %c0_i32_0 = arith.constant 0 : i32
    %c0_i32_1 = arith.constant 0 : i32
    return %c0_i32, %c0_i32_0 : i32, i32
  }
  func.func @transform_4(%arg0: i32) -> (i32, i32) {
    %c0_i32 = arith.constant 0 : i32
    %c0_i32_0 = arith.constant 0 : i32
    %c0_i32_1 = arith.constant 0 : i32
    return %c0_i32, %c0_i32_0 : i32, i32
  }
  func.func @transform_5(%arg0: i32) -> (i32, i32) {
    %c0_i32 = arith.constant 0 : i32
    %c0_i32_0 = arith.constant 0 : i32
    %c0_i32_1 = arith.constant 0 : i32
    return %c0_i32, %c0_i32_0 : i32, i32
  }
  func.func @transform_6(%arg0: i32) -> (i32, i32) {
    %c0_i32 = arith.constant 0 : i32
    %c0_i32_0 = arith.constant 0 : i32
    %c0_i32_1 = arith.constant 0 : i32
    return %c0_i32, %c0_i32_0 : i32, i32
  }
  func.func @transform_7(%arg0: i32) -> (i32, i32) {
    %c0_i32 = arith.constant 0 : i32
    %c0_i32_0 = arith.constant 0 : i32
    %c0_i32_1 = arith.constant 0 : i32
    return %c0_i32, %c0_i32_0 : i32, i32
  }
  func.func @transform_8(%arg0: i32) -> (i32, i32) {
    %c0_i32 = arith.constant 0 : i32
    %c0_i32_0 = arith.constant 0 : i32
    %c0_i32_1 = arith.constant 0 : i32
    return %c0_i32, %c0_i32_0 : i32, i32
  }
  func.func @transform_9(%arg0: i32) -> (i32, i32) {
    %c0_i32 = arith.constant 0 : i32
    %c0_i32_0 = arith.constant 0 : i32
    return %arg0, %c0_i32 : i32, i32
  }
}

</mosaic_0001>

<bundles_post_ra>
// kernel: tpu_custom_call.1
= control target key start
LH: loop header
LB: loop body
LE: loop exit
PB: predicated region body
PF: predicated region fallthrough
CT: control target
= control target key end

     0   :  { %14 = vsyncpa [#allocation3], 0  ;;  %s9574_s0 = inlined_call_operand.hbm [shape: f32[7,8,128], index: 0, kind: input, shape index: {}]   ;;  %s9575_s1 = inlined_call_operand.hbm [shape: f32[128,384], index: 1, kind: input, shape index: {}]   ;;  %s9576_s2 = inlined_call_operand.hbm [shape: f32[128,384], index: 2, kind: input, shape index: {}]   ;;  %s9577_s3 = inlined_call_operand.vmem [shape: f32[1,384], index: 3, kind: input, shape index: {}]   ;;  %s9578_s4 = inlined_call_operand.vmem [shape: f32[1,384], index: 4, kind: input, shape index: {}]   ;;  %s9579_s5 = inlined_call_operand.hbm [shape: f32[128,384], index: 5, kind: input, shape index: {}]   ;;  %s9580_s6 = inlined_call_operand.hbm [shape: f32[128,384], index: 6, kind: input, shape index: {}]   ;;  %s9581_s7 = inlined_call_operand.vmem [shape: f32[1,384], index: 7, kind: input, shape index: {}]   ;;  %s9582_s8 = inlined_call_operand.vmem [shape: f32[1,384], index: 8, kind: input, shape index: {}]   ;;  %s9583_s9 = inlined_call_operand.hbm [shape: f32[8,128], index: 9, kind: output, shape index: {}]  }
   0x1   :  { %15 = vsyncpa [#allocation6], 0 }
   0x2   :  { %16 = vsyncpa [#allocation9], 0 }
   0x3   :  { %17 = vsyncpa [#allocation4], 0  ;;  %s8071_s30 = smov [#allocation5]   ;;  %s7931_s13 = scalar_lea.hbm %s9575_s1, 6144 }
   0x4   :  { %s35_s10 = sshll.u32 %s8071_s30, 4  ;;  %p7932_p0 = scmp.ne.s32.totalorder %s9575_s1, %s7931_s13  ;;  %s36_s10 = int_to_ptr.vmem [resolvable:$true] %s35_s10 }
   0x5   :  { %p7935_p1 = scmp.lt.u32.totalorder %s7931_s13, %s9575_s1 }
   0x7   :  { %p7937_p2 = pnand %p7935_p1, %p7932_p0 }
   0x9   :  { %7940 = shalt.err (!%p7937_p2)
}
   0xa   :  { %s7941_s18 = scalar_lea.vmem %s36_s10, 6144  ;;  %p7946_p4 = scmp.lt.s32.totalorder %s36_s10, %s36_s10 }
   0xb   :  { %p7942_p3 = scmp.ne.s32.totalorder %s36_s10, %s7941_s18  ;;  %p7947_p5 = scmp.lt.s32.totalorder %s7941_s18, %s7941_s18 }
   0xd   :  { %p7948_p6 = por %p7947_p5, %p7946_p4 }
   0xf   :  { %p7949_p7 = pnand %p7948_p6, %p7942_p3 }
  0x11   :  { %7952 = shalt.err (!%p7949_p7)
}
  0x12   :  { %s8072_s19 = smov 384   ;;  %s8073_s20 = smov 24  }
  0x13   :  { %41 = dma.hbm_to_vmem [thread:$0]  %s9575_s1, 6144, %s36_s10, [#allocation6], %s8072_s19, %s8072_s19, %s8073_s20  }
  0x14   :  { %s8074_s23 = smov [#allocation8]   ;;  %s8075_s25 = smov [#allocation2]  }
  0x15   :  { %s63_s24 = sshll.u32 %s8074_s23, 4  ;;  %s23_s26 = sshll.u32 %s8075_s25, 4  ;;  %s64_s24 = int_to_ptr.vmem [resolvable:$true] %s63_s24  ;;  %s24_s26 = int_to_ptr.vmem [resolvable:$true] %s23_s26 }
  0x16   :  { %s7953_s29 = scalar_lea.hbm %s9579_s5, 6144 }
  0x17   :  { %p7954_p8 = scmp.ne.s32.totalorder %s9579_s5, %s7953_s29  ;;  %p7957_p9 = scmp.lt.u32.totalorder %s7953_s29, %s9579_s5 }
  0x19   :  { %p7959_p10 = pnand %p7957_p9, %p7954_p8 }
  0x1b   :  { %7962 = shalt.err (!%p7959_p10)
}
  0x1c   :  { %s7963_s1 = scalar_lea.vmem %s64_s24, 6144  ;;  %p7968_p12 = scmp.lt.s32.totalorder %s64_s24, %s64_s24 }
  0x1d   :  { %p7964_p11 = scmp.ne.s32.totalorder %s64_s24, %s7963_s1  ;;  %p7969_p13 = scmp.lt.s32.totalorder %s7963_s1, %s7963_s1 }
  0x1f   :  { %p7970_p0 = por %p7969_p13, %p7968_p12 }
  0x21   :  { %p7971_p1 = pnand %p7970_p0, %p7964_p11 }
  0x23   :  { %7974 = shalt.err (!%p7971_p1)
}
  0x24   :  { %69 = dma.hbm_to_vmem [thread:$0]  %s9579_s5, 6144, %s64_s24, [#allocation9], %s8072_s19, %s8072_s19, %s8073_s20  }
  0x25   :  { %s7975_s17 = scalar_lea.hbm %s9574_s0, 896 }
  0x26   :  { %p7976_p2 = scmp.ne.s32.totalorder %s9574_s0, %s7975_s17  ;;  %p7979_p3 = scmp.lt.u32.totalorder %s7975_s17, %s9574_s0 }
  0x28   :  { %p7981_p4 = pnand %p7979_p3, %p7976_p2 }
  0x2a   :  { %7984 = shalt.err (!%p7981_p4)
}
  0x2b   :  { %s7985_s25 = scalar_lea.vmem %s24_s26, 896  ;;  %p7990_p6 = scmp.lt.s32.totalorder %s24_s26, %s24_s26 }
  0x2c   :  { %p7986_p5 = scmp.ne.s32.totalorder %s24_s26, %s7985_s25  ;;  %p7991_p7 = scmp.lt.s32.totalorder %s7985_s25, %s7985_s25 }
  0x2e   :  { %p7992_p8 = por %p7991_p7, %p7990_p6 }
  0x30   :  { %p7993_p9 = pnand %p7992_p8, %p7986_p5 }
  0x32   :  { %7996 = shalt.err (!%p7993_p9)
}
  0x33   :  { %s8076_s5 = smov 128   ;;  %s8077_s24 = smov 8  }
  0x34   :  { %29 = dma.hbm_to_vmem [thread:$0]  %s9574_s0, 896, %s24_s26, [#allocation3], %s8076_s5, %s8076_s5, %s8077_s24  }
  0x35   :  { %s8078_s29 = smov [#allocation7]   ;;  %s8079_s11 = smov [#allocation10]  }
  0x36   :  { %s47_s30 = sshll.u32 %s8078_s29, 4  ;;  %s75_s12 = sshll.u32 %s8079_s11, 4  ;;  %s48_s30 = int_to_ptr.vmem [resolvable:$true] %s47_s30  ;;  %s76_s12 = int_to_ptr.vmem [resolvable:$true] %s75_s12 }
  0x37   :  { %s7997_s10 = scalar_lea.hbm %s9576_s2, 6144 }
  0x38   :  { %p7998_p10 = scmp.ne.s32.totalorder %s9576_s2, %s7997_s10  ;;  %p8001_p11 = scmp.lt.u32.totalorder %s7997_s10, %s9576_s2 }
  0x3a   :  { %p8003_p12 = pnand %p8001_p11, %p7998_p10 }
  0x3c   :  { %8006 = shalt.err (!%p8003_p12)
}
  0x3d   :  { %s8007_s0 = scalar_lea.vmem %s48_s30, 6144  ;;  %p8012_p0 = scmp.lt.s32.totalorder %s48_s30, %s48_s30 }
  0x3e   :  { %p8008_p13 = scmp.ne.s32.totalorder %s48_s30, %s8007_s0  ;;  %p8013_p1 = scmp.lt.s32.totalorder %s8007_s0, %s8007_s0 }
  0x40   :  { %p8014_p2 = por %p8013_p1, %p8012_p0 }
  0x42   :  { %p8015_p3 = pnand %p8014_p2, %p8008_p13 }
  0x44   :  { %8018 = shalt.err (!%p8015_p3)
}
  0x45   :  { %53 = dma.hbm_to_vmem [thread:$0]  %s9576_s2, 6144, %s48_s30, [#allocation6], %s8072_s19, %s8072_s19, %s8073_s20  }
  0x46   :  { %s8019_s23 = scalar_lea.hbm %s9580_s6, 6144 }
  0x47   :  { %p8020_p4 = scmp.ne.s32.totalorder %s9580_s6, %s8019_s23  ;;  %p8023_p5 = scmp.lt.u32.totalorder %s8019_s23, %s9580_s6 }
  0x49   :  { %p8025_p6 = pnand %p8023_p5, %p8020_p4 }
  0x4b   :  { %8028 = shalt.err (!%p8025_p6)
}
  0x4c   :  { %s8029_s28 = scalar_lea.vmem %s76_s12, 6144  ;;  %p8034_p8 = scmp.lt.s32.totalorder %s76_s12, %s76_s12 }
  0x4d   :  { %p8030_p7 = scmp.ne.s32.totalorder %s76_s12, %s8029_s28  ;;  %p8035_p9 = scmp.lt.s32.totalorder %s8029_s28, %s8029_s28 }
  0x4f   :  { %p8036_p10 = por %p8035_p9, %p8034_p8 }
  0x51   :  { %p8037_p11 = pnand %p8036_p10, %p8030_p7 }
  0x53   :  { %8040 = shalt.err (!%p8037_p11)
}
  0x54   :  { %81 = dma.hbm_to_vmem [thread:$0]  %s9580_s6, 6144, %s76_s12, [#allocation9], %s8072_s19, %s8072_s19, %s8073_s20  }
  0x55   :  { %8063 = dma.done.wait [#allocation3], 896  }
  0x56   :  { %8064 = vsyncadd [#allocation3], 4294966400 }
  0x57   :  { %8065 = dma.done.wait [#allocation6], 12288  }
  0x58   :  { %8066 = vsyncadd [#allocation6], 4294955008 }
  0x59   :  { %8067 = dma.done.wait [#allocation9], 12288  }
  0x5a   :  { %8068 = vsyncadd [#allocation9], 4294955008  ;;  %v9616_v0 = vmov 0.0|0.0   ;;  %v9584_v1 = vmov 0.0   ;;  %vm8082_vm0 = vmmov 0   ;;  %v102_v2 = vld [vmem:[#allocation5 + $0x8] sm:$0xff] }
  0x5b   :  { %6158 = vmatprep.subr.bf16.mxu1 %v9616_v0  ;;  %426 = vmatprep.mubr.f32.mxu0 %v9584_v1  ;;  %v105_v3 = vld [vmem:[#allocation5 + $0x20] sm:$0xff]  ;;  %v104_v6 = vld [vmem:[#allocation5 + $0x18] sm:$0xff]  ;;  %v111_v8 = vld [vmem:[#allocation5 + $0x50] sm:$0xff] }
  0x5c   :  { %5178 = vmatprep.mubr.msk.f32.mxu1 %vm8082_vm0, %v9584_v1  ;;  %v101_v4 = vld [vmem:[#allocation5] sm:$0xff]  ;;  %v8210_v5 = vpack.c.bf16 %v105_v3, %v102_v2  ;;  %v108_v7 = vld [vmem:[#allocation5 + $0x38] sm:$0xff]  ;;  %v107_v11 = vld [vmem:[#allocation5 + $0x30] sm:$0xff] }
  0x5d   :  { %v8212_v9 = vpack.c.bf16 %v104_v6, %v101_v4  ;;  %v8214_v10 = vpack.c.bf16 %v111_v8, %v108_v7  ;;  %v110_v12 = vld [vmem:[#allocation5 + $0x48] sm:$0xff]  ;;  %v117_v14 = vld [vmem:[#allocation5 + $0x80] sm:$0xff]  ;;  %v116_v18 = vld [vmem:[#allocation5 + $0x78] sm:$0xff] }
  0x5e   :  { %v114_v13 = vld [vmem:[#allocation5 + $0x68] sm:$0xff]  ;;  %6127 = vmatprep.subr.bf16.mxu0 %v8210_v5  ;;  %v8218_v15 = vpack.c.bf16 %v110_v12, %v107_v11  ;;  %v113_v17 = vld [vmem:[#allocation5 + $0x60] sm:$0xff]  ;;  %v120_v19 = vld [vmem:[#allocation5 + $0x98] sm:$0xff] }
  0x5f   :  { %6129 = vmatpush1.bf16.msra.mxu0 %v8212_v9  ;;  %v8221_v16 = vpack.c.bf16 %v117_v14, %v114_v13  ;;  %v123_v20 = vld [vmem:[#allocation5 + $0xb0] sm:$0xff]  ;;  %v8224_v21 = vpack.c.bf16 %v116_v18, %v113_v17  ;;  %v122_v24 = vld [vmem:[#allocation5 + $0xa8] sm:$0xff]  ;;  %v129_v28 = vld [vmem:[#allocation5 + $0xe0] sm:$0xff] }
  0x60   :  { %6131 = vmatprep.subr.bf16.mxu0 %v8214_v10  ;;  %v119_v22 = vld [vmem:[#allocation5 + $0x90] sm:$0xff]  ;;  %v8227_v23 = vpack.c.bf16 %v123_v20, %v120_v19  ;;  %v106_v26 = vld [vmem:[#allocation5 + $0x28] sm:$0xff]  ;;  %v109_v30 = vld [vmem:[#allocation5 + $0x40] sm:$0xff] }
  0x61   :  { %v103_v25 = vld [vmem:[#allocation5 + $0x10] sm:$0xff]  ;;  %v126_v27 = vld [vmem:[#allocation5 + $0xc8] sm:$0xff]  ;;  %v112_v31 = vld [vmem:[#allocation5 + $0x58] sm:$0xff]  ;;  %v8232_v32 = vpack.c.bf16 %v122_v24, %v119_v22 }
  0x62   :  { %v8229_v29 = vpack.c.bf16 %v106_v26, %v103_v25  ;;  %v8235_v33 = vpack.c.bf16 %v112_v31, %v109_v30  ;;  %v8238_v34 = vpack.c.bf16 %v129_v28, %v126_v27  ;;  %v125_v35 = vld [vmem:[#allocation5 + $0xc0] sm:$0xff]  ;;  %v128_v36 = vld [vmem:[#allocation5 + $0xd8] sm:$0xff]  ;;  %v115_v37 = vld [vmem:[#allocation5 + $0x70] sm:$0xff] }
  0x63   :  { %6133 = vmatpush1.bf16.msra.mxu0 %v8218_v15  ;;  %v132_v38 = vld [vmem:[#allocation5 + $0xf8] sm:$0xff]  ;;  %v135_v39 = vld [vmem:[#allocation5 + $0x110] sm:$0xff]  ;;  %v118_v40 = vld [vmem:[#allocation5 + $0x88] sm:$0xff]  ;;  %v8242_v41 = vpack.c.bf16 %v128_v36, %v125_v35 }
  0x64   :  { %6135 = vmatprep.subr.bf16.mxu0 %v8221_v16  ;;  %6160 = vmatpush3.bf16.msra.mxu1 %v8229_v29  ;;  %9757 = vst [vmem:[#allocation16_spill] sm:$0xff] %v8238_v34  ;;  %v131_v42 = vld [vmem:[#allocation5 + $0xf0] sm:$0xff]  ;;  %v8245_v43 = vpack.c.bf16 %v118_v40, %v115_v37  ;;  %v8248_v44 = vpack.c.bf16 %v135_v39, %v132_v38  ;;  %v134_v45 = vld [vmem:[#allocation5 + $0x108] sm:$0xff]  ;;  %v121_v46 = vld [vmem:[#allocation5 + $0xa0] sm:$0xff] }
  0x65   :  { %6161 = vmatprep.subr.bf16.mxu1 %v9616_v0  ;;  %9758 = vst [vmem:[#allocation17_spill] sm:$0xff] %v8242_v41  ;;  %v124_v47 = vld [vmem:[#allocation5 + $0xb8] sm:$0xff]  ;;  %v138_v48 = vld [vmem:[#allocation5 + $0x128] sm:$0xff]  ;;  %v141_v49 = vld [vmem:[#allocation5 + $0x140] sm:$0xff]  ;;  %v8252_v50 = vpack.c.bf16 %v134_v45, %v131_v42 }
  0x66   :  { %9759 = vst [vmem:[#allocation18_spill] sm:$0xff] %v8248_v44  ;;  %v137_v51 = vld [vmem:[#allocation5 + $0x120] sm:$0xff]  ;;  %v8255_v52 = vpack.c.bf16 %v124_v47, %v121_v46  ;;  %v8258_v53 = vpack.c.bf16 %v141_v49, %v138_v48  ;;  %v140_v54 = vld [vmem:[#allocation5 + $0x138] sm:$0xff]  ;;  %v127_v55 = vld [vmem:[#allocation5 + $0xd0] sm:$0xff] }
  0x67   :  { %6137 = vmatpush1.bf16.msra.mxu0 %v8224_v21  ;;  %9760 = vst [vmem:[#allocation19_spill] sm:$0xff] %v8252_v50  ;;  %v130_v56 = vld [vmem:[#allocation5 + $0xe8] sm:$0xff]  ;;  %v144_v57 = vld [vmem:[#allocation5 + $0x158] sm:$0xff]  ;;  %v147_v58 = vld [vmem:[#allocation5 + $0x170] sm:$0xff]  ;;  %v8262_v59 = vpack.c.bf16 %v140_v54, %v137_v51 }
  0x68   :  { %6139 = vmatprep.subr.bf16.mxu0 %v8227_v23  ;;  %6163 = vmatpush3.bf16.msra.mxu1 %v8235_v33  ;;  %9761 = vst [vmem:[#allocation20_spill] sm:$0xff] %v8258_v53  ;;  %v143_v60 = vld [vmem:[#allocation5 + $0x150] sm:$0xff]  ;;  %v8265_v61 = vpack.c.bf16 %v130_v56, %v127_v55  ;;  %v8268_v62 = vpack.c.bf16 %v147_v58, %v144_v57  ;;  %v146_v63 = vld [vmem:[#allocation5 + $0x168] sm:$0xff]  ;;  %v133_v2 = vld [vmem:[#allocation5 + $0x100] sm:$0xff] }
  0x69   :  { %6164 = vmatprep.subr.bf16.mxu1 %v9616_v0  ;;  %9762 = vst [vmem:[#allocation21_spill] sm:$0xff] %v8262_v59  ;;  %v136_v3 = vld [vmem:[#allocation5 + $0x118] sm:$0xff]  ;;  %v150_v4 = vld [vmem:[#allocation7 + $0x8] sm:$0xff]  ;;  %v153_v6 = vld [vmem:[#allocation7 + $0x20] sm:$0xff]  ;;  %v8272_v7 = vpack.c.bf16 %v146_v63, %v143_v60 }
  0x6a   :  { %9763 = vst [vmem:[#allocation22_spill] sm:$0xff] %v8265_v61  ;;  %9764 = vst [vmem:[#allocation23_spill] sm:$0xff] %v8268_v62  ;;  %v149_v8 = vld [vmem:[#allocation7] sm:$0xff]  ;;  %v8275_v11 = vpack.c.bf16 %v136_v3, %v133_v2  ;;  %v8278_v12 = vpack.c.bf16 %v153_v6, %v150_v4  ;;  %v152_v13 = vld [vmem:[#allocation7 + $0x18] sm:$0xff] }
  0x6b   :  { %6141 = vmatpush1.bf16.msra.mxu0 %v8232_v32  ;;  %9765 = vst [vmem:[#allocation24_spill] sm:$0xff] %v8272_v7  ;;  %v139_v14 = vld [vmem:[#allocation5 + $0x130] sm:$0xff]  ;;  %v142_v17 = vld [vmem:[#allocation5 + $0x148] sm:$0xff]  ;;  %v156_v18 = vld [vmem:[#allocation7 + $0x38] sm:$0xff]  ;;  %v8282_v22 = vpack.c.bf16 %v152_v13, %v149_v8 }
  0x6c   :  { %6143 = vmatprep.subr.bf16.mxu0 %v8238_v34  ;;  %6166 = vmatpush3.bf16.msra.mxu1 %v8245_v43  ;;  %9766 = vst [vmem:[#allocation25_spill] sm:$0xff] %v8275_v11  ;;  %9767 = vst [vmem:[#allocation26_spill] sm:$0xff] %v8278_v12  ;;  %v159_v19 = vld [vmem:[#allocation7 + $0x50] sm:$0xff]  ;;  %v361_v20 = vld [vmem:[#allocation2] sm:$0xff]  ;;  %v8285_v25 = vpack.c.bf16 %v142_v17, %v139_v14 }
  0x6d   :  { %6167 = vmatprep.subr.bf16.mxu1 %v9616_v0  ;;  %9768 = vst [vmem:[#allocation27_spill] sm:$0xff] %v8282_v22  ;;  %v155_v24 = vld [vmem:[#allocation7 + $0x30] sm:$0xff]  ;;  %v8288_v26 = vpack.c.bf16 %v159_v19, %v156_v18  ;;  %v158_v27 = vld [vmem:[#allocation7 + $0x48] sm:$0xff]  ;;  %v145_v28 = vld [vmem:[#allocation5 + $0x160] sm:$0xff] }
  0x6e   :  { %9769 = vst [vmem:[#allocation28_spill] sm:$0xff] %v8285_v25  ;;  %v148_v30 = vld [vmem:[#allocation5 + $0x178] sm:$0xff]  ;;  %v162_v31 = vld [vmem:[#allocation7 + $0x68] sm:$0xff]  ;;  %v165_v35 = vld [vmem:[#allocation7 + $0x80] sm:$0xff]  ;;  %v8292_v36 = vpack.c.bf16 %v158_v27, %v155_v24 }
  0x6f   :  { %6145 = vmatpush1.bf16.msra.mxu0 %v8242_v41  ;;  %9770 = vst [vmem:[#allocation29_spill] sm:$0xff] %v8288_v26  ;;  %v161_v37 = vld [vmem:[#allocation7 + $0x60] sm:$0xff]  ;;  %v8295_v38 = vpack.c.bf16 %v148_v30, %v145_v28  ;;  %v8298_v39 = vpack.c.bf16 %v165_v35, %v162_v31  ;;  %v164_v40 = vld [vmem:[#allocation7 + $0x78] sm:$0xff]  ;;  %v151_v42 = vld [vmem:[#allocation7 + $0x10] sm:$0xff] }
  0x70   :  { %6147 = vmatprep.subr.bf16.mxu0 %v8248_v44  ;;  %6169 = vmatpush3.bf16.msra.mxu1 %v8255_v52  ;;  %9771 = vst [vmem:[#allocation30_spill] sm:$0xff] %v8292_v36  ;;  %v154_v45 = vld [vmem:[#allocation7 + $0x28] sm:$0xff]  ;;  %v168_v46 = vld [vmem:[#allocation7 + $0x98] sm:$0xff]  ;;  %v171_v47 = vld [vmem:[#allocation7 + $0xb0] sm:$0xff]  ;;  %v8303_v48 = vpack.c.bf16 %v164_v40, %v161_v37 }
  0x71   :  { %6170 = vmatprep.subr.bf16.mxu1 %v9616_v0  ;;  %9772 = vst [vmem:[#allocation31_spill] sm:$0xff] %v8295_v38  ;;  %9773 = vst [vmem:[#allocation32_spill] sm:$0xff] %v8298_v39  ;;  %v167_v49 = vld [vmem:[#allocation7 + $0x90] sm:$0xff]  ;;  %v8306_v51 = vpack.c.bf16 %v154_v45, %v151_v42  ;;  %v8309_v54 = vpack.c.bf16 %v171_v47, %v168_v46  ;;  %v170_v55 = vld [vmem:[#allocation7 + $0xa8] sm:$0xff] }
  0x72   :  { %9774 = vst [vmem:[#allocation33_spill] sm:$0xff] %v8303_v48  ;;  %v157_v56 = vld [vmem:[#allocation7 + $0x40] sm:$0xff]  ;;  %v160_v57 = vld [vmem:[#allocation7 + $0x58] sm:$0xff]  ;;  %v174_v58 = vld [vmem:[#allocation7 + $0xc8] sm:$0xff]  ;;  %v8313_v63 = vpack.c.bf16 %v170_v55, %v167_v49 }
  0x73   :  { %6149 = vmatpush1.bf16.msra.mxu0 %v8252_v50  ;;  %9775 = vst [vmem:[#allocation34_spill] sm:$0xff] %v8306_v51  ;;  %9776 = vst [vmem:[#allocation35_spill] sm:$0xff] %v8309_v54  ;;  %v177_v60 = vld [vmem:[#allocation7 + $0xe0] sm:$0xff]  ;;  %v8316_v3 = vpack.c.bf16 %v160_v57, %v157_v56  ;;  %v176_v6 = vld [vmem:[#allocation7 + $0xd8] sm:$0xff] }
  0x74   :  { %6151 = vmatprep.subr.bf16.mxu0 %v8258_v53  ;;  %6172 = vmatpush3.bf16.msra.mxu1 %v8265_v61  ;;  %9777 = vst [vmem:[#allocation36_spill] sm:$0xff] %v8313_v63  ;;  %v173_v2 = vld [vmem:[#allocation7 + $0xc0] sm:$0xff]  ;;  %v8319_v4 = vpack.c.bf16 %v177_v60, %v174_v58  ;;  %v163_v8 = vld [vmem:[#allocation7 + $0x70] sm:$0xff]  ;;  %v166_v13 = vld [vmem:[#allocation7 + $0x88] sm:$0xff] }
  0x75   :  { %6173 = vmatprep.subr.bf16.mxu1 %v9616_v0  ;;  %9778 = vst [vmem:[#allocation37_spill] sm:$0xff] %v8316_v3  ;;  %v180_v14 = vld [vmem:[#allocation7 + $0xf8] sm:$0xff]  ;;  %v183_v17 = vld [vmem:[#allocation7 + $0x110] sm:$0xff]  ;;  %v8325_v18 = vpack.c.bf16 %v176_v6, %v173_v2  ;;  %v182_v27 = vld [vmem:[#allocation7 + $0x108] sm:$0xff] }
  0x76   :  { %9779 = vst [vmem:[#allocation38_spill] sm:$0xff] %v8319_v4  ;;  %v179_v19 = vld [vmem:[#allocation7 + $0xf0] sm:$0xff]  ;;  %v8331_v24 = vpack.c.bf16 %v183_v17, %v180_v14  ;;  %v169_v28 = vld [vmem:[#allocation7 + $0xa0] sm:$0xff]  ;;  %v172_v30 = vld [vmem:[#allocation7 + $0xb8] sm:$0xff] }
  0x77   :  { %6153 = vmatpush1.bf16.msra.mxu0 %v8262_v59  ;;  %9780 = vst [vmem:[#allocation39_spill] sm:$0xff] %v8325_v18  ;;  %v186_v31 = vld [vmem:[#allocation7 + $0x128] sm:$0xff]  ;;  %v189_v35 = vld [vmem:[#allocation7 + $0x140] sm:$0xff]  ;;  %v8335_v37 = vpack.c.bf16 %v182_v27, %v179_v19  ;;  %v8338_v42 = vpack.c.bf16 %v172_v30, %v169_v28  ;;  %v188_v46 = vld [vmem:[#allocation7 + $0x138] sm:$0xff] }
  0x78   :  { %6155 = vmatprep.subr.bf16.mxu0 %v8268_v62  ;;  %6175 = vmatpush3.bf16.msra.mxu1 %v8275_v11  ;;  %9782 = vst [vmem:[#allocation41_spill] sm:$0xff] %v8331_v24  ;;  %v185_v40 = vld [vmem:[#allocation7 + $0x120] sm:$0xff]  ;;  %v8341_v45 = vpack.c.bf16 %v189_v35, %v186_v31  ;;  %v175_v47 = vld [vmem:[#allocation7 + $0xd0] sm:$0xff]  ;;  %v178_v49 = vld [vmem:[#allocation7 + $0xe8] sm:$0xff] }
  0x79   :  { %6176 = vmatprep.subr.bf16.mxu1 %v9616_v0  ;;  %9783 = vst [vmem:[#allocation42_spill] sm:$0xff] %v8335_v37  ;;  %9784 = vst [vmem:[#allocation43_spill] sm:$0xff] %v8338_v42  ;;  %v192_v55 = vld [vmem:[#allocation7 + $0x158] sm:$0xff]  ;;  %v195_v56 = vld [vmem:[#allocation7 + $0x170] sm:$0xff]  ;;  %v8345_v57 = vpack.c.bf16 %v188_v46, %v185_v40  ;;  %v8348_v60 = vpack.c.bf16 %v178_v49, %v175_v47 }
  0x7a   :  { %9785 = vst [vmem:[#allocation44_spill] sm:$0xff] %v8341_v45  ;;  %v191_v58 = vld [vmem:[#allocation7 + $0x150] sm:$0xff]  ;;  %v8351_v2 = vpack.c.bf16 %v195_v56, %v192_v55  ;;  %v194_v6 = vld [vmem:[#allocation7 + $0x168] sm:$0xff]  ;;  %v193_v30 = vld [vmem:[#allocation7 + $0x160] sm:$0xff] }
  0x7b   :  { %6157 = vmatpush1.bf16.msra.mxu0 %v8272_v7  ;;  %9786 = vst [vmem:[#allocation45_spill] sm:$0xff] %v8345_v57  ;;  %9787 = vst [vmem:[#allocation46_spill] sm:$0xff] %v8348_v60  ;;  %v8355_v14 = vpack.c.bf16 %v194_v6, %v191_v58  ;;  %v187_v19 = vld [vmem:[#allocation7 + $0x130] sm:$0xff]  ;;  %v190_v27 = vld [vmem:[#allocation7 + $0x148] sm:$0xff] }
  0x7c   :  { %6183 = vmatprep.subr.bf16.mxu0 %v8278_v12  ;;  %6178 = vmatpush3.bf16.msra.mxu1 %v8285_v25  ;;  %9788 = vst [vmem:[#allocation47_spill] sm:$0xff] %v8351_v2  ;;  %v8364_v28 = vpack.c.bf16 %v190_v27, %v187_v19  ;;  %v196_v31 = vld [vmem:[#allocation7 + $0x178] sm:$0xff]  ;;  %v198_v40 = vld [vmem:[#allocation8 + $0x8] sm:$0xff]  ;;  %v201_v46 = vld [vmem:[#allocation8 + $0x20] sm:$0xff] }
  0x7d   :  { %6179 = vmatprep.subr.bf16.mxu1 %v9616_v0  ;;  %9789 = vst [vmem:[#allocation48_spill] sm:$0xff] %v8355_v14  ;;  %v8369_v35 = vpack.c.bf16 %v196_v31, %v193_v30  ;;  %v8378_v47 = vpack.c.bf16 %v201_v46, %v198_v40  ;;  %v197_v49 = vld [vmem:[#allocation8] sm:$0xff]  ;;  %v200_v55 = vld [vmem:[#allocation8 + $0x18] sm:$0xff]  ;;  %v199_v56 = vld [vmem:[#allocation8 + $0x10] sm:$0xff] }
  0x7e   :  { %427 = vmatmul.mubr.f32.vlgmr.msra.gmra.mrb[0].mxu0 %v361_v20  ;;  %9791 = vst [vmem:[#allocation50_spill] sm:$0xff] %v8364_v28  ;;  %v8380_v58 = vpack.c.bf16 %v200_v55, %v197_v49  ;;  %v202_v6 = vld [vmem:[#allocation8 + $0x28] sm:$0xff]  ;;  %v207_v19 = vld [vmem:[#allocation8 + $0x50] sm:$0xff]  ;;  %v205_v40 = vld [vmem:[#allocation8 + $0x40] sm:$0xff] }
  0x7f   :  { %6185 = vmatpush1.bf16.msra.mxu0 %v8282_v22  ;;  %567 = vmatprep.mubr.f32.mxu0 %v9584_v1  ;;  %9792 = vst [vmem:[#allocation51_spill] sm:$0xff] %v8369_v35  ;;  %9793 = vst [vmem:[#allocation52_spill] sm:$0xff] %v8378_v47  ;;  %v203_v30 = vld [vmem:[#allocation8 + $0x30] sm:$0xff]  ;;  %v206_v31 = vld [vmem:[#allocation8 + $0x48] sm:$0xff] }
  0x80   :  { %6187 = vmatprep.subr.bf16.mxu0 %v8288_v26  ;;  %6181 = vmatpush3.bf16.msra.mxu1 %v8295_v38  ;;  %9794 = vst [vmem:[#allocation53_spill] sm:$0xff] %v8380_v58  ;;  %v8390_v46 = vpack.c.bf16 %v206_v31, %v203_v30  ;;  %v208_v49 = vld [vmem:[#allocation8 + $0x58] sm:$0xff]  ;;  %v214_v31 = vld [vmem:[#allocation8 + $0x88] sm:$0xff] }
  0x81   :  { %6214 = vmatprep.subr.bf16.mxu1 %v9616_v0  ;;  %v8393_v55 = vpack.c.bf16 %v208_v49, %v205_v40  ;;  %v216_v49 = vld [vmem:[#allocation8 + $0x98] sm:$0xff] }
  0x82   :  { %9797 = vst [vmem:[#allocation56_spill] sm:$0xff] %v8390_v46 }
  0x83   :  { %6189 = vmatpush1.bf16.msra.mxu0 %v8292_v36  ;;  %5179 = vmatmul.mubr.f32.vlgmr.msra.gmra.mrb[0].mxu1 %v361_v20  ;;  %v8328_v20 = vpack.c.bf16 %v166_v13, %v163_v8  ;;  %v181_v8 = vld [vmem:[#allocation7 + $0x100] sm:$0xff]  ;;  %v184_v13 = vld [vmem:[#allocation7 + $0x118] sm:$0xff]  ;;  %9798 = vst [vmem:[#allocation57_spill] sm:$0xff] %v8393_v55 }
  0x84   :  { %6191 = vmatprep.subr.bf16.mxu0 %v8298_v39  ;;  %6216 = vmatpush3.bf16.msra.mxu1 %v8306_v51  ;;  %v8358_v17 = vpack.c.bf16 %v184_v13, %v181_v8  ;;  %v8383_v8 = vpack.c.bf16 %v202_v6, %v199_v56  ;;  %v204_v13 = vld [vmem:[#allocation8 + $0x38] sm:$0xff]  ;;  %v210_v56 = vld [vmem:[#allocation8 + $0x68] sm:$0xff]  ;;  %v213_v6 = vld [vmem:[#allocation8 + $0x80] sm:$0xff] }
  0x85   :  { %6217 = vmatprep.subr.bf16.mxu1 %v9616_v0  ;;  %5213 = vmatprep.mubr.msk.f32.mxu1 %vm8082_vm0, %v9584_v1  ;;  %9781 = vst [vmem:[#allocation40_spill] sm:$0xff] %v8328_v20  ;;  %v8387_v27 = vpack.c.bf16 %v207_v19, %v204_v13  ;;  %v8397_v13 = vpack.c.bf16 %v213_v6, %v210_v56  ;;  %v209_v19 = vld [vmem:[#allocation8 + $0x60] sm:$0xff]  ;;  %v215_v6 = vld [vmem:[#allocation8 + $0x90] sm:$0xff] }
  0x86   :  { %9790 = vst [vmem:[#allocation49_spill] sm:$0xff] %v8358_v17  ;;  %9795 = vst [vmem:[#allocation54_spill] sm:$0xff] %v8383_v8 }
  0x87   :  { %6193 = vmatpush1.bf16.msra.mxu0 %v8303_v48  ;;  %9796 = vst [vmem:[#allocation55_spill] sm:$0xff] %v8387_v27  ;;  %9799 = vst [vmem:[#allocation58_spill] sm:$0xff] %v8397_v13 }
  0x88   :  { %6195 = vmatprep.subr.bf16.mxu0 %v8309_v54  ;;  %6219 = vmatpush3.bf16.msra.mxu1 %v8316_v3 }
  0x89   :  { %6220 = vmatprep.subr.bf16.mxu1 %v9616_v0 }
  0x8b   :  { %6197 = vmatpush1.bf16.msra.mxu0 %v8313_v63 }
  0x8c   :  { %6199 = vmatprep.subr.bf16.mxu0 %v8319_v4  ;;  %6222 = vmatpush3.bf16.msra.mxu1 %v8328_v20 }
  0x8d   :  { %6223 = vmatprep.subr.bf16.mxu1 %v9616_v0 }
  0x8f   :  { %6201 = vmatpush1.bf16.msra.mxu0 %v8325_v18 }
  0x90   :  { %6203 = vmatprep.subr.bf16.mxu0 %v8331_v24  ;;  %6225 = vmatpush3.bf16.msra.mxu1 %v8338_v42 }
  0x91   :  { %6226 = vmatprep.subr.bf16.mxu1 %v9616_v0 }
  0x93   :  { %6205 = vmatpush1.bf16.msra.mxu0 %v8335_v37 }
  0x94   :  { %6207 = vmatprep.subr.bf16.mxu0 %v8341_v45  ;;  %6228 = vmatpush3.bf16.msra.mxu1 %v8348_v60 }
  0x95   :  { %6229 = vmatprep.subr.bf16.mxu1 %v9616_v0 }
  0x97   :  { %6209 = vmatpush1.bf16.msra.mxu0 %v8345_v57 }
  0x98   :  { %6211 = vmatprep.subr.bf16.mxu0 %v8351_v2  ;;  %6231 = vmatpush3.bf16.msra.mxu1 %v8358_v17 }
  0x99   :  { %6232 = vmatprep.subr.bf16.mxu1 %v9616_v0 }
  0x9b   :  { %6213 = vmatpush1.bf16.msra.mxu0 %v8355_v14 }
  0x9c   :  { %6234 = vmatpush3.bf16.msra.mxu1 %v8364_v28  ;;  %6239 = vmatprep.subr.bf16.mxu0 %v8378_v47  ;;  %v238_v47 = vld [vmem:[#allocation8 + $0x148] sm:$0xff] }
  0x9d   :  { %6235 = vmatprep.subr.bf16.mxu1 %v9616_v0 }
  0x9e   :  { %568 = vmatmul.mubr.f32.vlgmr.msra.gmra.mrb[0].mxu0 %v9584_v1 }
  0x9f   :  { %729 = vmatprep.mubr.f32.mxu0 %v9584_v1  ;;  %6241 = vmatpush1.bf16.msra.mxu0 %v8380_v58  ;;  %v234_v58 = vld [vmem:[#allocation8 + $0x128] sm:$0xff] }
  0xa0   :  { %6237 = vmatpush3.bf16.msra.mxu1 %v8369_v35  ;;  %6243 = vmatprep.subr.bf16.mxu0 %v8387_v27  ;;  %v217_v27 = vld [vmem:[#allocation8 + $0xa0] sm:$0xff]  ;;  %v244_v35 = vld [vmem:[#allocation8 + $0x178] sm:$0xff] }
  0xa1   :  { %6270 = vmatprep.subr.bf16.mxu1 %v9616_v0 }
  0xa3   :  { %5214 = vmatmul.mubr.f32.vlgmr.msra.gmra.mrb[2].mxu1 %v9584_v1  ;;  %6245 = vmatpush1.bf16.msra.mxu0 %v8390_v46  ;;  %v219_v46 = vld [vmem:[#allocation8 + $0xb0] sm:$0xff] }
  0xa4   :  { %5248 = vmatprep.mubr.msk.f32.mxu1 %vm8082_vm0, %v9584_v1  ;;  %6272 = vmatpush3.bf16.msra.mxu1 %v8383_v8  ;;  %v212_v1 = vld [vmem:[#allocation8 + $0x78] sm:$0xff]  ;;  %v211_v8 = vld [vmem:[#allocation8 + $0x70] sm:$0xff]  ;;  %v8407_v56 = vpack.c.bf16 %v219_v46, %v216_v49  ;;  %v221_v49 = vld [vmem:[#allocation8 + $0xc0] sm:$0xff] }
  0xa5   :  { %6273 = vmatprep.subr.bf16.mxu1 %v9616_v0  ;;  %v8400_v30 = vpack.c.bf16 %v212_v1, %v209_v19  ;;  %6247 = vmatprep.subr.bf16.mxu0 %v8397_v13  ;;  %v8403_v40 = vpack.c.bf16 %v214_v31, %v211_v8  ;;  %v220_v19 = vld [vmem:[#allocation8 + $0xb8] sm:$0xff]  ;;  %v222_v31 = vld [vmem:[#allocation8 + $0xc8] sm:$0xff]  ;;  %v223_v13 = vld [vmem:[#allocation8 + $0xd0] sm:$0xff] }
  0xa6   :  { %9802 = vst [vmem:[#allocation61_spill] sm:$0xff] %v8407_v56  ;;  %v8413_v8 = vpack.c.bf16 %v220_v19, %v217_v27  ;;  %v228_v19 = vld [vmem:[#allocation8 + $0xf8] sm:$0xff] }
  0xa7   :  { %9800 = vst [vmem:[#allocation59_spill] sm:$0xff] %v8400_v30  ;;  %9801 = vst [vmem:[#allocation60_spill] sm:$0xff] %v8403_v40  ;;  %6249 = vmatpush1.bf16.msra.mxu0 %v8400_v30  ;;  %v225_v30 = vld [vmem:[#allocation8 + $0xe0] sm:$0xff] }
  0xa8   :  { %6275 = vmatpush3.bf16.msra.mxu1 %v8393_v55  ;;  %v218_v55 = vld [vmem:[#allocation8 + $0xa8] sm:$0xff]  ;;  %6251 = vmatprep.subr.bf16.mxu0 %v8407_v56  ;;  %9804 = vst [vmem:[#allocation63_spill] sm:$0xff] %v8413_v8  ;;  %v8417_v46 = vpack.c.bf16 %v225_v30, %v222_v31  ;;  %v227_v31 = vld [vmem:[#allocation8 + $0xf0] sm:$0xff]  ;;  %v229_v56 = vld [vmem:[#allocation8 + $0x100] sm:$0xff] }
  0xa9   :  { %6276 = vmatprep.subr.bf16.mxu1 %v9616_v0  ;;  %v8410_v1 = vpack.c.bf16 %v218_v55, %v215_v6  ;;  %v226_v6 = vld [vmem:[#allocation8 + $0xe8] sm:$0xff] }
  0xaa   :  { %9805 = vst [vmem:[#allocation64_spill] sm:$0xff] %v8417_v46  ;;  %v8423_v27 = vpack.c.bf16 %v226_v6, %v223_v13 }
  0xab   :  { %9803 = vst [vmem:[#allocation62_spill] sm:$0xff] %v8410_v1  ;;  %6253 = vmatpush1.bf16.msra.mxu0 %v8410_v1  ;;  %v231_v1 = vld [vmem:[#allocation8 + $0x110] sm:$0xff] }
  0xac   :  { %6278 = vmatpush3.bf16.msra.mxu1 %v8403_v40  ;;  %v224_v40 = vld [vmem:[#allocation8 + $0xd8] sm:$0xff]  ;;  %6255 = vmatprep.subr.bf16.mxu0 %v8417_v46  ;;  %9807 = vst [vmem:[#allocation66_spill] sm:$0xff] %v8423_v27  ;;  %v8427_v30 = vpack.c.bf16 %v231_v1, %v228_v19  ;;  %v237_v46 = vld [vmem:[#allocation8 + $0x140] sm:$0xff]  ;;  %v235_v1 = vld [vmem:[#allocation8 + $0x130] sm:$0xff] }
  0xad   :  { %6279 = vmatprep.subr.bf16.mxu1 %v9616_v0  ;;  %v8420_v55 = vpack.c.bf16 %v224_v40, %v221_v49  ;;  %v232_v49 = vld [vmem:[#allocation8 + $0x118] sm:$0xff]  ;;  %v8435_v6 = vpack.c.bf16 %v237_v46, %v234_v58  ;;  %v239_v58 = vld [vmem:[#allocation8 + $0x150] sm:$0xff]  ;;  %v242_v46 = vld [vmem:[#allocation8 + $0x168] sm:$0xff] }
  0xae   :  { %9808 = vst [vmem:[#allocation67_spill] sm:$0xff] %v8427_v30  ;;  %v8433_v13 = vpack.c.bf16 %v232_v49, %v229_v56  ;;  %v241_v49 = vld [vmem:[#allocation8 + $0x160] sm:$0xff] }
  0xaf   :  { %9806 = vst [vmem:[#allocation65_spill] sm:$0xff] %v8420_v55  ;;  %6257 = vmatpush1.bf16.msra.mxu0 %v8420_v55  ;;  %9811 = vst [vmem:[#allocation70_spill] sm:$0xff] %v8435_v6  ;;  %v233_v55 = vld [vmem:[#allocation8 + $0x120] sm:$0xff] }
  0xb0   :  { %6281 = vmatpush3.bf16.msra.mxu1 %v8413_v8  ;;  %v230_v8 = vld [vmem:[#allocation8 + $0x108] sm:$0xff]  ;;  %6259 = vmatprep.subr.bf16.mxu0 %v8427_v30  ;;  %9810 = vst [vmem:[#allocation69_spill] sm:$0xff] %v8433_v13  ;;  %v9815_v30 = vmov 0.0|0.0  }
  0xb1   :  { %6282 = vmatprep.subr.bf16.mxu1 %v9616_v0  ;;  %v8430_v40 = vpack.c.bf16 %v230_v8, %v227_v31  ;;  %v243_v8 = vld [vmem:[#allocation8 + $0x170] sm:$0xff]  ;;  %v8442_v31 = vpack.c.bf16 %v238_v47, %v235_v1  ;;  %v8452_v47 = vpack.c.bf16 %v244_v35, %v241_v49  ;;  %v310_v35 = vld [vmem:[%s9578_s4] sm:$0x7] }
  0xb3   :  { %9809 = vst [vmem:[#allocation68_spill] sm:$0xff] %v8430_v40  ;;  %6261 = vmatpush1.bf16.msra.mxu0 %v8430_v40  ;;  %9813 = vst [vmem:[#allocation72_spill] sm:$0xff] %v8442_v31  ;;  %v246_v40 = vld [vmem:[#allocation10 + $0x8] sm:$0xff] }
  0xb4   :  { %6284 = vmatpush3.bf16.msra.mxu1 %v8423_v27  ;;  %v236_v27 = vld [vmem:[#allocation8 + $0x138] sm:$0xff]  ;;  %6263 = vmatprep.subr.bf16.mxu0 %v8435_v6  ;;  %9817 = vst [vmem:[#allocation75_spill] sm:$0xff] %v8452_v47 }
  0xb5   :  { %6285 = vmatprep.subr.bf16.mxu1 %v9616_v0  ;;  %v8438_v19 = vpack.c.bf16 %v236_v27, %v233_v55  ;;  %v240_v0 = vld [vmem:[#allocation8 + $0x158] sm:$0xff]  ;;  %v249_v55 = vld [vmem:[#allocation10 + $0x20] sm:$0xff]  ;;  %v8448_v27 = vpack.c.bf16 %v242_v46, %v239_v58  ;;  %v295_v58 = vlaneseq }
  0xb6   :  { %v8444_v56 = vpack.c.bf16 %v243_v8, %v240_v0  ;;  %v8454_v0 = vpack.c.bf16 %v249_v55, %v246_v40  ;;  %v293_v40 = vld [vmem:[%s9577_s3] sm:$0x7] }
  0xb7   :  { %9812 = vst [vmem:[#allocation71_spill] sm:$0xff] %v8438_v19  ;;  %6265 = vmatpush1.bf16.msra.mxu0 %v8438_v19  ;;  %9816 = vst [vmem:[#allocation74_spill] sm:$0xff] %v8448_v27  ;;  %v296_v46 = vshrl.u32 %v295_v58, 7 }
  0xb8   :  { %6287 = vmatpush3.bf16.msra.mxu1 %v8433_v13  ;;  %9814 = vst [vmem:[#allocation73_spill] sm:$0xff] %v8444_v56  ;;  %6267 = vmatprep.subr.bf16.mxu0 %v8444_v56  ;;  %9818 = vst [vmem:[#allocation76_spill] sm:$0xff] %v8454_v0 }
  0xb9   :  { %6288 = vmatprep.subr.bf16.mxu1 %v9815_v30  ;;  %v8469_v49 = vsub.s32 1, %v296_v46 }
  0xbb   :  { %6269 = vmatpush1.bf16.msra.mxu0 %v8448_v27  ;;  %9820 = vst [vmem:[#allocation78_spill] sm:$0xff] %v8469_v49  ;;  %v319_v58 = vrot.slane %v310_v35, %v8469_v49 }
  0xbc   :  { %6290 = vmatpush3.bf16.msra.mxu1 %v8442_v31  ;;  %6295 = vmatprep.subr.bf16.mxu0 %v8454_v0  ;;  %v8461_v31 = vsub.s32 0, %v296_v46 }
  0xbd   :  { %6291 = vmatprep.subr.bf16.mxu1 %v9815_v30 }
  0xbe   :  { %9819 = vst [vmem:[#allocation77_spill] sm:$0xff] %v8461_v31  ;;  %v298_v55 = vrot.slane %v293_v40, %v8461_v31  ;;  %v315_v0 = vrot.slane %v310_v35, %v8461_v31 }
  0xc0   :  { %6293 = vmatpush3.bf16.msra.mxu1 %v8452_v47  ;;  %v8475_v47 = vadd.f32 %v315_v0, %v298_v55 }
  0xc1   :  { %6326 = vmatprep.subr.bf16.mxu1 %v9815_v30 }
  0xc2   :  { %9821 = vst [vmem:[#allocation79_spill] sm:$0xff] %v8475_v47 }
 0x156   :  { %v499_v1 = vpop.f32.mrb[0].mxu1 }
 0x157   :  { %v5180_v8 = vpop.f32.mrb[1].mxu1 }
 0x158   :  { %v302_v8 = vrot.slane %v293_v40, %v8469_v49  ;;  %v8481_v49 = vsub.s32 2, %v296_v46 }
 0x15a   :  { %v8477_v56 = vadd.f32 %v319_v58, %v302_v8  ;;  %9823 = vst [vmem:[#allocation81_spill] sm:$0xff] %v8481_v49  ;;  %v8484_v0 = vrot.slane %v310_v35, %v8481_v49  ;;  %v248_v8 = vld [vmem:[#allocation10 + $0x18] sm:$0xff]  ;;  %v247_v35 = vld [vmem:[#allocation10 + $0x10] sm:$0xff]  ;;  %v250_v58 = vld [vmem:[#allocation10 + $0x28] sm:$0xff] }
 0x15c   :  { %9822 = vst [vmem:[#allocation80_spill] sm:$0xff] %v8477_v56 }
 0x171   :  { %v569_v27 = vpop.f32.mrb[0].mxu0 }
 0x172   :  { %v7695_v19 = vadd.f32 %v8475_v47, %v569_v27  ;;  %v571_v6 = vpop.f32.mrb[1].mxu0  ;;  %v8487_v27 = vrot.slane %v293_v40, %v8481_v49  ;;  %v252_v47 = vld [vmem:[#allocation10 + $0x38] sm:$0xff]  ;;  %v255_v40 = vld [vmem:[#allocation10 + $0x50] sm:$0xff] }
 0x173   :  { %v7697_v14 = vadd.f32 %v8477_v56, %v571_v6 }
 0x174   :  { %v4642_v13 = vmul.f32 -1.442695, %v7695_v19  ;;  %9824 = vst [vmem:[#allocation82_spill] sm:$0xff] %v8487_v27 }
 0x175   :  { %v4643_v2 = vmul.f32 -1.442695, %v7697_v14  ;;  %v500_v14 = vadd.f32 %v499_v1, %v8487_v27  ;;  %v251_v1 = vld [vmem:[#allocation10 + $0x30] sm:$0xff]  ;;  %v261_v27 = vld [vmem:[#allocation10 + $0x80] sm:$0xff] }
 0x176   :  { %7791 = vpow2.f32 %v4642_v13  ;;  %v640_v28 = vpop.f32.mrb[2].mxu1 }
 0x177   :  { %v5215_v57 = vpop.f32.mrb[3].mxu1  ;;  %7793 = vpow2.f32 %v4643_v2  ;;  %v641_v6 = vadd.f32 %v640_v28, %v8484_v0  ;;  %v8493_v28 = vpack.c.bf16 %v250_v58, %v247_v35  ;;  %v264_v35 = vld [vmem:[#allocation10 + $0x98] sm:$0xff]  ;;  %v267_v58 = vld [vmem:[#allocation10 + $0xb0] sm:$0xff] }
 0x179   :  { %9825 = vst [vmem:[#allocation83_spill] sm:$0xff] %v8493_v28 }
 0x180   :  { %v7792_v31 = vpop.eup %7791 }
 0x181   :  { %v648_v45 = vadd.f32 1.0, %v7792_v31  ;;  %v7794_v55 = vpop.eup %7793  ;;  %v245_v31 = vld [vmem:[#allocation10] sm:$0xff] }
 0x182   :  { %v655_v19 = vadd.f32 1.0, %v7794_v55  ;;  %v8491_v17 = vpack.c.bf16 %v248_v8, %v245_v31  ;;  %v260_v31 = vld [vmem:[#allocation10 + $0x78] sm:$0xff]  ;;  %v262_v8 = vld [vmem:[#allocation10 + $0x88] sm:$0xff] }
 0x183   :  { %7795 = vrcp.f32 %v648_v45 }
 0x184   :  { %7797 = vrcp.f32 %v655_v19 }
 0x18d   :  { %v7796_v13 = vpop.eup %7795 }
 0x18e   :  { %v658_v57 = vmul.f32 %v7796_v13, %v641_v6  ;;  %v7798_v45 = vpop.eup %7797  ;;  %v8497_v6 = vpack.c.bf16 %v255_v40, %v252_v47  ;;  %v254_v13 = vld [vmem:[#allocation10 + $0x48] sm:$0xff]  ;;  %v9830_v40 = vmov 0.0  }
 0x18f   :  { %v661_v46 = vsub.f32 1.0, %v7798_v45  ;;  %v663_v55 = vmul.f32 0.0, %v7798_v45 }
 0x190   :  { %v659_v2 = vadd.f32 %v658_v57, %v500_v14  ;;  %9826 = vst [vmem:[#allocation84_spill] sm:$0xff] %v8497_v6  ;;  %v253_v14 = vld [vmem:[#allocation10 + $0x40] sm:$0xff]  ;;  %v256_v57 = vld [vmem:[#allocation10 + $0x58] sm:$0xff] }
 0x191   :  { %v8505_v45 = vpack.c.bf16 %v256_v57, %v253_v14  ;;  %v266_v14 = vld [vmem:[#allocation10 + $0xa8] sm:$0xff]  ;;  %v265_v57 = vld [vmem:[#allocation10 + $0xa0] sm:$0xff] }
 0x192   :  { %7799 = vtanh.f32 %v659_v2  ;;  %v258_v2 = vld [vmem:[#allocation10 + $0x68] sm:$0xff] }
 0x193   :  { %9828 = vst [vmem:[#allocation86_spill] sm:$0xff] %v8505_v45  ;;  %v8509_v47 = vpack.c.bf16 %v261_v27, %v258_v2  ;;  %v263_v27 = vld [vmem:[#allocation10 + $0x90] sm:$0xff]  ;;  %v268_v2 = vld [vmem:[#allocation10 + $0xb8] sm:$0xff] }
 0x195   :  { %9829 = vst [vmem:[#allocation87_spill] sm:$0xff] %v8509_v47 }
 0x19c   :  { %v7800_v56 = vpop.eup %7799 }
 0x19d   :  { %v662_v49 = vmul.f32 %v7800_v56, %v661_v46  ;;  %v8503_v56 = vpack.c.bf16 %v254_v13, %v251_v1  ;;  %v259_v46 = vld [vmem:[#allocation10 + $0x70] sm:$0xff]  ;;  %v8522_v13 = vpack.c.bf16 %v267_v58, %v264_v35  ;;  %v272_v35 = vld [vmem:[#allocation10 + $0xd8] sm:$0xff] }
 0x19e   :  { %v8518_v1 = vpack.c.bf16 %v262_v8, %v259_v46  ;;  %v269_v46 = vld [vmem:[#allocation10 + $0xc0] sm:$0xff]  ;;  %v271_v58 = vld [vmem:[#allocation10 + $0xd0] sm:$0xff] }
 0x19f   :  { %v8495_v19 = vadd.f32 %v663_v55, %v662_v49  ;;  %9827 = vst [vmem:[#allocation85_spill] sm:$0xff] %v8503_v56  ;;  %v257_v49 = vld [vmem:[#allocation10 + $0x60] sm:$0xff]  ;;  %9833 = vst [vmem:[#allocation90_spill] sm:$0xff] %v8522_v13 }
 0x1a0   :  { %v8516_v55 = vpack.c.bf16 %v260_v31, %v257_v49  ;;  %9832 = vst [vmem:[#allocation89_spill] sm:$0xff] %v8518_v1  ;;  %v8526_v49 = vpack.c.bf16 %v266_v14, %v263_v27  ;;  %v8528_v31 = vpack.c.bf16 %v268_v2, %v265_v57  ;;  %v8536_v27 = vpack.c.bf16 %v272_v35, %v269_v46  ;;  %v275_v57 = vld [vmem:[#allocation10 + $0xf0] sm:$0xff]  ;;  %v277_v2 = vld [vmem:[#allocation10 + $0x100] sm:$0xff] }
 0x1a1   :  { %730 = vmatmul.mubr.f32.vlgmr.msra.gmra.mrb[2].mxu0 %v8495_v19  ;;  %5249 = vmatmul.mubr.f32.vlgmr.msra.gmra.mrb[4].mxu1 %v8495_v19  ;;  %v281_v35 = vld [vmem:[#allocation10 + $0x120] sm:$0xff] }
 0x1a2   :  { %6297 = vmatpush1.bf16.msra.mxu0 %v8491_v17  ;;  %6328 = vmatpush3.bf16.msra.mxu1 %v8493_v28  ;;  %9831 = vst [vmem:[#allocation88_spill] sm:$0xff] %v8516_v55  ;;  %v273_v28 = vld [vmem:[#allocation10 + $0xe0] sm:$0xff]  ;;  %9834 = vst [vmem:[#allocation91_spill] sm:$0xff] %v8526_v49 }
 0x1a3   :  { %6299 = vmatprep.subr.bf16.mxu0 %v8497_v6  ;;  %6329 = vmatprep.subr.bf16.mxu1 %v9815_v30  ;;  %v270_v6 = vld [vmem:[#allocation10 + $0xc8] sm:$0xff]  ;;  %9835 = vst [vmem:[#allocation92_spill] sm:$0xff] %v8528_v31 }
 0x1a4   :  { %870 = vmatprep.mubr.f32.mxu0 %v9830_v40  ;;  %5283 = vmatprep.mubr.msk.f32.mxu1 %vm8082_vm0, %v9830_v40  ;;  %v8532_v8 = vpack.c.bf16 %v273_v28, %v270_v6  ;;  %v278_v6 = vld [vmem:[#allocation10 + $0x108] sm:$0xff] }
 0x1a5   :  { %v8546_v46 = vpack.c.bf16 %v278_v6, %v275_v57  ;;  %v287_v6 = vld [vmem:[#allocation10 + $0x150] sm:$0xff] }
 0x1a6   :  { %6301 = vmatpush1.bf16.msra.mxu0 %v8503_v56  ;;  %6331 = vmatpush3.bf16.msra.mxu1 %v8505_v45  ;;  %9836 = vst [vmem:[#allocation93_spill] sm:$0xff] %v8532_v8  ;;  %v276_v45 = vld [vmem:[#allocation10 + $0xf8] sm:$0xff]  ;;  %v279_v56 = vld [vmem:[#allocation10 + $0x110] sm:$0xff] }
 0x1a7   :  { %6303 = vmatprep.subr.bf16.mxu0 %v8509_v47  ;;  %6332 = vmatprep.subr.bf16.mxu1 %v9815_v30  ;;  %v274_v47 = vld [vmem:[#allocation10 + $0xe8] sm:$0xff]  ;;  %v8542_v28 = vpack.c.bf16 %v279_v56, %v276_v45  ;;  %9838 = vst [vmem:[#allocation95_spill] sm:$0xff] %v8546_v46  ;;  %v284_v45 = vld [vmem:[#allocation10 + $0x138] sm:$0xff] }
 0x1a8   :  { %v8538_v14 = vpack.c.bf16 %v274_v47, %v271_v58  ;;  %v283_v58 = vld [vmem:[#allocation10 + $0x130] sm:$0xff]  ;;  %v8556_v57 = vpack.c.bf16 %v284_v45, %v281_v35  ;;  %v9842_v45 = vld [vmem:[#allocation50_spill] sm:$0xff] }
 0x1a9   :  { %9837 = vst [vmem:[#allocation94_spill] sm:$0xff] %v8542_v28 }
 0x1aa   :  { %6305 = vmatpush1.bf16.msra.mxu0 %v8516_v55  ;;  %6334 = vmatpush3.bf16.msra.mxu1 %v8518_v1  ;;  %v282_v1 = vld [vmem:[#allocation10 + $0x128] sm:$0xff]  ;;  %v285_v55 = vld [vmem:[#allocation10 + $0x140] sm:$0xff] }
 0x1ab   :  { %6307 = vmatprep.subr.bf16.mxu0 %v8522_v13  ;;  %6335 = vmatprep.subr.bf16.mxu1 %v9815_v30  ;;  %v280_v13 = vld [vmem:[#allocation10 + $0x118] sm:$0xff]  ;;  %v8552_v56 = vpack.c.bf16 %v285_v55, %v282_v1  ;;  %v290_v1 = vld [vmem:[#allocation10 + $0x168] sm:$0xff] }
 0x1ac   :  { %v8548_v47 = vpack.c.bf16 %v280_v13, %v277_v2  ;;  %v289_v2 = vld [vmem:[#allocation10 + $0x160] sm:$0xff] }
 0x1ae   :  { %6309 = vmatpush1.bf16.msra.mxu0 %v8526_v49  ;;  %6337 = vmatpush3.bf16.msra.mxu1 %v8528_v31  ;;  %v288_v31 = vld [vmem:[#allocation10 + $0x158] sm:$0xff]  ;;  %v291_v49 = vld [vmem:[#allocation10 + $0x170] sm:$0xff] }
 0x1af   :  { %6311 = vmatprep.subr.bf16.mxu0 %v8532_v8  ;;  %6338 = vmatprep.subr.bf16.mxu1 %v9815_v30  ;;  %v286_v8 = vld [vmem:[#allocation10 + $0x148] sm:$0xff]  ;;  %v8562_v55 = vpack.c.bf16 %v291_v49, %v288_v31  ;;  %v970_v49 = vld [vmem:[#allocation2 + $0x8] sm:$0xff] }
 0x1b0   :  { %v8558_v13 = vpack.c.bf16 %v286_v8, %v283_v58  ;;  %v9839_v31 = vld [vmem:[#allocation49_spill] sm:$0xff]  ;;  %v9840_v8 = vld [vmem:[#allocation44_spill] sm:$0xff]  ;;  %v9843_v58 = vld [vmem:[#allocation47_spill] sm:$0xff] }
 0x1b2   :  { %6313 = vmatpush1.bf16.msra.mxu0 %v8536_v27  ;;  %6340 = vmatpush3.bf16.msra.mxu1 %v8538_v14 }
 0x1b3   :  { %6315 = vmatprep.subr.bf16.mxu0 %v8542_v28  ;;  %6341 = vmatprep.subr.bf16.mxu1 %v9815_v30  ;;  %v292_v28 = vld [vmem:[#allocation10 + $0x178] sm:$0xff] }
 0x1b4   :  { %v8568_v35 = vpack.c.bf16 %v292_v28, %v289_v2  ;;  %v9841_v28 = vld [vmem:[#allocation45_spill] sm:$0xff]  ;;  %v9846_v2 = vld [vmem:[#allocation52_spill] sm:$0xff] }
 0x1b6   :  { %6317 = vmatpush1.bf16.msra.mxu0 %v8546_v46  ;;  %6343 = vmatpush3.bf16.msra.mxu1 %v8548_v47  ;;  %v8566_v46 = vpack.c.bf16 %v290_v1, %v287_v6  ;;  %v9844_v6 = vld [vmem:[#allocation48_spill] sm:$0xff]  ;;  %v9845_v1 = vld [vmem:[#allocation51_spill] sm:$0xff] }
 0x1b7   :  { %6319 = vmatprep.subr.bf16.mxu0 %v8552_v56  ;;  %6344 = vmatprep.subr.bf16.mxu1 %v9815_v30 }
 0x1ba   :  { %6321 = vmatpush1.bf16.msra.mxu0 %v8556_v57  ;;  %6346 = vmatpush3.bf16.msra.mxu1 %v8558_v13 }
 0x1bb   :  { %6323 = vmatprep.subr.bf16.mxu0 %v8562_v55  ;;  %6347 = vmatprep.subr.bf16.mxu1 %v9815_v30 }
 0x1be   :  { %6325 = vmatpush1.bf16.msra.mxu0 %v8566_v46  ;;  %6349 = vmatpush3.bf16.msra.mxu1 %v8568_v35 }
 0x1bf   :  { %6351 = vmatprep.subr.bf16.mxu0 %v8210_v5  ;;  %6382 = vmatprep.subr.bf16.mxu1 %v9815_v30 }
 0x1c1   :  { %871 = vmatmul.mubr.f32.vlgmr.msra.gmra.mrb[2].mxu0 %v9830_v40  ;;  %5284 = vmatmul.mubr.f32.vlgmr.msra.gmra.mrb[6].mxu1 %v9830_v40 }
 0x1c2   :  { %6353 = vmatpush1.bf16.msra.mxu0 %v8212_v9  ;;  %6384 = vmatpush3.bf16.msra.mxu1 %v8229_v29 }
 0x1c3   :  { %6355 = vmatprep.subr.bf16.mxu0 %v8214_v10  ;;  %6385 = vmatprep.subr.bf16.mxu1 %v9815_v30 }
 0x1c4   :  { %1035 = vmatprep.mubr.f32.mxu0 %v9830_v40  ;;  %5318 = vmatprep.mubr.msk.f32.mxu1 %vm8082_vm0, %v9830_v40 }
 0x1c6   :  { %6357 = vmatpush1.bf16.msra.mxu0 %v8218_v15  ;;  %6387 = vmatpush3.bf16.msra.mxu1 %v8235_v33 }
 0x1c7   :  { %6359 = vmatprep.subr.bf16.mxu0 %v8221_v16  ;;  %6388 = vmatprep.subr.bf16.mxu1 %v9815_v30 }
 0x1ca   :  { %6361 = vmatpush1.bf16.msra.mxu0 %v8224_v21  ;;  %6390 = vmatpush3.bf16.msra.mxu1 %v8245_v43 }
 0x1cb   :  { %6363 = vmatprep.subr.bf16.mxu0 %v8227_v23  ;;  %6391 = vmatprep.subr.bf16.mxu1 %v9815_v30 }
 0x1ce   :  { %6365 = vmatpush1.bf16.msra.mxu0 %v8232_v32  ;;  %6393 = vmatpush3.bf16.msra.mxu1 %v8255_v52 }
 0x1cf   :  { %6367 = vmatprep.subr.bf16.mxu0 %v8238_v34  ;;  %6394 = vmatprep.subr.bf16.mxu1 %v9815_v30 }
 0x1d2   :  { %6369 = vmatpush1.bf16.msra.mxu0 %v8242_v41  ;;  %6396 = vmatpush3.bf16.msra.mxu1 %v8265_v61 }
 0x1d3   :  { %6371 = vmatprep.subr.bf16.mxu0 %v8248_v44  ;;  %6397 = vmatprep.subr.bf16.mxu1 %v9815_v30 }
 0x1d6   :  { %6373 = vmatpush1.bf16.msra.mxu0 %v8252_v50  ;;  %6399 = vmatpush3.bf16.msra.mxu1 %v8275_v11 }
 0x1d7   :  { %6375 = vmatprep.subr.bf16.mxu0 %v8258_v53  ;;  %6400 = vmatprep.subr.bf16.mxu1 %v9815_v30 }
 0x1da   :  { %6377 = vmatpush1.bf16.msra.mxu0 %v8262_v59  ;;  %6402 = vmatpush3.bf16.msra.mxu1 %v8285_v25 }
 0x1db   :  { %6379 = vmatprep.subr.bf16.mxu0 %v8268_v62  ;;  %6403 = vmatprep.subr.bf16.mxu1 %v9815_v30 }
 0x1de   :  { %6381 = vmatpush1.bf16.msra.mxu0 %v8272_v7  ;;  %6405 = vmatpush3.bf16.msra.mxu1 %v8295_v38 }
 0x1df   :  { %6407 = vmatprep.subr.bf16.mxu0 %v8278_v12  ;;  %6438 = vmatprep.subr.bf16.mxu1 %v9815_v30 }
 0x1e1   :  { %1036 = vmatmul.mubr.f32.vlgmr.msra.gmra.mrb[4].mxu0 %v970_v49  ;;  %5319 = vmatmul.mubr.f32.vlgmr.msra.gmra.mrb[8].mxu1 %v970_v49  ;;  %v9847_v49 = vld [vmem:[#allocation53_spill] sm:$0xff] }
 0x1e2   :  { %6409 = vmatpush1.bf16.msra.mxu0 %v8282_v22  ;;  %6440 = vmatpush3.bf16.msra.mxu1 %v8306_v51 }
 0x1e3   :  { %6411 = vmatprep.subr.bf16.mxu0 %v8288_v26  ;;  %6441 = vmatprep.subr.bf16.mxu1 %v9815_v30 }
 0x1e4   :  { %1176 = vmatprep.mubr.f32.mxu0 %v9830_v40  ;;  %5353 = vmatprep.mubr.msk.f32.mxu1 %vm8082_vm0, %v9830_v40 }
 0x1e6   :  { %6413 = vmatpush1.bf16.msra.mxu0 %v8292_v36  ;;  %6443 = vmatpush3.bf16.msra.mxu1 %v8316_v3 }
 0x1e7   :  { %6415 = vmatprep.subr.bf16.mxu0 %v8298_v39  ;;  %6444 = vmatprep.subr.bf16.mxu1 %v9815_v30 }
 0x1ea   :  { %6417 = vmatpush1.bf16.msra.mxu0 %v8303_v48  ;;  %6446 = vmatpush3.bf16.msra.mxu1 %v8328_v20 }
 0x1eb   :  { %6419 = vmatprep.subr.bf16.mxu0 %v8309_v54  ;;  %6447 = vmatprep.subr.bf16.mxu1 %v9815_v30 }
 0x1ee   :  { %6421 = vmatpush1.bf16.msra.mxu0 %v8313_v63  ;;  %6449 = vmatpush3.bf16.msra.mxu1 %v8338_v42 }
 0x1ef   :  { %6423 = vmatprep.subr.bf16.mxu0 %v8319_v4  ;;  %6450 = vmatprep.subr.bf16.mxu1 %v9815_v30 }
 0x1f2   :  { %6425 = vmatpush1.bf16.msra.mxu0 %v8325_v18  ;;  %6452 = vmatpush3.bf16.msra.mxu1 %v8348_v60 }
 0x1f3   :  { %6427 = vmatprep.subr.bf16.mxu0 %v8331_v24  ;;  %6453 = vmatprep.subr.bf16.mxu1 %v9815_v30 }
 0x1f6   :  { %6429 = vmatpush1.bf16.msra.mxu0 %v8335_v37  ;;  %6455 = vmatpush3.bf16.msra.mxu1 %v9839_v31  ;;  %v9858_v31 = vld [vmem:[#allocation64_spill] sm:$0xff]  ;;  %v9872_v37 = vld [vmem:[#allocation78_spill] sm:$0xff] }
 0x1f7   :  { %6431 = vmatprep.subr.bf16.mxu0 %v9840_v8  ;;  %6456 = vmatprep.subr.bf16.mxu1 %v9815_v30  ;;  %v9857_v8 = vld [vmem:[#allocation63_spill] sm:$0xff] }
 0x1fa   :  { %6433 = vmatpush1.bf16.msra.mxu0 %v9841_v28  ;;  %6458 = vmatpush3.bf16.msra.mxu1 %v9842_v45  ;;  %v9848_v28 = vld [vmem:[#allocation54_spill] sm:$0xff]  ;;  %v9849_v45 = vld [vmem:[#allocation55_spill] sm:$0xff] }
 0x1fb   :  { %6435 = vmatprep.subr.bf16.mxu0 %v9843_v58  ;;  %6459 = vmatprep.subr.bf16.mxu1 %v9815_v30  ;;  %v9856_v58 = vld [vmem:[#allocation62_spill] sm:$0xff] }
 0x1fe   :  { %6437 = vmatpush1.bf16.msra.mxu0 %v9844_v6  ;;  %6461 = vmatpush3.bf16.msra.mxu1 %v9845_v1  ;;  %v9851_v1 = vld [vmem:[#allocation57_spill] sm:$0xff]  ;;  %v9852_v6 = vld [vmem:[#allocation58_spill] sm:$0xff] }
 0x1ff   :  { %6463 = vmatprep.subr.bf16.mxu0 %v9846_v2  ;;  %6494 = vmatprep.subr.bf16.mxu1 %v9815_v30  ;;  %v9850_v2 = vld [vmem:[#allocation56_spill] sm:$0xff] }
 0x201   :  { %1177 = vmatmul.mubr.f32.vlgmr.msra.gmra.mrb[4].mxu0 %v8495_v19  ;;  %5354 = vmatmul.mubr.f32.vlgmr.msra.gmra.mrb[10].mxu1 %v8495_v19 }
 0x202   :  { %6465 = vmatpush1.bf16.msra.mxu0 %v9847_v49  ;;  %6496 = vmatpush3.bf16.msra.mxu1 %v9848_v28  ;;  %v9853_v49 = vld [vmem:[#allocation59_spill] sm:$0xff]  ;;  %v9854_v28 = vld [vmem:[#allocation60_spill] sm:$0xff] }
 0x203   :  { %6467 = vmatprep.subr.bf16.mxu0 %v9849_v45  ;;  %6497 = vmatprep.subr.bf16.mxu1 %v9815_v30  ;;  %v9855_v45 = vld [vmem:[#allocation61_spill] sm:$0xff] }
 0x204   :  { %1338 = vmatprep.mubr.f32.mxu0 %v9830_v40  ;;  %5388 = vmatprep.mubr.msk.f32.mxu1 %vm8082_vm0, %v9830_v40 }
 0x206   :  { %6469 = vmatpush1.bf16.msra.mxu0 %v9850_v2  ;;  %6499 = vmatpush3.bf16.msra.mxu1 %v9851_v1  ;;  %v9859_v1 = vld [vmem:[#allocation65_spill] sm:$0xff]  ;;  %v9861_v2 = vld [vmem:[#allocation67_spill] sm:$0xff] }
 0x207   :  { %6471 = vmatprep.subr.bf16.mxu0 %v9852_v6  ;;  %6500 = vmatprep.subr.bf16.mxu1 %v9815_v30  ;;  %v9860_v6 = vld [vmem:[#allocation66_spill] sm:$0xff] }
 0x20a   :  { %6473 = vmatpush1.bf16.msra.mxu0 %v9853_v49  ;;  %6502 = vmatpush3.bf16.msra.mxu1 %v9854_v28  ;;  %v9862_v28 = vld [vmem:[#allocation68_spill] sm:$0xff]  ;;  %v9864_v49 = vld [vmem:[#allocation70_spill] sm:$0xff] }
 0x20b   :  { %6475 = vmatprep.subr.bf16.mxu0 %v9855_v45  ;;  %6503 = vmatprep.subr.bf16.mxu1 %v9815_v30  ;;  %v9863_v45 = vld [vmem:[#allocation69_spill] sm:$0xff] }
 0x20e   :  { %6477 = vmatpush1.bf16.msra.mxu0 %v9856_v58  ;;  %6505 = vmatpush3.bf16.msra.mxu1 %v9857_v8  ;;  %v9865_v8 = vld [vmem:[#allocation71_spill] sm:$0xff]  ;;  %v9867_v58 = vld [vmem:[#allocation73_spill] sm:$0xff] }
 0x20f   :  { %6479 = vmatprep.subr.bf16.mxu0 %v9858_v31  ;;  %6506 = vmatprep.subr.bf16.mxu1 %v9815_v30  ;;  %v9866_v31 = vld [vmem:[#allocation72_spill] sm:$0xff] }
 0x212   :  { %6481 = vmatpush1.bf16.msra.mxu0 %v9859_v1  ;;  %6508 = vmatpush3.bf16.msra.mxu1 %v9860_v6  ;;  %v9868_v6 = vld [vmem:[#allocation74_spill] sm:$0xff]  ;;  %v9870_v1 = vld [vmem:[#allocation76_spill] sm:$0xff] }
 0x213   :  { %6483 = vmatprep.subr.bf16.mxu0 %v9861_v2  ;;  %6509 = vmatprep.subr.bf16.mxu1 %v9815_v30  ;;  %v9869_v2 = vld [vmem:[#allocation75_spill] sm:$0xff] }
 0x216   :  { %6485 = vmatpush1.bf16.msra.mxu0 %v9862_v28  ;;  %6511 = vmatpush3.bf16.msra.mxu1 %v9863_v45 }
 0x217   :  { %6487 = vmatprep.subr.bf16.mxu0 %v9864_v49  ;;  %6512 = vmatprep.subr.bf16.mxu1 %v9815_v30 }
 0x21a   :  { %6489 = vmatpush1.bf16.msra.mxu0 %v9865_v8  ;;  %6514 = vmatpush3.bf16.msra.mxu1 %v9866_v31  ;;  %v344_v8 = vld [vmem:[%s9582_s8] sm:$0x7]  ;;  %v9871_v31 = vld [vmem:[#allocation77_spill] sm:$0xff] }
 0x21b   :  { %6491 = vmatprep.subr.bf16.mxu0 %v9867_v58  ;;  %6515 = vmatprep.subr.bf16.mxu1 %v9815_v30  ;;  %v327_v58 = vld [vmem:[%s9581_s7] sm:$0x7]  ;;  %s8083_s7 = smov [#allocation11]  }
 0x21c   :  { %v332_v28 = vrot.slane %v327_v58, %v9871_v31  ;;  %s4631_s8 = sshll.u32 %s8083_s7, 4  ;;  %s4632_s8 = int_to_ptr.vmem [resolvable:$true] %s4631_s8 }
 0x21d   :  { %s8041_s13 = scalar_lea.vmem %s4632_s8, 128  ;;  %p8046_p13 = scmp.lt.s32.totalorder %s4632_s8, %s4632_s8 }
 0x21e   :  { %6493 = vmatpush1.bf16.msra.mxu0 %v9868_v6  ;;  %6517 = vmatpush3.bf16.msra.mxu1 %v9869_v2  ;;  %v349_v6 = vrot.slane %v344_v8, %v9871_v31  ;;  %v336_v2 = vrot.slane %v327_v58, %v9872_v37  ;;  %p8042_p12 = scmp.ne.s32.totalorder %s4632_s8, %s8041_s13  ;;  %p8047_p0 = scmp.lt.s32.totalorder %s8041_s13, %s8041_s13 }
 0x21f   :  { %6519 = vmatprep.subr.bf16.mxu0 %v9870_v1  ;;  %6550 = vmatprep.subr.bf16.mxu1 %v9815_v30  ;;  %v353_v1 = vrot.slane %v344_v8, %v9872_v37  ;;  %v9875_v37 = vld [vmem:[#allocation81_spill] sm:$0xff] }
 0x220   :  { %v8695_v24 = vadd.f32 %v349_v6, %v332_v28  ;;  %v8702_v28 = vrot.slane %v344_v8, %v9875_v37  ;;  %p8048_p1 = por %p8047_p0, %p8046_p13 }
 0x222   :  { %9873 = vst [vmem:[#allocation77_spill] sm:$0xff] %v8695_v24  ;;  %9876 = vst [vmem:[#allocation81_spill] sm:$0xff] %v8702_v28  ;;  %p8049_p2 = pnand %p8048_p1, %p8042_p12 }
 0x274   :  { %v802_v45 = vpop.f32.mrb[4].mxu1 }
 0x275   :  { %v5250_v49 = vpop.f32.mrb[5].mxu1 }
 0x276   :  { %v8697_v49 = vadd.f32 %v353_v1, %v336_v2  ;;  %v8705_v1 = vrot.slane %v327_v58, %v9875_v37 }
 0x278   :  { %9874 = vst [vmem:[#allocation78_spill] sm:$0xff] %v8697_v49 }
 0x294   :  { %v872_v60 = vpop.f32.mrb[2].mxu0  ;;  %v943_v18 = vpop.f32.mrb[6].mxu1 }
 0x295   :  { %v7699_v4 = vadd.f32 %v8695_v24, %v872_v60  ;;  %v874_v42 = vpop.f32.mrb[3].mxu0  ;;  %v5285_v63 = vpop.f32.mrb[7].mxu1  ;;  %v944_v60 = vadd.f32 %v943_v18, %v8702_v28 }
 0x296   :  { %v7701_v20 = vadd.f32 %v8697_v49, %v874_v42 }
 0x297   :  { %v4644_v54 = vmul.f32 -1.442695, %v7699_v4  ;;  %v803_v4 = vadd.f32 %v802_v45, %v8705_v1 }
 0x298   :  { %v4645_v48 = vmul.f32 -1.442695, %v7701_v20 }
 0x299   :  { %7801 = vpow2.f32 %v4644_v54 }
 0x29a   :  { %7803 = vpow2.f32 %v4645_v48 }
 0x2a3   :  { %v7802_v31 = vpop.eup %7801 }
 0x2a4   :  { %v951_v39 = vadd.f32 1.0, %v7802_v31  ;;  %v7804_v6 = vpop.eup %7803 }
 0x2a5   :  { %v958_v2 = vadd.f32 1.0, %v7804_v6  ;;  %v9878_v6 = vld [vmem:[#allocation79_spill] sm:$0xff] }
 0x2a6   :  { %7805 = vrcp.f32 %v951_v39 }
 0x2a7   :  { %7807 = vrcp.f32 %v958_v2  ;;  %v9879_v2 = vld [vmem:[#allocation80_spill] sm:$0xff] }
 0x2b0   :  { %v7806_v63 = vpop.eup %7805 }
 0x2b1   :  { %v961_v54 = vmul.f32 %v7806_v63, %v944_v60  ;;  %v7808_v39 = vpop.eup %7807 }
 0x2b2   :  { %v964_v31 = vsub.f32 1.0, %v7808_v39  ;;  %v966_v24 = vmul.f32 0.0, %v7808_v39  ;;  %v9880_v39 = vld [vmem:[#allocation82_spill] sm:$0xff] }
 0x2b3   :  { %v962_v20 = vadd.f32 %v961_v54, %v803_v4 }
 0x2b4   :  { %v1108_v48 = vpop.f32.mrb[8].mxu1 }
 0x2b5   :  { %7809 = vtanh.f32 %v962_v20  ;;  %v5320_v42 = vpop.f32.mrb[9].mxu1 }
 0x2bf   :  { %v7810_v8 = vpop.eup %7809 }
 0x2c0   :  { %v965_v49 = vmul.f32 %v7810_v8, %v964_v31  ;;  %v1109_v31 = vadd.f32 %v1108_v48, %v9880_v39  ;;  %v9882_v48 = vld [vmem:[#allocation84_spill] sm:$0xff] }
 0x2c2   :  { %v8709_v3 = vadd.f32 %v966_v24, %v965_v49 }
 0x2c4   :  { %9877 = vst [vmem:[#allocation96_spill] sm:$0xff] %v8709_v3 }
 0x2d4   :  { %v1178_v58 = vpop.f32.mrb[4].mxu0  ;;  %v1249_v37 = vpop.f32.mrb[10].mxu1 }
 0x2d5   :  { %v7703_v18 = vadd.f32 %v9878_v6, %v1178_v58  ;;  %v1180_v28 = vpop.f32.mrb[5].mxu0  ;;  %v5355_v36 = vpop.f32.mrb[11].mxu1  ;;  %v1250_v24 = vadd.f32 %v1249_v37, %v8484_v0  ;;  %v9881_v37 = vld [vmem:[#allocation83_spill] sm:$0xff] }
 0x2d6   :  { %v7705_v60 = vadd.f32 %v9879_v2, %v1180_v28 }
 0x2d7   :  { %v4646_v45 = vmul.f32 -1.442695, %v7703_v18 }
 0x2d8   :  { %v4647_v63 = vmul.f32 -1.442695, %v7705_v60 }
 0x2d9   :  { %7811 = vpow2.f32 %v4646_v45 }
 0x2da   :  { %7813 = vpow2.f32 %v4647_v63 }
 0x2e3   :  { %v7812_v4 = vpop.eup %7811 }
 0x2e4   :  { %v1257_v54 = vadd.f32 1.0, %v7812_v4  ;;  %v7814_v20 = vpop.eup %7813  ;;  %v9884_v4 = vld [vmem:[#allocation86_spill] sm:$0xff] }
 0x2e5   :  { %v1264_v42 = vadd.f32 1.0, %v7814_v20  ;;  %v9886_v20 = vld [vmem:[#allocation88_spill] sm:$0xff] }
 0x2e6   :  { %7815 = vrcp.f32 %v1257_v54  ;;  %v9885_v54 = vld [vmem:[#allocation87_spill] sm:$0xff] }
 0x2e7   :  { %7817 = vrcp.f32 %v1264_v42  ;;  %v9887_v42 = vld [vmem:[#allocation89_spill] sm:$0xff] }
 0x2f0   :  { %v7816_v49 = vpop.eup %7815 }
 0x2f1   :  { %v1267_v8 = vmul.f32 %v7816_v49, %v1250_v24  ;;  %v7818_v36 = vpop.eup %7817  ;;  %v9888_v24 = vld [vmem:[#allocation90_spill] sm:$0xff]  ;;  %v9889_v49 = vld [vmem:[#allocation91_spill] sm:$0xff] }
 0x2f2   :  { %v1270_v18 = vsub.f32 1.0, %v7818_v36  ;;  %v1272_v60 = vmul.f32 %v7818_v36, %v8495_v19  ;;  %v9883_v19 = vld [vmem:[#allocation85_spill] sm:$0xff]  ;;  %v9893_v36 = vld [vmem:[#allocation95_spill] sm:$0xff] }
 0x2f3   :  { %v1268_v58 = vadd.f32 %v1267_v8, %v1109_v31  ;;  %v9890_v31 = vld [vmem:[#allocation92_spill] sm:$0xff]  ;;  %v9891_v8 = vld [vmem:[#allocation93_spill] sm:$0xff] }
 0x2f5   :  { %7819 = vtanh.f32 %v1268_v58  ;;  %v9892_v58 = vld [vmem:[#allocation94_spill] sm:$0xff] }
 0x2ff   :  { %v7820_v28 = vpop.eup %7819 }
 0x300   :  { %v1271_v45 = vmul.f32 %v7820_v28, %v1270_v18  ;;  %v1579_v18 = vld [vmem:[#allocation2 + $0x10] sm:$0xff] }
 0x301   :  { %v9894_v28 = vld [vmem:[#allocation30_spill] sm:$0xff] }
 0x302   :  { %v8716_v63 = vadd.f32 %v1272_v60, %v1271_v45  ;;  %v9895_v45 = vld [vmem:[#allocation37_spill] sm:$0xff]  ;;  %v9896_v60 = vld [vmem:[#allocation32_spill] sm:$0xff] }
 0x304   :  { %1339 = vmatmul.mubr.f32.vlgmr.msra.gmra.mrb[6].mxu0 %v8716_v63  ;;  %5389 = vmatmul.mubr.f32.vlgmr.msra.gmra.mrb[12].mxu1 %v8716_v63 }
 0x305   :  { %6521 = vmatpush1.bf16.msra.mxu0 %v8491_v17  ;;  %6552 = vmatpush3.bf16.msra.mxu1 %v9881_v37 }
 0x306   :  { %6523 = vmatprep.subr.bf16.mxu0 %v9882_v48  ;;  %6553 = vmatprep.subr.bf16.mxu1 %v9815_v30 }
 0x307   :  { %1479 = vmatprep.mubr.f32.mxu0 %v9830_v40  ;;  %5423 = vmatprep.mubr.msk.f32.mxu1 %vm8082_vm0, %v9830_v40 }
 0x309   :  { %6525 = vmatpush1.bf16.msra.mxu0 %v9883_v19  ;;  %6555 = vmatpush3.bf16.msra.mxu1 %v9884_v4 }
 0x30a   :  { %6527 = vmatprep.subr.bf16.mxu0 %v9885_v54  ;;  %6556 = vmatprep.subr.bf16.mxu1 %v9815_v30 }
 0x30d   :  { %6529 = vmatpush1.bf16.msra.mxu0 %v9886_v20  ;;  %6558 = vmatpush3.bf16.msra.mxu1 %v9887_v42 }
 0x30e   :  { %6531 = vmatprep.subr.bf16.mxu0 %v9888_v24  ;;  %6559 = vmatprep.subr.bf16.mxu1 %v9815_v30 }
 0x311   :  { %6533 = vmatpush1.bf16.msra.mxu0 %v9889_v49  ;;  %6561 = vmatpush3.bf16.msra.mxu1 %v9890_v31 }
 0x312   :  { %6535 = vmatprep.subr.bf16.mxu0 %v9891_v8  ;;  %6562 = vmatprep.subr.bf16.mxu1 %v9815_v30 }
 0x315   :  { %6537 = vmatpush1.bf16.msra.mxu0 %v8536_v27  ;;  %6564 = vmatpush3.bf16.msra.mxu1 %v8538_v14 }
 0x316   :  { %6539 = vmatprep.subr.bf16.mxu0 %v9892_v58  ;;  %6565 = vmatprep.subr.bf16.mxu1 %v9815_v30 }
 0x319   :  { %6541 = vmatpush1.bf16.msra.mxu0 %v9893_v36  ;;  %6567 = vmatpush3.bf16.msra.mxu1 %v8548_v47 }
 0x31a   :  { %6543 = vmatprep.subr.bf16.mxu0 %v8552_v56  ;;  %6568 = vmatprep.subr.bf16.mxu1 %v9815_v30 }
 0x31d   :  { %6545 = vmatpush1.bf16.msra.mxu0 %v8556_v57  ;;  %6570 = vmatpush3.bf16.msra.mxu1 %v8558_v13 }
 0x31e   :  { %6547 = vmatprep.subr.bf16.mxu0 %v8562_v55  ;;  %6571 = vmatprep.subr.bf16.mxu1 %v9815_v30 }
 0x321   :  { %6549 = vmatpush1.bf16.msra.mxu0 %v8566_v46  ;;  %6573 = vmatpush3.bf16.msra.mxu1 %v8568_v35 }
 0x322   :  { %6575 = vmatprep.subr.bf16.mxu0 %v8210_v5  ;;  %6606 = vmatprep.subr.bf16.mxu1 %v9815_v30 }
 0x324   :  { %1480 = vmatmul.mubr.f32.vlgmr.msra.gmra.mrb[6].mxu0 %v8709_v3  ;;  %5424 = vmatmul.mubr.f32.vlgmr.msra.gmra.mrb[14].mxu1 %v8709_v3 }
 0x325   :  { %6577 = vmatpush1.bf16.msra.mxu0 %v8212_v9  ;;  %6608 = vmatpush3.bf16.msra.mxu1 %v8229_v29 }
 0x326   :  { %6579 = vmatprep.subr.bf16.mxu0 %v8214_v10  ;;  %6609 = vmatprep.subr.bf16.mxu1 %v9815_v30 }
 0x327   :  { %1644 = vmatprep.mubr.f32.mxu0 %v9830_v40  ;;  %5458 = vmatprep.mubr.msk.f32.mxu1 %vm8082_vm0, %v9830_v40 }
 0x329   :  { %6581 = vmatpush1.bf16.msra.mxu0 %v8218_v15  ;;  %6611 = vmatpush3.bf16.msra.mxu1 %v8235_v33 }
 0x32a   :  { %6583 = vmatprep.subr.bf16.mxu0 %v8221_v16  ;;  %6612 = vmatprep.subr.bf16.mxu1 %v9815_v30 }
 0x32d   :  { %6585 = vmatpush1.bf16.msra.mxu0 %v8224_v21  ;;  %6614 = vmatpush3.bf16.msra.mxu1 %v8245_v43 }
 0x32e   :  { %6587 = vmatprep.subr.bf16.mxu0 %v8227_v23  ;;  %6615 = vmatprep.subr.bf16.mxu1 %v9815_v30 }
 0x331   :  { %6589 = vmatpush1.bf16.msra.mxu0 %v8232_v32  ;;  %6617 = vmatpush3.bf16.msra.mxu1 %v8255_v52 }
 0x332   :  { %6591 = vmatprep.subr.bf16.mxu0 %v8238_v34  ;;  %6618 = vmatprep.subr.bf16.mxu1 %v9815_v30 }
 0x335   :  { %6593 = vmatpush1.bf16.msra.mxu0 %v8242_v41  ;;  %6620 = vmatpush3.bf16.msra.mxu1 %v8265_v61 }
 0x336   :  { %6595 = vmatprep.subr.bf16.mxu0 %v8248_v44  ;;  %6621 = vmatprep.subr.bf16.mxu1 %v9815_v30  ;;  %v9941_v44 = vld [vmem:[#allocation81_spill] sm:$0xff] }
 0x339   :  { %6597 = vmatpush1.bf16.msra.mxu0 %v8252_v50  ;;  %6623 = vmatpush3.bf16.msra.mxu1 %v8275_v11 }
 0x33a   :  { %6599 = vmatprep.subr.bf16.mxu0 %v8258_v53  ;;  %6624 = vmatprep.subr.bf16.mxu1 %v9815_v30 }
 0x33d   :  { %6601 = vmatpush1.bf16.msra.mxu0 %v8262_v59  ;;  %6626 = vmatpush3.bf16.msra.mxu1 %v8285_v25 }
 0x33e   :  { %6603 = vmatprep.subr.bf16.mxu0 %v8268_v62  ;;  %6627 = vmatprep.subr.bf16.mxu1 %v9815_v30  ;;  %v9939_v62 = vld [vmem:[#allocation77_spill] sm:$0xff] }
 0x341   :  { %6605 = vmatpush1.bf16.msra.mxu0 %v8272_v7  ;;  %6629 = vmatpush3.bf16.msra.mxu1 %v8295_v38  ;;  %v9902_v38 = vld [vmem:[#allocation38_spill] sm:$0xff] }
 0x342   :  { %6631 = vmatprep.subr.bf16.mxu0 %v8278_v12  ;;  %6662 = vmatprep.subr.bf16.mxu1 %v9815_v30  ;;  %v9901_v12 = vld [vmem:[#allocation43_spill] sm:$0xff] }
 0x344   :  { %1645 = vmatmul.mubr.f32.vlgmr.msra.gmra.mrb[8].mxu0 %v1579_v18  ;;  %5459 = vmatmul.mubr.f32.vlgmr.msra.gmra.mrb[16].mxu1 %v1579_v18  ;;  %v9897_v18 = vld [vmem:[#allocation33_spill] sm:$0xff] }
 0x345   :  { %6633 = vmatpush1.bf16.msra.mxu0 %v8282_v22  ;;  %6664 = vmatpush3.bf16.msra.mxu1 %v8306_v51  ;;  %v9898_v51 = vld [vmem:[#allocation40_spill] sm:$0xff] }
 0x346   :  { %6635 = vmatprep.subr.bf16.mxu0 %v8288_v26  ;;  %6665 = vmatprep.subr.bf16.mxu1 %v9815_v30  ;;  %v9899_v26 = vld [vmem:[#allocation35_spill] sm:$0xff]  ;;  %v9900_v22 = vld [vmem:[#allocation36_spill] sm:$0xff] }
 0x347   :  { %1785 = vmatprep.mubr.f32.mxu0 %v9830_v40  ;;  %5493 = vmatprep.mubr.msk.f32.mxu1 %vm8082_vm0, %v9830_v40 }
 0x349   :  { %6637 = vmatpush1.bf16.msra.mxu0 %v9894_v28  ;;  %6667 = vmatpush3.bf16.msra.mxu1 %v9895_v45  ;;  %v9903_v45 = vld [vmem:[#allocation39_spill] sm:$0xff]  ;;  %v9905_v28 = vld [vmem:[#allocation41_spill] sm:$0xff] }
 0x34a   :  { %6639 = vmatprep.subr.bf16.mxu0 %v9896_v60  ;;  %6668 = vmatprep.subr.bf16.mxu1 %v9815_v30  ;;  %v9904_v60 = vld [vmem:[#allocation46_spill] sm:$0xff] }
 0x34d   :  { %6641 = vmatpush1.bf16.msra.mxu0 %v9897_v18  ;;  %6670 = vmatpush3.bf16.msra.mxu1 %v9898_v51  ;;  %v9906_v51 = vld [vmem:[#allocation42_spill] sm:$0xff]  ;;  %v9908_v18 = vld [vmem:[#allocation44_spill] sm:$0xff] }
 0x34e   :  { %6643 = vmatprep.subr.bf16.mxu0 %v9899_v26  ;;  %6671 = vmatprep.subr.bf16.mxu1 %v9815_v30  ;;  %v9907_v26 = vld [vmem:[#allocation49_spill] sm:$0xff] }
 0x351   :  { %6645 = vmatpush1.bf16.msra.mxu0 %v9900_v22  ;;  %6673 = vmatpush3.bf16.msra.mxu1 %v9901_v12  ;;  %v9909_v12 = vld [vmem:[#allocation45_spill] sm:$0xff]  ;;  %v9911_v22 = vld [vmem:[#allocation47_spill] sm:$0xff] }
 0x352   :  { %6647 = vmatprep.subr.bf16.mxu0 %v9902_v38  ;;  %6674 = vmatprep.subr.bf16.mxu1 %v9815_v30  ;;  %v9910_v38 = vld [vmem:[#allocation50_spill] sm:$0xff] }
 0x355   :  { %6649 = vmatpush1.bf16.msra.mxu0 %v9903_v45  ;;  %6676 = vmatpush3.bf16.msra.mxu1 %v9904_v60  ;;  %v9912_v60 = vld [vmem:[#allocation48_spill] sm:$0xff] }
 0x356   :  { %6651 = vmatprep.subr.bf16.mxu0 %v9905_v28  ;;  %6677 = vmatprep.subr.bf16.mxu1 %v9815_v30  ;;  %v9913_v28 = vld [vmem:[#allocation51_spill] sm:$0xff]  ;;  %v9914_v45 = vld [vmem:[#allocation52_spill] sm:$0xff] }
 0x359   :  { %6653 = vmatpush1.bf16.msra.mxu0 %v9906_v51  ;;  %6679 = vmatpush3.bf16.msra.mxu1 %v9907_v26  ;;  %v9925_v26 = vld [vmem:[#allocation63_spill] sm:$0xff]  ;;  %v9926_v51 = vld [vmem:[#allocation64_spill] sm:$0xff] }
 0x35a   :  { %6655 = vmatprep.subr.bf16.mxu0 %v9908_v18  ;;  %6680 = vmatprep.subr.bf16.mxu1 %v9815_v30  ;;  %v9915_v18 = vld [vmem:[#allocation53_spill] sm:$0xff] }
 0x35d   :  { %6657 = vmatpush1.bf16.msra.mxu0 %v9909_v12  ;;  %6682 = vmatpush3.bf16.msra.mxu1 %v9910_v38  ;;  %v9916_v12 = vld [vmem:[#allocation54_spill] sm:$0xff]  ;;  %v9917_v38 = vld [vmem:[#allocation55_spill] sm:$0xff] }
 0x35e   :  { %6659 = vmatprep.subr.bf16.mxu0 %v9911_v22  ;;  %6683 = vmatprep.subr.bf16.mxu1 %v9815_v30  ;;  %v9924_v22 = vld [vmem:[#allocation62_spill] sm:$0xff] }
 0x361   :  { %6661 = vmatpush1.bf16.msra.mxu0 %v9912_v60  ;;  %6685 = vmatpush3.bf16.msra.mxu1 %v9913_v28  ;;  %v9919_v28 = vld [vmem:[#allocation57_spill] sm:$0xff]  ;;  %v9920_v60 = vld [vmem:[#allocation58_spill] sm:$0xff] }
 0x362   :  { %6687 = vmatprep.subr.bf16.mxu0 %v9914_v45  ;;  %6718 = vmatprep.subr.bf16.mxu1 %v9815_v30  ;;  %v9918_v45 = vld [vmem:[#allocation56_spill] sm:$0xff] }
 0x364   :  { %1786 = vmatmul.mubr.f32.vlgmr.msra.gmra.mrb[8].mxu0 %v8716_v63  ;;  %5494 = vmatmul.mubr.f32.vlgmr.msra.gmra.mrb[18].mxu1 %v8716_v63 }
 0x365   :  { %6689 = vmatpush1.bf16.msra.mxu0 %v9915_v18  ;;  %6720 = vmatpush3.bf16.msra.mxu1 %v9916_v12  ;;  %v9921_v18 = vld [vmem:[#allocation59_spill] sm:$0xff]  ;;  %v9922_v12 = vld [vmem:[#allocation60_spill] sm:$0xff] }
 0x366   :  { %6691 = vmatprep.subr.bf16.mxu0 %v9917_v38  ;;  %6721 = vmatprep.subr.bf16.mxu1 %v9815_v30  ;;  %v9923_v38 = vld [vmem:[#allocation61_spill] sm:$0xff] }
 0x367   :  { %1947 = vmatprep.mubr.f32.mxu0 %v9830_v40  ;;  %5528 = vmatprep.mubr.msk.f32.mxu1 %vm8082_vm0, %v9830_v40 }
 0x369   :  { %6693 = vmatpush1.bf16.msra.mxu0 %v9918_v45  ;;  %6723 = vmatpush3.bf16.msra.mxu1 %v9919_v28  ;;  %v9927_v28 = vld [vmem:[#allocation65_spill] sm:$0xff]  ;;  %v9929_v45 = vld [vmem:[#allocation67_spill] sm:$0xff] }
 0x36a   :  { %6695 = vmatprep.subr.bf16.mxu0 %v9920_v60  ;;  %6724 = vmatprep.subr.bf16.mxu1 %v9815_v30  ;;  %v9928_v60 = vld [vmem:[#allocation66_spill] sm:$0xff] }
 0x36d   :  { %6697 = vmatpush1.bf16.msra.mxu0 %v9921_v18  ;;  %6726 = vmatpush3.bf16.msra.mxu1 %v9922_v12  ;;  %v9930_v12 = vld [vmem:[#allocation68_spill] sm:$0xff]  ;;  %v9932_v18 = vld [vmem:[#allocation70_spill] sm:$0xff] }
 0x36e   :  { %6699 = vmatprep.subr.bf16.mxu0 %v9923_v38  ;;  %6727 = vmatprep.subr.bf16.mxu1 %v9815_v30  ;;  %v9931_v38 = vld [vmem:[#allocation69_spill] sm:$0xff] }
 0x371   :  { %6701 = vmatpush1.bf16.msra.mxu0 %v9924_v22  ;;  %6729 = vmatpush3.bf16.msra.mxu1 %v9925_v26  ;;  %v9933_v26 = vld [vmem:[#allocation71_spill] sm:$0xff]  ;;  %v9935_v22 = vld [vmem:[#allocation73_spill] sm:$0xff] }
 0x372   :  { %6703 = vmatprep.subr.bf16.mxu0 %v9926_v51  ;;  %6730 = vmatprep.subr.bf16.mxu1 %v9815_v30  ;;  %v9934_v51 = vld [vmem:[#allocation72_spill] sm:$0xff] }
 0x375   :  { %6705 = vmatpush1.bf16.msra.mxu0 %v9927_v28  ;;  %6732 = vmatpush3.bf16.msra.mxu1 %v9928_v60  ;;  %v9936_v60 = vld [vmem:[#allocation74_spill] sm:$0xff]  ;;  %v9938_v28 = vld [vmem:[#allocation76_spill] sm:$0xff] }
 0x376   :  { %6707 = vmatprep.subr.bf16.mxu0 %v9929_v45  ;;  %6733 = vmatprep.subr.bf16.mxu1 %v9815_v30  ;;  %v9937_v45 = vld [vmem:[#allocation75_spill] sm:$0xff] }
 0x379   :  { %6709 = vmatpush1.bf16.msra.mxu0 %v9930_v12  ;;  %6735 = vmatpush3.bf16.msra.mxu1 %v9931_v38 }
 0x37a   :  { %6711 = vmatprep.subr.bf16.mxu0 %v9932_v18  ;;  %6736 = vmatprep.subr.bf16.mxu1 %v9815_v30 }
 0x37d   :  { %6713 = vmatpush1.bf16.msra.mxu0 %v9933_v26  ;;  %6738 = vmatpush3.bf16.msra.mxu1 %v9934_v51 }
 0x37e   :  { %6715 = vmatprep.subr.bf16.mxu0 %v9935_v22  ;;  %6739 = vmatprep.subr.bf16.mxu1 %v9815_v30  ;;  %v9940_v22 = vld [vmem:[#allocation78_spill] sm:$0xff] }
 0x381   :  { %6717 = vmatpush1.bf16.msra.mxu0 %v9936_v60  ;;  %6741 = vmatpush3.bf16.msra.mxu1 %v9937_v45 }
 0x382   :  { %6743 = vmatprep.subr.bf16.mxu0 %v9938_v28  ;;  %6774 = vmatprep.subr.bf16.mxu1 %v9815_v30 }
 0x3d7   :  { %v1411_v38 = vpop.f32.mrb[12].mxu1 }
 0x3d8   :  { %v5390_v18 = vpop.f32.mrb[13].mxu1  ;;  %v1412_v41 = vadd.f32 %v1411_v38, %v8705_v1 }
 0x3f7   :  { %v1481_v12 = vpop.f32.mrb[6].mxu0  ;;  %v1552_v7 = vpop.f32.mrb[14].mxu1 }
 0x3f8   :  { %v7707_v26 = vadd.f32 %v9939_v62, %v1481_v12  ;;  %v1483_v25 = vpop.f32.mrb[7].mxu0  ;;  %v5425_v51 = vpop.f32.mrb[15].mxu1  ;;  %v1553_v61 = vadd.f32 %v1552_v7, %v9941_v44 }
 0x3f9   :  { %v7709_v53 = vadd.f32 %v9940_v22, %v1483_v25 }
 0x3fa   :  { %v4648_v59 = vmul.f32 -1.442695, %v7707_v26 }
 0x3fb   :  { %v4649_v11 = vmul.f32 -1.442695, %v7709_v53 }
 0x3fc   :  { %7821 = vpow2.f32 %v4648_v59 }
 0x3fd   :  { %7823 = vpow2.f32 %v4649_v11 }
 0x406   :  { %v7822_v60 = vpop.eup %7821 }
 0x407   :  { %v1560_v45 = vadd.f32 1.0, %v7822_v60  ;;  %v7824_v28 = vpop.eup %7823 }
 0x408   :  { %v1567_v50 = vadd.f32 1.0, %v7824_v28 }
 0x409   :  { %7825 = vrcp.f32 %v1560_v45 }
 0x40a   :  { %7827 = vrcp.f32 %v1567_v50 }
 0x413   :  { %v7826_v18 = vpop.eup %7825 }
 0x414   :  { %v1570_v34 = vmul.f32 %v7826_v18, %v1553_v61  ;;  %v7828_v25 = vpop.eup %7827 }
 0x415   :  { %v1573_v59 = vsub.f32 1.0, %v7828_v25  ;;  %v1575_v60 = vmul.f32 %v7828_v25, %v8709_v3  ;;  %v9960_v3 = vld [vmem:[#allocation37_spill] sm:$0xff] }
 0x416   :  { %v1571_v12 = vadd.f32 %v1570_v34, %v1412_v41 }
 0x417   :  { %v1717_v51 = vpop.f32.mrb[16].mxu1 }
 0x418   :  { %7829 = vtanh.f32 %v1571_v12  ;;  %v5460_v26 = vpop.f32.mrb[17].mxu1 }
 0x422   :  { %v7830_v53 = vpop.eup %7829 }
 0x423   :  { %v1574_v11 = vmul.f32 %v7830_v53, %v1573_v59  ;;  %v1718_v53 = vadd.f32 %v1717_v51, %v9880_v39  ;;  %v9945_v51 = vld [vmem:[#allocation22_spill] sm:$0xff] }
 0x425   :  { %v8869_v45 = vadd.f32 %v1575_v60, %v1574_v11 }
 0x427   :  { %9942 = vst [vmem:[#allocation79_spill] sm:$0xff] %v8869_v45 }
 0x437   :  { %v1787_v28 = vpop.f32.mrb[8].mxu0  ;;  %v1858_v22 = vpop.f32.mrb[18].mxu1 }
 0x438   :  { %v7711_v7 = vadd.f32 %v9878_v6, %v1787_v28  ;;  %v1789_v44 = vpop.f32.mrb[9].mxu0  ;;  %v5495_v38 = vpop.f32.mrb[19].mxu1  ;;  %v1859_v25 = vadd.f32 %v1858_v22, %v8484_v0  ;;  %v9943_v22 = vld [vmem:[#allocation16_spill] sm:$0xff] }
 0x439   :  { %v7713_v34 = vadd.f32 %v9879_v2, %v1789_v44 }
 0x43a   :  { %v4650_v61 = vmul.f32 -1.442695, %v7711_v7 }
 0x43b   :  { %v4651_v41 = vmul.f32 -1.442695, %v7713_v34 }
 0x43c   :  { %7831 = vpow2.f32 %v4650_v61 }
 0x43d   :  { %7833 = vpow2.f32 %v4651_v41  ;;  %v9946_v41 = vld [vmem:[#allocation18_spill] sm:$0xff] }
 0x446   :  { %v7832_v50 = vpop.eup %7831 }
 0x447   :  { %v1866_v18 = vadd.f32 1.0, %v7832_v50  ;;  %v7834_v12 = vpop.eup %7833  ;;  %v9947_v50 = vld [vmem:[#allocation19_spill] sm:$0xff] }
 0x448   :  { %v1873_v26 = vadd.f32 1.0, %v7834_v12  ;;  %v9949_v12 = vld [vmem:[#allocation20_spill] sm:$0xff] }
 0x449   :  { %7835 = vrcp.f32 %v1866_v18  ;;  %v9948_v18 = vld [vmem:[#allocation25_spill] sm:$0xff] }
 0x44a   :  { %7837 = vrcp.f32 %v1873_v26  ;;  %v9950_v26 = vld [vmem:[#allocation21_spill] sm:$0xff] }
 0x453   :  { %v7836_v59 = vpop.eup %7835 }
 0x454   :  { %v1876_v11 = vmul.f32 %v7836_v59, %v1859_v25  ;;  %v7838_v28 = vpop.eup %7837  ;;  %v9951_v25 = vld [vmem:[#allocation28_spill] sm:$0xff]  ;;  %v9952_v59 = vld [vmem:[#allocation23_spill] sm:$0xff] }
 0x455   :  { %v1879_v7 = vsub.f32 1.0, %v7838_v28  ;;  %v1881_v61 = vmul.f32 %v7838_v28, %v8716_v63  ;;  %v9944_v63 = vld [vmem:[#allocation17_spill] sm:$0xff]  ;;  %v9955_v28 = vld [vmem:[#allocation26_spill] sm:$0xff] }
 0x456   :  { %v1877_v60 = vadd.f32 %v1876_v11, %v1718_v53  ;;  %v9953_v53 = vld [vmem:[#allocation24_spill] sm:$0xff]  ;;  %v9954_v11 = vld [vmem:[#allocation31_spill] sm:$0xff] }
 0x458   :  { %7839 = vtanh.f32 %v1877_v60  ;;  %v2188_v60 = vld [vmem:[#allocation2 + $0x18] sm:$0xff] }
 0x462   :  { %v7840_v44 = vpop.eup %7839 }
 0x463   :  { %v1880_v38 = vmul.f32 %v7840_v44, %v1879_v7  ;;  %v9956_v7 = vld [vmem:[#allocation27_spill] sm:$0xff]  ;;  %v9957_v44 = vld [vmem:[#allocation34_spill] sm:$0xff] }
 0x465   :  { %v8876_v34 = vadd.f32 %v1881_v61, %v1880_v38  ;;  %v9958_v38 = vld [vmem:[#allocation29_spill] sm:$0xff]  ;;  %v9959_v61 = vld [vmem:[#allocation30_spill] sm:$0xff] }
 0x467   :  { %1948 = vmatmul.mubr.f32.vlgmr.msra.gmra.mrb[10].mxu0 %v8876_v34  ;;  %5529 = vmatmul.mubr.f32.vlgmr.msra.gmra.mrb[20].mxu1 %v8876_v34 }
 0x468   :  { %6745 = vmatpush1.bf16.msra.mxu0 %v8491_v17  ;;  %6776 = vmatpush3.bf16.msra.mxu1 %v9881_v37 }
 0x469   :  { %6747 = vmatprep.subr.bf16.mxu0 %v9882_v48  ;;  %6777 = vmatprep.subr.bf16.mxu1 %v9815_v30 }
 0x46a   :  { %2088 = vmatprep.mubr.f32.mxu0 %v9830_v40  ;;  %5563 = vmatprep.mubr.msk.f32.mxu1 %vm8082_vm0, %v9830_v40 }
 0x46c   :  { %6749 = vmatpush1.bf16.msra.mxu0 %v9883_v19  ;;  %6779 = vmatpush3.bf16.msra.mxu1 %v9884_v4 }
 0x46d   :  { %6751 = vmatprep.subr.bf16.mxu0 %v9885_v54  ;;  %6780 = vmatprep.subr.bf16.mxu1 %v9815_v30 }
 0x470   :  { %6753 = vmatpush1.bf16.msra.mxu0 %v9886_v20  ;;  %6782 = vmatpush3.bf16.msra.mxu1 %v9887_v42 }
 0x471   :  { %6755 = vmatprep.subr.bf16.mxu0 %v9888_v24  ;;  %6783 = vmatprep.subr.bf16.mxu1 %v9815_v30 }
 0x474   :  { %6757 = vmatpush1.bf16.msra.mxu0 %v9889_v49  ;;  %6785 = vmatpush3.bf16.msra.mxu1 %v9890_v31 }
 0x475   :  { %6759 = vmatprep.subr.bf16.mxu0 %v9891_v8  ;;  %6786 = vmatprep.subr.bf16.mxu1 %v9815_v30 }
 0x478   :  { %6761 = vmatpush1.bf16.msra.mxu0 %v8536_v27  ;;  %6788 = vmatpush3.bf16.msra.mxu1 %v8538_v14 }
 0x479   :  { %6763 = vmatprep.subr.bf16.mxu0 %v9892_v58  ;;  %6789 = vmatprep.subr.bf16.mxu1 %v9815_v30 }
 0x47c   :  { %6765 = vmatpush1.bf16.msra.mxu0 %v9893_v36  ;;  %6791 = vmatpush3.bf16.msra.mxu1 %v8548_v47 }
 0x47d   :  { %6767 = vmatprep.subr.bf16.mxu0 %v8552_v56  ;;  %6792 = vmatprep.subr.bf16.mxu1 %v9815_v30 }
 0x480   :  { %6769 = vmatpush1.bf16.msra.mxu0 %v8556_v57  ;;  %6794 = vmatpush3.bf16.msra.mxu1 %v8558_v13 }
 0x481   :  { %6771 = vmatprep.subr.bf16.mxu0 %v8562_v55  ;;  %6795 = vmatprep.subr.bf16.mxu1 %v9815_v30 }
 0x484   :  { %6773 = vmatpush1.bf16.msra.mxu0 %v8566_v46  ;;  %6797 = vmatpush3.bf16.msra.mxu1 %v8568_v35 }
 0x485   :  { %6799 = vmatprep.subr.bf16.mxu0 %v8210_v5  ;;  %6830 = vmatprep.subr.bf16.mxu1 %v9815_v30 }
 0x487   :  { %2089 = vmatmul.mubr.f32.vlgmr.msra.gmra.mrb[10].mxu0 %v8869_v45  ;;  %5564 = vmatmul.mubr.f32.vlgmr.msra.gmra.mrb[22].mxu1 %v8869_v45 }
 0x488   :  { %6801 = vmatpush1.bf16.msra.mxu0 %v8212_v9  ;;  %6832 = vmatpush3.bf16.msra.mxu1 %v8229_v29 }
 0x489   :  { %6803 = vmatprep.subr.bf16.mxu0 %v8214_v10  ;;  %6833 = vmatprep.subr.bf16.mxu1 %v9815_v30 }
 0x48a   :  { %2253 = vmatprep.mubr.f32.mxu0 %v9830_v40  ;;  %5598 = vmatprep.mubr.msk.f32.mxu1 %vm8082_vm0, %v9830_v40 }
 0x48c   :  { %6805 = vmatpush1.bf16.msra.mxu0 %v8218_v15  ;;  %6835 = vmatpush3.bf16.msra.mxu1 %v8235_v33 }
 0x48d   :  { %6807 = vmatprep.subr.bf16.mxu0 %v8221_v16  ;;  %6836 = vmatprep.subr.bf16.mxu1 %v9815_v30 }
 0x490   :  { %6809 = vmatpush1.bf16.msra.mxu0 %v8224_v21  ;;  %6838 = vmatpush3.bf16.msra.mxu1 %v8245_v43 }
 0x491   :  { %6811 = vmatprep.subr.bf16.mxu0 %v8227_v23  ;;  %6839 = vmatprep.subr.bf16.mxu1 %v9815_v30 }
 0x494   :  { %6813 = vmatpush1.bf16.msra.mxu0 %v8232_v32  ;;  %6841 = vmatpush3.bf16.msra.mxu1 %v8255_v52 }
 0x495   :  { %6815 = vmatprep.subr.bf16.mxu0 %v9943_v22  ;;  %6842 = vmatprep.subr.bf16.mxu1 %v9815_v30 }
 0x498   :  { %6817 = vmatpush1.bf16.msra.mxu0 %v9944_v63  ;;  %6844 = vmatpush3.bf16.msra.mxu1 %v9945_v51 }
 0x499   :  { %6819 = vmatprep.subr.bf16.mxu0 %v9946_v41  ;;  %6845 = vmatprep.subr.bf16.mxu1 %v9815_v30  ;;  %v10005_v41 = vld [vmem:[#allocation81_spill] sm:$0xff] }
 0x49c   :  { %6821 = vmatpush1.bf16.msra.mxu0 %v9947_v50  ;;  %6847 = vmatpush3.bf16.msra.mxu1 %v9948_v18 }
 0x49d   :  { %6823 = vmatprep.subr.bf16.mxu0 %v9949_v12  ;;  %6848 = vmatprep.subr.bf16.mxu1 %v9815_v30 }
 0x4a0   :  { %6825 = vmatpush1.bf16.msra.mxu0 %v9950_v26  ;;  %6850 = vmatpush3.bf16.msra.mxu1 %v9951_v25 }
 0x4a1   :  { %6827 = vmatprep.subr.bf16.mxu0 %v9952_v59  ;;  %6851 = vmatprep.subr.bf16.mxu1 %v9815_v30 }
 0x4a4   :  { %6829 = vmatpush1.bf16.msra.mxu0 %v9953_v53  ;;  %6853 = vmatpush3.bf16.msra.mxu1 %v9954_v11  ;;  %v9966_v11 = vld [vmem:[#allocation43_spill] sm:$0xff]  ;;  %v9967_v53 = vld [vmem:[#allocation38_spill] sm:$0xff] }
 0x4a5   :  { %6855 = vmatprep.subr.bf16.mxu0 %v9955_v28  ;;  %6886 = vmatprep.subr.bf16.mxu1 %v9815_v30  ;;  %v9961_v28 = vld [vmem:[#allocation32_spill] sm:$0xff] }
 0x4a7   :  { %2254 = vmatmul.mubr.f32.vlgmr.msra.gmra.mrb[12].mxu0 %v2188_v60  ;;  %5599 = vmatmul.mubr.f32.vlgmr.msra.gmra.mrb[24].mxu1 %v2188_v60  ;;  %v9962_v60 = vld [vmem:[#allocation33_spill] sm:$0xff] }
 0x4a8   :  { %6857 = vmatpush1.bf16.msra.mxu0 %v9956_v7  ;;  %6888 = vmatpush3.bf16.msra.mxu1 %v9957_v44  ;;  %v9963_v44 = vld [vmem:[#allocation40_spill] sm:$0xff] }
 0x4a9   :  { %6859 = vmatprep.subr.bf16.mxu0 %v9958_v38  ;;  %6889 = vmatprep.subr.bf16.mxu1 %v9815_v30  ;;  %v9964_v38 = vld [vmem:[#allocation35_spill] sm:$0xff]  ;;  %v9965_v7 = vld [vmem:[#allocation36_spill] sm:$0xff] }
 0x4aa   :  { %2394 = vmatprep.mubr.f32.mxu0 %v9830_v40  ;;  %5633 = vmatprep.mubr.msk.f32.mxu1 %vm8082_vm0, %v9830_v40 }
 0x4ac   :  { %6861 = vmatpush1.bf16.msra.mxu0 %v9959_v61  ;;  %6891 = vmatpush3.bf16.msra.mxu1 %v9960_v3  ;;  %v9968_v3 = vld [vmem:[#allocation39_spill] sm:$0xff]  ;;  %v9970_v61 = vld [vmem:[#allocation41_spill] sm:$0xff] }
 0x4ad   :  { %6863 = vmatprep.subr.bf16.mxu0 %v9961_v28  ;;  %6892 = vmatprep.subr.bf16.mxu1 %v9815_v30  ;;  %v9969_v28 = vld [vmem:[#allocation46_spill] sm:$0xff] }
 0x4b0   :  { %6865 = vmatpush1.bf16.msra.mxu0 %v9962_v60  ;;  %6894 = vmatpush3.bf16.msra.mxu1 %v9963_v44  ;;  %v9971_v44 = vld [vmem:[#allocation42_spill] sm:$0xff]  ;;  %v9973_v60 = vld [vmem:[#allocation44_spill] sm:$0xff] }
 0x4b1   :  { %6867 = vmatprep.subr.bf16.mxu0 %v9964_v38  ;;  %6895 = vmatprep.subr.bf16.mxu1 %v9815_v30  ;;  %v9972_v38 = vld [vmem:[#allocation49_spill] sm:$0xff] }
 0x4b4   :  { %6869 = vmatpush1.bf16.msra.mxu0 %v9965_v7  ;;  %6897 = vmatpush3.bf16.msra.mxu1 %v9966_v11  ;;  %v9974_v11 = vld [vmem:[#allocation45_spill] sm:$0xff]  ;;  %v9976_v7 = vld [vmem:[#allocation47_spill] sm:$0xff] }
 0x4b5   :  { %6871 = vmatprep.subr.bf16.mxu0 %v9967_v53  ;;  %6898 = vmatprep.subr.bf16.mxu1 %v9815_v30  ;;  %v9975_v53 = vld [vmem:[#allocation50_spill] sm:$0xff] }
 0x4b8   :  { %6873 = vmatpush1.bf16.msra.mxu0 %v9968_v3  ;;  %6900 = vmatpush3.bf16.msra.mxu1 %v9969_v28  ;;  %v9977_v28 = vld [vmem:[#allocation48_spill] sm:$0xff] }
 0x4b9   :  { %6875 = vmatprep.subr.bf16.mxu0 %v9970_v61  ;;  %6901 = vmatprep.subr.bf16.mxu1 %v9815_v30  ;;  %v9978_v61 = vld [vmem:[#allocation51_spill] sm:$0xff]  ;;  %v9979_v3 = vld [vmem:[#allocation52_spill] sm:$0xff] }
 0x4bc   :  { %6877 = vmatpush1.bf16.msra.mxu0 %v9971_v44  ;;  %6903 = vmatpush3.bf16.msra.mxu1 %v9972_v38  ;;  %v9990_v38 = vld [vmem:[#allocation63_spill] sm:$0xff]  ;;  %v9991_v44 = vld [vmem:[#allocation64_spill] sm:$0xff] }
 0x4bd   :  { %6879 = vmatprep.subr.bf16.mxu0 %v9973_v60  ;;  %6904 = vmatprep.subr.bf16.mxu1 %v9815_v30  ;;  %v9980_v60 = vld [vmem:[#allocation53_spill] sm:$0xff] }
 0x4c0   :  { %6881 = vmatpush1.bf16.msra.mxu0 %v9974_v11  ;;  %6906 = vmatpush3.bf16.msra.mxu1 %v9975_v53  ;;  %v9981_v11 = vld [vmem:[#allocation54_spill] sm:$0xff]  ;;  %v9982_v53 = vld [vmem:[#allocation55_spill] sm:$0xff] }
 0x4c1   :  { %6883 = vmatprep.subr.bf16.mxu0 %v9976_v7  ;;  %6907 = vmatprep.subr.bf16.mxu1 %v9815_v30  ;;  %v9989_v7 = vld [vmem:[#allocation62_spill] sm:$0xff] }
 0x4c4   :  { %6885 = vmatpush1.bf16.msra.mxu0 %v9977_v28  ;;  %6909 = vmatpush3.bf16.msra.mxu1 %v9978_v61  ;;  %v9984_v61 = vld [vmem:[#allocation57_spill] sm:$0xff]  ;;  %v9985_v28 = vld [vmem:[#allocation58_spill] sm:$0xff] }
 0x4c5   :  { %6911 = vmatprep.subr.bf16.mxu0 %v9979_v3  ;;  %6942 = vmatprep.subr.bf16.mxu1 %v9815_v30  ;;  %v9983_v3 = vld [vmem:[#allocation56_spill] sm:$0xff] }
 0x4c7   :  { %2395 = vmatmul.mubr.f32.vlgmr.msra.gmra.mrb[12].mxu0 %v8876_v34  ;;  %5634 = vmatmul.mubr.f32.vlgmr.msra.gmra.mrb[26].mxu1 %v8876_v34 }
 0x4c8   :  { %6913 = vmatpush1.bf16.msra.mxu0 %v9980_v60  ;;  %6944 = vmatpush3.bf16.msra.mxu1 %v9981_v11  ;;  %v9986_v60 = vld [vmem:[#allocation59_spill] sm:$0xff]  ;;  %v9987_v11 = vld [vmem:[#allocation60_spill] sm:$0xff] }
 0x4c9   :  { %6915 = vmatprep.subr.bf16.mxu0 %v9982_v53  ;;  %6945 = vmatprep.subr.bf16.mxu1 %v9815_v30  ;;  %v9988_v53 = vld [vmem:[#allocation61_spill] sm:$0xff] }
 0x4ca   :  { %2556 = vmatprep.mubr.f32.mxu0 %v9830_v40  ;;  %5668 = vmatprep.mubr.msk.f32.mxu1 %vm8082_vm0, %v9830_v40 }
 0x4cc   :  { %6917 = vmatpush1.bf16.msra.mxu0 %v9983_v3  ;;  %6947 = vmatpush3.bf16.msra.mxu1 %v9984_v61  ;;  %v9992_v61 = vld [vmem:[#allocation65_spill] sm:$0xff]  ;;  %v9994_v3 = vld [vmem:[#allocation67_spill] sm:$0xff] }
 0x4cd   :  { %6919 = vmatprep.subr.bf16.mxu0 %v9985_v28  ;;  %6948 = vmatprep.subr.bf16.mxu1 %v9815_v30  ;;  %v9993_v28 = vld [vmem:[#allocation66_spill] sm:$0xff] }
 0x4d0   :  { %6921 = vmatpush1.bf16.msra.mxu0 %v9986_v60  ;;  %6950 = vmatpush3.bf16.msra.mxu1 %v9987_v11  ;;  %v9995_v11 = vld [vmem:[#allocation68_spill] sm:$0xff]  ;;  %v9997_v60 = vld [vmem:[#allocation70_spill] sm:$0xff] }
 0x4d1   :  { %6923 = vmatprep.subr.bf16.mxu0 %v9988_v53  ;;  %6951 = vmatprep.subr.bf16.mxu1 %v9815_v30  ;;  %v9996_v53 = vld [vmem:[#allocation69_spill] sm:$0xff] }
 0x4d4   :  { %6925 = vmatpush1.bf16.msra.mxu0 %v9989_v7  ;;  %6953 = vmatpush3.bf16.msra.mxu1 %v9990_v38  ;;  %v9998_v38 = vld [vmem:[#allocation71_spill] sm:$0xff]  ;;  %v10000_v7 = vld [vmem:[#allocation73_spill] sm:$0xff] }
 0x4d5   :  { %6927 = vmatprep.subr.bf16.mxu0 %v9991_v44  ;;  %6954 = vmatprep.subr.bf16.mxu1 %v9815_v30  ;;  %v9999_v44 = vld [vmem:[#allocation72_spill] sm:$0xff] }
 0x4d8   :  { %6929 = vmatpush1.bf16.msra.mxu0 %v9992_v61  ;;  %6956 = vmatpush3.bf16.msra.mxu1 %v9993_v28  ;;  %v10001_v28 = vld [vmem:[#allocation74_spill] sm:$0xff]  ;;  %v10003_v61 = vld [vmem:[#allocation76_spill] sm:$0xff] }
 0x4d9   :  { %6931 = vmatprep.subr.bf16.mxu0 %v9994_v3  ;;  %6957 = vmatprep.subr.bf16.mxu1 %v9815_v30  ;;  %v10002_v3 = vld [vmem:[#allocation75_spill] sm:$0xff] }
 0x4dc   :  { %6933 = vmatpush1.bf16.msra.mxu0 %v9995_v11  ;;  %6959 = vmatpush3.bf16.msra.mxu1 %v9996_v53 }
 0x4dd   :  { %6935 = vmatprep.subr.bf16.mxu0 %v9997_v60  ;;  %6960 = vmatprep.subr.bf16.mxu1 %v9815_v30 }
 0x4e0   :  { %6937 = vmatpush1.bf16.msra.mxu0 %v9998_v38  ;;  %6962 = vmatpush3.bf16.msra.mxu1 %v9999_v44 }
 0x4e1   :  { %6939 = vmatprep.subr.bf16.mxu0 %v10000_v7  ;;  %6963 = vmatprep.subr.bf16.mxu1 %v9815_v30  ;;  %v10004_v7 = vld [vmem:[#allocation78_spill] sm:$0xff] }
 0x4e4   :  { %6941 = vmatpush1.bf16.msra.mxu0 %v10001_v28  ;;  %6965 = vmatpush3.bf16.msra.mxu1 %v10002_v3 }
 0x4e5   :  { %6967 = vmatprep.subr.bf16.mxu0 %v10003_v61  ;;  %6998 = vmatprep.subr.bf16.mxu1 %v9815_v30 }
 0x53a   :  { %v2020_v53 = vpop.f32.mrb[20].mxu1 }
 0x53b   :  { %v5530_v60 = vpop.f32.mrb[21].mxu1  ;;  %v2021_v63 = vadd.f32 %v2020_v53, %v8705_v1 }
 0x55a   :  { %v2090_v11 = vpop.f32.mrb[10].mxu0  ;;  %v2161_v59 = vpop.f32.mrb[22].mxu1 }
 0x55b   :  { %v7715_v38 = vadd.f32 %v9939_v62, %v2090_v11  ;;  %v2092_v25 = vpop.f32.mrb[11].mxu0  ;;  %v5565_v44 = vpop.f32.mrb[23].mxu1  ;;  %v2162_v51 = vadd.f32 %v2161_v59, %v10005_v41 }
 0x55c   :  { %v7717_v12 = vadd.f32 %v10004_v7, %v2092_v25 }
 0x55d   :  { %v4652_v26 = vmul.f32 -1.442695, %v7715_v38 }
 0x55e   :  { %v4653_v18 = vmul.f32 -1.442695, %v7717_v12 }
 0x55f   :  { %7841 = vpow2.f32 %v4652_v26 }
 0x560   :  { %7843 = vpow2.f32 %v4653_v18 }
 0x569   :  { %v7842_v28 = vpop.eup %7841 }
 0x56a   :  { %v2169_v3 = vadd.f32 1.0, %v7842_v28  ;;  %v7844_v61 = vpop.eup %7843 }
 0x56b   :  { %v2176_v50 = vadd.f32 1.0, %v7844_v61 }
 0x56c   :  { %7845 = vrcp.f32 %v2169_v3 }
 0x56d   :  { %7847 = vrcp.f32 %v2176_v50 }
 0x576   :  { %v7846_v60 = vpop.eup %7845 }
 0x577   :  { %v2179_v22 = vmul.f32 %v7846_v60, %v2162_v51  ;;  %v7848_v25 = vpop.eup %7847 }
 0x578   :  { %v2182_v26 = vsub.f32 1.0, %v7848_v25  ;;  %v2184_v28 = vmul.f32 %v7848_v25, %v8869_v45  ;;  %v10024_v45 = vld [vmem:[#allocation37_spill] sm:$0xff] }
 0x579   :  { %v2180_v11 = vadd.f32 %v2179_v22, %v2021_v63 }
 0x57a   :  { %v2326_v44 = vpop.f32.mrb[24].mxu1 }
 0x57b   :  { %7849 = vtanh.f32 %v2180_v11  ;;  %v5600_v38 = vpop.f32.mrb[25].mxu1 }
 0x585   :  { %v7850_v12 = vpop.eup %7849 }
 0x586   :  { %v2183_v18 = vmul.f32 %v7850_v12, %v2182_v26  ;;  %v2327_v12 = vadd.f32 %v2326_v44, %v9880_v39  ;;  %v10009_v44 = vld [vmem:[#allocation22_spill] sm:$0xff] }
 0x588   :  { %v9029_v3 = vadd.f32 %v2184_v28, %v2183_v18 }
 0x58a   :  { %10006 = vst [vmem:[#allocation80_spill] sm:$0xff] %v9029_v3 }
 0x59a   :  { %v2396_v61 = vpop.f32.mrb[12].mxu0  ;;  %v2467_v7 = vpop.f32.mrb[26].mxu1 }
 0x59b   :  { %v7719_v59 = vadd.f32 %v9878_v6, %v2396_v61  ;;  %v2398_v41 = vpop.f32.mrb[13].mxu0  ;;  %v5635_v53 = vpop.f32.mrb[27].mxu1  ;;  %v2468_v25 = vadd.f32 %v2467_v7, %v8484_v0  ;;  %v10008_v7 = vld [vmem:[#allocation17_spill] sm:$0xff] }
 0x59c   :  { %v7721_v22 = vadd.f32 %v9879_v2, %v2398_v41 }
 0x59d   :  { %v4654_v51 = vmul.f32 -1.442695, %v7719_v59 }
 0x59e   :  { %v4655_v63 = vmul.f32 -1.442695, %v7721_v22 }
 0x59f   :  { %7851 = vpow2.f32 %v4654_v51 }
 0x5a0   :  { %7853 = vpow2.f32 %v4655_v63  ;;  %v10010_v63 = vld [vmem:[#allocation18_spill] sm:$0xff] }
 0x5a9   :  { %v7852_v50 = vpop.eup %7851 }
 0x5aa   :  { %v2475_v60 = vadd.f32 1.0, %v7852_v50  ;;  %v7854_v11 = vpop.eup %7853  ;;  %v10011_v50 = vld [vmem:[#allocation19_spill] sm:$0xff] }
 0x5ab   :  { %v2482_v38 = vadd.f32 1.0, %v7854_v11  ;;  %v10013_v11 = vld [vmem:[#allocation20_spill] sm:$0xff] }
 0x5ac   :  { %7855 = vrcp.f32 %v2475_v60  ;;  %v10012_v60 = vld [vmem:[#allocation25_spill] sm:$0xff] }
 0x5ad   :  { %7857 = vrcp.f32 %v2482_v38  ;;  %v10014_v38 = vld [vmem:[#allocation21_spill] sm:$0xff] }
 0x5b6   :  { %v7856_v26 = vpop.eup %7855 }
 0x5b7   :  { %v2485_v18 = vmul.f32 %v7856_v26, %v2468_v25  ;;  %v7858_v61 = vpop.eup %7857  ;;  %v10015_v25 = vld [vmem:[#allocation28_spill] sm:$0xff]  ;;  %v10016_v26 = vld [vmem:[#allocation23_spill] sm:$0xff] }
 0x5b8   :  { %v2488_v59 = vsub.f32 1.0, %v7858_v61  ;;  %v2490_v51 = vmul.f32 %v7858_v61, %v8876_v34  ;;  %v10007_v34 = vld [vmem:[#allocation16_spill] sm:$0xff]  ;;  %v10019_v61 = vld [vmem:[#allocation26_spill] sm:$0xff] }
 0x5b9   :  { %v2486_v28 = vadd.f32 %v2485_v18, %v2327_v12  ;;  %v10017_v12 = vld [vmem:[#allocation24_spill] sm:$0xff]  ;;  %v10018_v18 = vld [vmem:[#allocation31_spill] sm:$0xff] }
 0x5bb   :  { %7859 = vtanh.f32 %v2486_v28  ;;  %v2797_v28 = vld [vmem:[#allocation2 + $0x20] sm:$0xff] }
 0x5c5   :  { %v7860_v41 = vpop.eup %7859 }
 0x5c6   :  { %v2489_v53 = vmul.f32 %v7860_v41, %v2488_v59  ;;  %v10020_v59 = vld [vmem:[#allocation27_spill] sm:$0xff]  ;;  %v10021_v41 = vld [vmem:[#allocation34_spill] sm:$0xff] }
 0x5c8   :  { %v9036_v22 = vadd.f32 %v2490_v51, %v2489_v53  ;;  %v10022_v53 = vld [vmem:[#allocation29_spill] sm:$0xff]  ;;  %v10023_v51 = vld [vmem:[#allocation30_spill] sm:$0xff] }
 0x5ca   :  { %2557 = vmatmul.mubr.f32.vlgmr.msra.gmra.mrb[14].mxu0 %v9036_v22  ;;  %5669 = vmatmul.mubr.f32.vlgmr.msra.gmra.mrb[28].mxu1 %v9036_v22 }
 0x5cb   :  { %6969 = vmatpush1.bf16.msra.mxu0 %v8491_v17  ;;  %7000 = vmatpush3.bf16.msra.mxu1 %v9881_v37 }
 0x5cc   :  { %6971 = vmatprep.subr.bf16.mxu0 %v9882_v48  ;;  %7001 = vmatprep.subr.bf16.mxu1 %v9815_v30 }
 0x5cd   :  { %2697 = vmatprep.mubr.f32.mxu0 %v9830_v40  ;;  %5703 = vmatprep.mubr.msk.f32.mxu1 %vm8082_vm0, %v9830_v40 }
 0x5cf   :  { %6973 = vmatpush1.bf16.msra.mxu0 %v9883_v19  ;;  %7003 = vmatpush3.bf16.msra.mxu1 %v9884_v4 }
 0x5d0   :  { %6975 = vmatprep.subr.bf16.mxu0 %v9885_v54  ;;  %7004 = vmatprep.subr.bf16.mxu1 %v9815_v30 }
 0x5d3   :  { %6977 = vmatpush1.bf16.msra.mxu0 %v9886_v20  ;;  %7006 = vmatpush3.bf16.msra.mxu1 %v9887_v42 }
 0x5d4   :  { %6979 = vmatprep.subr.bf16.mxu0 %v9888_v24  ;;  %7007 = vmatprep.subr.bf16.mxu1 %v9815_v30 }
 0x5d7   :  { %6981 = vmatpush1.bf16.msra.mxu0 %v9889_v49  ;;  %7009 = vmatpush3.bf16.msra.mxu1 %v9890_v31 }
 0x5d8   :  { %6983 = vmatprep.subr.bf16.mxu0 %v9891_v8  ;;  %7010 = vmatprep.subr.bf16.mxu1 %v9815_v30 }
 0x5db   :  { %6985 = vmatpush1.bf16.msra.mxu0 %v8536_v27  ;;  %7012 = vmatpush3.bf16.msra.mxu1 %v8538_v14 }
 0x5dc   :  { %6987 = vmatprep.subr.bf16.mxu0 %v9892_v58  ;;  %7013 = vmatprep.subr.bf16.mxu1 %v9815_v30 }
 0x5df   :  { %6989 = vmatpush1.bf16.msra.mxu0 %v9893_v36  ;;  %7015 = vmatpush3.bf16.msra.mxu1 %v8548_v47 }
 0x5e0   :  { %6991 = vmatprep.subr.bf16.mxu0 %v8552_v56  ;;  %7016 = vmatprep.subr.bf16.mxu1 %v9815_v30 }
 0x5e3   :  { %6993 = vmatpush1.bf16.msra.mxu0 %v8556_v57  ;;  %7018 = vmatpush3.bf16.msra.mxu1 %v8558_v13 }
 0x5e4   :  { %6995 = vmatprep.subr.bf16.mxu0 %v8562_v55  ;;  %7019 = vmatprep.subr.bf16.mxu1 %v9815_v30 }
 0x5e7   :  { %6997 = vmatpush1.bf16.msra.mxu0 %v8566_v46  ;;  %7021 = vmatpush3.bf16.msra.mxu1 %v8568_v35 }
 0x5e8   :  { %7023 = vmatprep.subr.bf16.mxu0 %v8210_v5  ;;  %7054 = vmatprep.subr.bf16.mxu1 %v9815_v30 }
 0x5ea   :  { %2698 = vmatmul.mubr.f32.vlgmr.msra.gmra.mrb[14].mxu0 %v9029_v3  ;;  %5704 = vmatmul.mubr.f32.vlgmr.msra.gmra.mrb[30].mxu1 %v9029_v3 }
 0x5eb   :  { %7025 = vmatpush1.bf16.msra.mxu0 %v8212_v9  ;;  %7056 = vmatpush3.bf16.msra.mxu1 %v8229_v29 }
 0x5ec   :  { %7027 = vmatprep.subr.bf16.mxu0 %v8214_v10  ;;  %7057 = vmatprep.subr.bf16.mxu1 %v9815_v30 }
 0x5ed   :  { %2862 = vmatprep.mubr.f32.mxu0 %v9830_v40  ;;  %5738 = vmatprep.mubr.msk.f32.mxu1 %vm8082_vm0, %v9830_v40 }
 0x5ef   :  { %7029 = vmatpush1.bf16.msra.mxu0 %v8218_v15  ;;  %7059 = vmatpush3.bf16.msra.mxu1 %v8235_v33 }
 0x5f0   :  { %7031 = vmatprep.subr.bf16.mxu0 %v8221_v16  ;;  %7060 = vmatprep.subr.bf16.mxu1 %v9815_v30 }
 0x5f3   :  { %7033 = vmatpush1.bf16.msra.mxu0 %v8224_v21  ;;  %7062 = vmatpush3.bf16.msra.mxu1 %v8245_v43 }
 0x5f4   :  { %7035 = vmatprep.subr.bf16.mxu0 %v8227_v23  ;;  %7063 = vmatprep.subr.bf16.mxu1 %v9815_v30 }
 0x5f7   :  { %7037 = vmatpush1.bf16.msra.mxu0 %v8232_v32  ;;  %7065 = vmatpush3.bf16.msra.mxu1 %v8255_v52 }
 0x5f8   :  { %7039 = vmatprep.subr.bf16.mxu0 %v10007_v34  ;;  %7066 = vmatprep.subr.bf16.mxu1 %v9815_v30 }
 0x5fb   :  { %7041 = vmatpush1.bf16.msra.mxu0 %v10008_v7  ;;  %7068 = vmatpush3.bf16.msra.mxu1 %v10009_v44 }
 0x5fc   :  { %7043 = vmatprep.subr.bf16.mxu0 %v10010_v63  ;;  %7069 = vmatprep.subr.bf16.mxu1 %v9815_v30  ;;  %v10069_v63 = vld [vmem:[#allocation81_spill] sm:$0xff] }
 0x5ff   :  { %7045 = vmatpush1.bf16.msra.mxu0 %v10011_v50  ;;  %7071 = vmatpush3.bf16.msra.mxu1 %v10012_v60 }
 0x600   :  { %7047 = vmatprep.subr.bf16.mxu0 %v10013_v11  ;;  %7072 = vmatprep.subr.bf16.mxu1 %v9815_v30 }
 0x603   :  { %7049 = vmatpush1.bf16.msra.mxu0 %v10014_v38  ;;  %7074 = vmatpush3.bf16.msra.mxu1 %v10015_v25 }
 0x604   :  { %7051 = vmatprep.subr.bf16.mxu0 %v10016_v26  ;;  %7075 = vmatprep.subr.bf16.mxu1 %v9815_v30 }
 0x607   :  { %7053 = vmatpush1.bf16.msra.mxu0 %v10017_v12  ;;  %7077 = vmatpush3.bf16.msra.mxu1 %v10018_v18  ;;  %v10030_v18 = vld [vmem:[#allocation43_spill] sm:$0xff]  ;;  %v10031_v12 = vld [vmem:[#allocation38_spill] sm:$0xff] }
 0x608   :  { %7079 = vmatprep.subr.bf16.mxu0 %v10019_v61  ;;  %7110 = vmatprep.subr.bf16.mxu1 %v9815_v30  ;;  %v10025_v61 = vld [vmem:[#allocation32_spill] sm:$0xff] }
 0x60a   :  { %2863 = vmatmul.mubr.f32.vlgmr.msra.gmra.mrb[16].mxu0 %v2797_v28  ;;  %5739 = vmatmul.mubr.f32.vlgmr.msra.gmra.mrb[32].mxu1 %v2797_v28  ;;  %v10026_v28 = vld [vmem:[#allocation33_spill] sm:$0xff] }
 0x60b   :  { %7081 = vmatpush1.bf16.msra.mxu0 %v10020_v59  ;;  %7112 = vmatpush3.bf16.msra.mxu1 %v10021_v41  ;;  %v10027_v41 = vld [vmem:[#allocation40_spill] sm:$0xff] }
 0x60c   :  { %7083 = vmatprep.subr.bf16.mxu0 %v10022_v53  ;;  %7113 = vmatprep.subr.bf16.mxu1 %v9815_v30  ;;  %v10028_v53 = vld [vmem:[#allocation35_spill] sm:$0xff]  ;;  %v10029_v59 = vld [vmem:[#allocation36_spill] sm:$0xff] }
 0x60d   :  { %3003 = vmatprep.mubr.f32.mxu0 %v9830_v40  ;;  %5773 = vmatprep.mubr.msk.f32.mxu1 %vm8082_vm0, %v9830_v40 }
 0x60f   :  { %7085 = vmatpush1.bf16.msra.mxu0 %v10023_v51  ;;  %7115 = vmatpush3.bf16.msra.mxu1 %v10024_v45  ;;  %v10032_v45 = vld [vmem:[#allocation39_spill] sm:$0xff]  ;;  %v10034_v51 = vld [vmem:[#allocation41_spill] sm:$0xff] }
 0x610   :  { %7087 = vmatprep.subr.bf16.mxu0 %v10025_v61  ;;  %7116 = vmatprep.subr.bf16.mxu1 %v9815_v30  ;;  %v10033_v61 = vld [vmem:[#allocation46_spill] sm:$0xff] }
 0x613   :  { %7089 = vmatpush1.bf16.msra.mxu0 %v10026_v28  ;;  %7118 = vmatpush3.bf16.msra.mxu1 %v10027_v41  ;;  %v10035_v41 = vld [vmem:[#allocation42_spill] sm:$0xff]  ;;  %v10037_v28 = vld [vmem:[#allocation44_spill] sm:$0xff] }
 0x614   :  { %7091 = vmatprep.subr.bf16.mxu0 %v10028_v53  ;;  %7119 = vmatprep.subr.bf16.mxu1 %v9815_v30  ;;  %v10036_v53 = vld [vmem:[#allocation49_spill] sm:$0xff] }
 0x617   :  { %7093 = vmatpush1.bf16.msra.mxu0 %v10029_v59  ;;  %7121 = vmatpush3.bf16.msra.mxu1 %v10030_v18  ;;  %v10038_v18 = vld [vmem:[#allocation45_spill] sm:$0xff]  ;;  %v10040_v59 = vld [vmem:[#allocation47_spill] sm:$0xff] }
 0x618   :  { %7095 = vmatprep.subr.bf16.mxu0 %v10031_v12  ;;  %7122 = vmatprep.subr.bf16.mxu1 %v9815_v30  ;;  %v10039_v12 = vld [vmem:[#allocation50_spill] sm:$0xff] }
 0x61b   :  { %7097 = vmatpush1.bf16.msra.mxu0 %v10032_v45  ;;  %7124 = vmatpush3.bf16.msra.mxu1 %v10033_v61  ;;  %v10041_v61 = vld [vmem:[#allocation48_spill] sm:$0xff] }
 0x61c   :  { %7099 = vmatprep.subr.bf16.mxu0 %v10034_v51  ;;  %7125 = vmatprep.subr.bf16.mxu1 %v9815_v30  ;;  %v10042_v51 = vld [vmem:[#allocation51_spill] sm:$0xff]  ;;  %v10043_v45 = vld [vmem:[#allocation52_spill] sm:$0xff] }
 0x61f   :  { %7101 = vmatpush1.bf16.msra.mxu0 %v10035_v41  ;;  %7127 = vmatpush3.bf16.msra.mxu1 %v10036_v53  ;;  %v10054_v53 = vld [vmem:[#allocation63_spill] sm:$0xff]  ;;  %v10055_v41 = vld [vmem:[#allocation64_spill] sm:$0xff] }
 0x620   :  { %7103 = vmatprep.subr.bf16.mxu0 %v10037_v28  ;;  %7128 = vmatprep.subr.bf16.mxu1 %v9815_v30  ;;  %v10044_v28 = vld [vmem:[#allocation53_spill] sm:$0xff] }
 0x623   :  { %7105 = vmatpush1.bf16.msra.mxu0 %v10038_v18  ;;  %7130 = vmatpush3.bf16.msra.mxu1 %v10039_v12  ;;  %v10045_v18 = vld [vmem:[#allocation54_spill] sm:$0xff]  ;;  %v10046_v12 = vld [vmem:[#allocation55_spill] sm:$0xff] }
 0x624   :  { %7107 = vmatprep.subr.bf16.mxu0 %v10040_v59  ;;  %7131 = vmatprep.subr.bf16.mxu1 %v9815_v30  ;;  %v10053_v59 = vld [vmem:[#allocation62_spill] sm:$0xff] }
 0x627   :  { %7109 = vmatpush1.bf16.msra.mxu0 %v10041_v61  ;;  %7133 = vmatpush3.bf16.msra.mxu1 %v10042_v51  ;;  %v10048_v51 = vld [vmem:[#allocation57_spill] sm:$0xff]  ;;  %v10049_v61 = vld [vmem:[#allocation58_spill] sm:$0xff] }
 0x628   :  { %7135 = vmatprep.subr.bf16.mxu0 %v10043_v45  ;;  %7166 = vmatprep.subr.bf16.mxu1 %v9815_v30  ;;  %v10047_v45 = vld [vmem:[#allocation56_spill] sm:$0xff] }
 0x62a   :  { %3004 = vmatmul.mubr.f32.vlgmr.msra.gmra.mrb[16].mxu0 %v9036_v22  ;;  %5774 = vmatmul.mubr.f32.vlgmr.msra.gmra.mrb[34].mxu1 %v9036_v22 }
 0x62b   :  { %7137 = vmatpush1.bf16.msra.mxu0 %v10044_v28  ;;  %7168 = vmatpush3.bf16.msra.mxu1 %v10045_v18  ;;  %v10050_v28 = vld [vmem:[#allocation59_spill] sm:$0xff]  ;;  %v10051_v18 = vld [vmem:[#allocation60_spill] sm:$0xff] }
 0x62c   :  { %7139 = vmatprep.subr.bf16.mxu0 %v10046_v12  ;;  %7169 = vmatprep.subr.bf16.mxu1 %v9815_v30  ;;  %v10052_v12 = vld [vmem:[#allocation61_spill] sm:$0xff] }
 0x62d   :  { %3165 = vmatprep.mubr.f32.mxu0 %v9830_v40  ;;  %5808 = vmatprep.mubr.msk.f32.mxu1 %vm8082_vm0, %v9830_v40 }
 0x62f   :  { %7141 = vmatpush1.bf16.msra.mxu0 %v10047_v45  ;;  %7171 = vmatpush3.bf16.msra.mxu1 %v10048_v51  ;;  %v10056_v51 = vld [vmem:[#allocation65_spill] sm:$0xff]  ;;  %v10058_v45 = vld [vmem:[#allocation67_spill] sm:$0xff] }
 0x630   :  { %7143 = vmatprep.subr.bf16.mxu0 %v10049_v61  ;;  %7172 = vmatprep.subr.bf16.mxu1 %v9815_v30  ;;  %v10057_v61 = vld [vmem:[#allocation66_spill] sm:$0xff] }
 0x633   :  { %7145 = vmatpush1.bf16.msra.mxu0 %v10050_v28  ;;  %7174 = vmatpush3.bf16.msra.mxu1 %v10051_v18  ;;  %v10059_v18 = vld [vmem:[#allocation68_spill] sm:$0xff]  ;;  %v10061_v28 = vld [vmem:[#allocation70_spill] sm:$0xff] }
 0x634   :  { %7147 = vmatprep.subr.bf16.mxu0 %v10052_v12  ;;  %7175 = vmatprep.subr.bf16.mxu1 %v9815_v30  ;;  %v10060_v12 = vld [vmem:[#allocation69_spill] sm:$0xff] }
 0x637   :  { %7149 = vmatpush1.bf16.msra.mxu0 %v10053_v59  ;;  %7177 = vmatpush3.bf16.msra.mxu1 %v10054_v53  ;;  %v10062_v53 = vld [vmem:[#allocation71_spill] sm:$0xff]  ;;  %v10064_v59 = vld [vmem:[#allocation73_spill] sm:$0xff] }
 0x638   :  { %7151 = vmatprep.subr.bf16.mxu0 %v10055_v41  ;;  %7178 = vmatprep.subr.bf16.mxu1 %v9815_v30  ;;  %v10063_v41 = vld [vmem:[#allocation72_spill] sm:$0xff] }
 0x63b   :  { %7153 = vmatpush1.bf16.msra.mxu0 %v10056_v51  ;;  %7180 = vmatpush3.bf16.msra.mxu1 %v10057_v61  ;;  %v10065_v61 = vld [vmem:[#allocation74_spill] sm:$0xff]  ;;  %v10067_v51 = vld [vmem:[#allocation76_spill] sm:$0xff] }
 0x63c   :  { %7155 = vmatprep.subr.bf16.mxu0 %v10058_v45  ;;  %7181 = vmatprep.subr.bf16.mxu1 %v9815_v30  ;;  %v10066_v45 = vld [vmem:[#allocation75_spill] sm:$0xff] }
 0x63f   :  { %7157 = vmatpush1.bf16.msra.mxu0 %v10059_v18  ;;  %7183 = vmatpush3.bf16.msra.mxu1 %v10060_v12 }
 0x640   :  { %7159 = vmatprep.subr.bf16.mxu0 %v10061_v28  ;;  %7184 = vmatprep.subr.bf16.mxu1 %v9815_v30 }
 0x643   :  { %7161 = vmatpush1.bf16.msra.mxu0 %v10062_v53  ;;  %7186 = vmatpush3.bf16.msra.mxu1 %v10063_v41 }
 0x644   :  { %7163 = vmatprep.subr.bf16.mxu0 %v10064_v59  ;;  %7187 = vmatprep.subr.bf16.mxu1 %v9815_v30  ;;  %v10068_v59 = vld [vmem:[#allocation78_spill] sm:$0xff] }
 0x647   :  { %7165 = vmatpush1.bf16.msra.mxu0 %v10065_v61  ;;  %7189 = vmatpush3.bf16.msra.mxu1 %v10066_v45 }
 0x648   :  { %7191 = vmatprep.subr.bf16.mxu0 %v10067_v51  ;;  %7222 = vmatprep.subr.bf16.mxu1 %v9815_v30 }
 0x69d   :  { %v2629_v12 = vpop.f32.mrb[28].mxu1 }
 0x69e   :  { %v5670_v28 = vpop.f32.mrb[29].mxu1  ;;  %v2630_v7 = vadd.f32 %v2629_v12, %v8705_v1 }
 0x6bd   :  { %v2699_v18 = vpop.f32.mrb[14].mxu0  ;;  %v2770_v26 = vpop.f32.mrb[30].mxu1 }
 0x6be   :  { %v7723_v53 = vadd.f32 %v9939_v62, %v2699_v18  ;;  %v2701_v25 = vpop.f32.mrb[15].mxu0  ;;  %v5705_v41 = vpop.f32.mrb[31].mxu1  ;;  %v2771_v44 = vadd.f32 %v2770_v26, %v10069_v63 }
 0x6bf   :  { %v7725_v11 = vadd.f32 %v10068_v59, %v2701_v25 }
 0x6c0   :  { %v4656_v38 = vmul.f32 -1.442695, %v7723_v53 }
 0x6c1   :  { %v4657_v60 = vmul.f32 -1.442695, %v7725_v11 }
 0x6c2   :  { %7861 = vpow2.f32 %v4656_v38 }
 0x6c3   :  { %7863 = vpow2.f32 %v4657_v60 }
 0x6cc   :  { %v7862_v61 = vpop.eup %7861 }
 0x6cd   :  { %v2778_v45 = vadd.f32 1.0, %v7862_v61  ;;  %v7864_v51 = vpop.eup %7863 }
 0x6ce   :  { %v2785_v50 = vadd.f32 1.0, %v7864_v51 }
 0x6cf   :  { %7865 = vrcp.f32 %v2778_v45 }
 0x6d0   :  { %7867 = vrcp.f32 %v2785_v50 }
 0x6d9   :  { %v7866_v28 = vpop.eup %7865 }
 0x6da   :  { %v2788_v34 = vmul.f32 %v7866_v28, %v2771_v44  ;;  %v7868_v25 = vpop.eup %7867 }
 0x6db   :  { %v2791_v38 = vsub.f32 1.0, %v7868_v25  ;;  %v2793_v61 = vmul.f32 %v7868_v25, %v9029_v3  ;;  %v10087_v3 = vld [vmem:[#allocation37_spill] sm:$0xff] }
 0x6dc   :  { %v2789_v18 = vadd.f32 %v2788_v34, %v2630_v7 }
 0x6dd   :  { %v2935_v41 = vpop.f32.mrb[32].mxu1 }
 0x6de   :  { %7869 = vtanh.f32 %v2789_v18  ;;  %v5740_v53 = vpop.f32.mrb[33].mxu1 }
 0x6e8   :  { %v7870_v11 = vpop.eup %7869 }
 0x6e9   :  { %v2792_v60 = vmul.f32 %v7870_v11, %v2791_v38  ;;  %v2936_v11 = vadd.f32 %v2935_v41, %v9880_v39  ;;  %v10072_v41 = vld [vmem:[#allocation22_spill] sm:$0xff] }
 0x6eb   :  { %v9189_v45 = vadd.f32 %v2793_v61, %v2792_v60 }
 0x6fd   :  { %v3005_v51 = vpop.f32.mrb[16].mxu0  ;;  %v3076_v59 = vpop.f32.mrb[34].mxu1 }
 0x6fe   :  { %v7727_v26 = vadd.f32 %v9878_v6, %v3005_v51  ;;  %v3007_v63 = vpop.f32.mrb[17].mxu0  ;;  %v5775_v12 = vpop.f32.mrb[35].mxu1  ;;  %v3077_v25 = vadd.f32 %v3076_v59, %v8484_v0  ;;  %v10071_v59 = vld [vmem:[#allocation17_spill] sm:$0xff] }
 0x6ff   :  { %v7729_v34 = vadd.f32 %v9879_v2, %v3007_v63 }
 0x700   :  { %v4658_v44 = vmul.f32 -1.442695, %v7727_v26 }
 0x701   :  { %v4659_v7 = vmul.f32 -1.442695, %v7729_v34 }
 0x702   :  { %7871 = vpow2.f32 %v4658_v44 }
 0x703   :  { %7873 = vpow2.f32 %v4659_v7  ;;  %v10073_v7 = vld [vmem:[#allocation18_spill] sm:$0xff] }
 0x70c   :  { %v7872_v50 = vpop.eup %7871 }
 0x70d   :  { %v3084_v28 = vadd.f32 1.0, %v7872_v50  ;;  %v7874_v18 = vpop.eup %7873  ;;  %v10074_v50 = vld [vmem:[#allocation19_spill] sm:$0xff] }
 0x70e   :  { %v3091_v53 = vadd.f32 1.0, %v7874_v18  ;;  %v10076_v18 = vld [vmem:[#allocation20_spill] sm:$0xff] }
 0x70f   :  { %7875 = vrcp.f32 %v3084_v28  ;;  %v10075_v28 = vld [vmem:[#allocation25_spill] sm:$0xff] }
 0x710   :  { %7877 = vrcp.f32 %v3091_v53  ;;  %v10077_v53 = vld [vmem:[#allocation21_spill] sm:$0xff] }
 0x719   :  { %v7876_v38 = vpop.eup %7875 }
 0x71a   :  { %v3094_v60 = vmul.f32 %v7876_v38, %v3077_v25  ;;  %v7878_v51 = vpop.eup %7877  ;;  %v10078_v25 = vld [vmem:[#allocation28_spill] sm:$0xff]  ;;  %v10079_v38 = vld [vmem:[#allocation23_spill] sm:$0xff] }
 0x71b   :  { %v3097_v26 = vsub.f32 1.0, %v7878_v51  ;;  %v3099_v44 = vmul.f32 %v7878_v51, %v9036_v22  ;;  %v10070_v22 = vld [vmem:[#allocation16_spill] sm:$0xff]  ;;  %v10082_v51 = vld [vmem:[#allocation26_spill] sm:$0xff] }
 0x71c   :  { %v3095_v61 = vadd.f32 %v3094_v60, %v2936_v11  ;;  %v10080_v11 = vld [vmem:[#allocation24_spill] sm:$0xff]  ;;  %v10081_v60 = vld [vmem:[#allocation31_spill] sm:$0xff] }
 0x71e   :  { %7879 = vtanh.f32 %v3095_v61  ;;  %v3406_v61 = vld [vmem:[#allocation2 + $0x28] sm:$0xff] }
 0x728   :  { %v7880_v63 = vpop.eup %7879 }
 0x729   :  { %v3098_v12 = vmul.f32 %v7880_v63, %v3097_v26  ;;  %v10083_v26 = vld [vmem:[#allocation27_spill] sm:$0xff]  ;;  %v10084_v63 = vld [vmem:[#allocation34_spill] sm:$0xff] }
 0x72b   :  { %v9196_v34 = vadd.f32 %v3099_v44, %v3098_v12  ;;  %v10085_v12 = vld [vmem:[#allocation29_spill] sm:$0xff]  ;;  %v10086_v44 = vld [vmem:[#allocation30_spill] sm:$0xff] }
 0x72d   :  { %3166 = vmatmul.mubr.f32.vlgmr.msra.gmra.mrb[18].mxu0 %v9196_v34  ;;  %5809 = vmatmul.mubr.f32.vlgmr.msra.gmra.mrb[36].mxu1 %v9196_v34 }
 0x72e   :  { %7193 = vmatpush1.bf16.msra.mxu0 %v8491_v17  ;;  %7224 = vmatpush3.bf16.msra.mxu1 %v9881_v37 }
 0x72f   :  { %7195 = vmatprep.subr.bf16.mxu0 %v9882_v48  ;;  %7225 = vmatprep.subr.bf16.mxu1 %v9815_v30 }
 0x730   :  { %3306 = vmatprep.mubr.f32.mxu0 %v9830_v40  ;;  %5843 = vmatprep.mubr.msk.f32.mxu1 %vm8082_vm0, %v9830_v40 }
 0x732   :  { %7197 = vmatpush1.bf16.msra.mxu0 %v9883_v19  ;;  %7227 = vmatpush3.bf16.msra.mxu1 %v9884_v4 }
 0x733   :  { %7199 = vmatprep.subr.bf16.mxu0 %v9885_v54  ;;  %7228 = vmatprep.subr.bf16.mxu1 %v9815_v30 }
 0x736   :  { %7201 = vmatpush1.bf16.msra.mxu0 %v9886_v20  ;;  %7230 = vmatpush3.bf16.msra.mxu1 %v9887_v42 }
 0x737   :  { %7203 = vmatprep.subr.bf16.mxu0 %v9888_v24  ;;  %7231 = vmatprep.subr.bf16.mxu1 %v9815_v30 }
 0x73a   :  { %7205 = vmatpush1.bf16.msra.mxu0 %v9889_v49  ;;  %7233 = vmatpush3.bf16.msra.mxu1 %v9890_v31 }
 0x73b   :  { %7207 = vmatprep.subr.bf16.mxu0 %v9891_v8  ;;  %7234 = vmatprep.subr.bf16.mxu1 %v9815_v30 }
 0x73e   :  { %7209 = vmatpush1.bf16.msra.mxu0 %v8536_v27  ;;  %7236 = vmatpush3.bf16.msra.mxu1 %v8538_v14 }
 0x73f   :  { %7211 = vmatprep.subr.bf16.mxu0 %v9892_v58  ;;  %7237 = vmatprep.subr.bf16.mxu1 %v9815_v30 }
 0x742   :  { %7213 = vmatpush1.bf16.msra.mxu0 %v9893_v36  ;;  %7239 = vmatpush3.bf16.msra.mxu1 %v8548_v47 }
 0x743   :  { %7215 = vmatprep.subr.bf16.mxu0 %v8552_v56  ;;  %7240 = vmatprep.subr.bf16.mxu1 %v9815_v30 }
 0x746   :  { %7217 = vmatpush1.bf16.msra.mxu0 %v8556_v57  ;;  %7242 = vmatpush3.bf16.msra.mxu1 %v8558_v13 }
 0x747   :  { %7219 = vmatprep.subr.bf16.mxu0 %v8562_v55  ;;  %7243 = vmatprep.subr.bf16.mxu1 %v9815_v30 }
 0x74a   :  { %7221 = vmatpush1.bf16.msra.mxu0 %v8566_v46  ;;  %7245 = vmatpush3.bf16.msra.mxu1 %v8568_v35 }
 0x74b   :  { %7247 = vmatprep.subr.bf16.mxu0 %v8210_v5  ;;  %7278 = vmatprep.subr.bf16.mxu1 %v9815_v30 }
 0x74d   :  { %3307 = vmatmul.mubr.f32.vlgmr.msra.gmra.mrb[18].mxu0 %v9189_v45  ;;  %5844 = vmatmul.mubr.f32.vlgmr.msra.gmra.mrb[38].mxu1 %v9189_v45 }
 0x74e   :  { %7249 = vmatpush1.bf16.msra.mxu0 %v8212_v9  ;;  %7280 = vmatpush3.bf16.msra.mxu1 %v8229_v29 }
 0x74f   :  { %7251 = vmatprep.subr.bf16.mxu0 %v8214_v10  ;;  %7281 = vmatprep.subr.bf16.mxu1 %v9815_v30 }
 0x750   :  { %3471 = vmatprep.mubr.f32.mxu0 %v9830_v40  ;;  %5878 = vmatprep.mubr.msk.f32.mxu1 %vm8082_vm0, %v9830_v40 }
 0x752   :  { %7253 = vmatpush1.bf16.msra.mxu0 %v8218_v15  ;;  %7283 = vmatpush3.bf16.msra.mxu1 %v8235_v33 }
 0x753   :  { %7255 = vmatprep.subr.bf16.mxu0 %v8221_v16  ;;  %7284 = vmatprep.subr.bf16.mxu1 %v9815_v30 }
 0x756   :  { %7257 = vmatpush1.bf16.msra.mxu0 %v8224_v21  ;;  %7286 = vmatpush3.bf16.msra.mxu1 %v8245_v43 }
 0x757   :  { %7259 = vmatprep.subr.bf16.mxu0 %v8227_v23  ;;  %7287 = vmatprep.subr.bf16.mxu1 %v9815_v30 }
 0x75a   :  { %7261 = vmatpush1.bf16.msra.mxu0 %v8232_v32  ;;  %7289 = vmatpush3.bf16.msra.mxu1 %v8255_v52 }
 0x75b   :  { %7263 = vmatprep.subr.bf16.mxu0 %v10070_v22  ;;  %7290 = vmatprep.subr.bf16.mxu1 %v9815_v30 }
 0x75e   :  { %7265 = vmatpush1.bf16.msra.mxu0 %v10071_v59  ;;  %7292 = vmatpush3.bf16.msra.mxu1 %v10072_v41 }
 0x75f   :  { %7267 = vmatprep.subr.bf16.mxu0 %v10073_v7  ;;  %7293 = vmatprep.subr.bf16.mxu1 %v9815_v30  ;;  %v10132_v7 = vld [vmem:[#allocation81_spill] sm:$0xff] }
 0x762   :  { %7269 = vmatpush1.bf16.msra.mxu0 %v10074_v50  ;;  %7295 = vmatpush3.bf16.msra.mxu1 %v10075_v28 }
 0x763   :  { %7271 = vmatprep.subr.bf16.mxu0 %v10076_v18  ;;  %7296 = vmatprep.subr.bf16.mxu1 %v9815_v30 }
 0x766   :  { %7273 = vmatpush1.bf16.msra.mxu0 %v10077_v53  ;;  %7298 = vmatpush3.bf16.msra.mxu1 %v10078_v25 }
 0x767   :  { %7275 = vmatprep.subr.bf16.mxu0 %v10079_v38  ;;  %7299 = vmatprep.subr.bf16.mxu1 %v9815_v30 }
 0x76a   :  { %7277 = vmatpush1.bf16.msra.mxu0 %v10080_v11  ;;  %7301 = vmatpush3.bf16.msra.mxu1 %v10081_v60  ;;  %v10093_v60 = vld [vmem:[#allocation43_spill] sm:$0xff]  ;;  %v10094_v11 = vld [vmem:[#allocation38_spill] sm:$0xff] }
 0x76b   :  { %7303 = vmatprep.subr.bf16.mxu0 %v10082_v51  ;;  %7334 = vmatprep.subr.bf16.mxu1 %v9815_v30  ;;  %v10088_v51 = vld [vmem:[#allocation32_spill] sm:$0xff] }
 0x76d   :  { %3472 = vmatmul.mubr.f32.vlgmr.msra.gmra.mrb[20].mxu0 %v3406_v61  ;;  %5879 = vmatmul.mubr.f32.vlgmr.msra.gmra.mrb[40].mxu1 %v3406_v61  ;;  %v10089_v61 = vld [vmem:[#allocation33_spill] sm:$0xff] }
 0x76e   :  { %7305 = vmatpush1.bf16.msra.mxu0 %v10083_v26  ;;  %7336 = vmatpush3.bf16.msra.mxu1 %v10084_v63  ;;  %v10090_v63 = vld [vmem:[#allocation40_spill] sm:$0xff] }
 0x76f   :  { %7307 = vmatprep.subr.bf16.mxu0 %v10085_v12  ;;  %7337 = vmatprep.subr.bf16.mxu1 %v9815_v30  ;;  %v10091_v12 = vld [vmem:[#allocation35_spill] sm:$0xff]  ;;  %v10092_v26 = vld [vmem:[#allocation36_spill] sm:$0xff] }
 0x770   :  { %3612 = vmatprep.mubr.f32.mxu0 %v9830_v40  ;;  %5913 = vmatprep.mubr.msk.f32.mxu1 %vm8082_vm0, %v9830_v40 }
 0x772   :  { %7309 = vmatpush1.bf16.msra.mxu0 %v10086_v44  ;;  %7339 = vmatpush3.bf16.msra.mxu1 %v10087_v3  ;;  %v10095_v3 = vld [vmem:[#allocation39_spill] sm:$0xff]  ;;  %v10097_v44 = vld [vmem:[#allocation41_spill] sm:$0xff] }
 0x773   :  { %7311 = vmatprep.subr.bf16.mxu0 %v10088_v51  ;;  %7340 = vmatprep.subr.bf16.mxu1 %v9815_v30  ;;  %v10096_v51 = vld [vmem:[#allocation46_spill] sm:$0xff] }
 0x776   :  { %7313 = vmatpush1.bf16.msra.mxu0 %v10089_v61  ;;  %7342 = vmatpush3.bf16.msra.mxu1 %v10090_v63  ;;  %v10098_v63 = vld [vmem:[#allocation42_spill] sm:$0xff]  ;;  %v10100_v61 = vld [vmem:[#allocation44_spill] sm:$0xff] }
 0x777   :  { %7315 = vmatprep.subr.bf16.mxu0 %v10091_v12  ;;  %7343 = vmatprep.subr.bf16.mxu1 %v9815_v30  ;;  %v10099_v12 = vld [vmem:[#allocation49_spill] sm:$0xff] }
 0x77a   :  { %7317 = vmatpush1.bf16.msra.mxu0 %v10092_v26  ;;  %7345 = vmatpush3.bf16.msra.mxu1 %v10093_v60  ;;  %v10101_v60 = vld [vmem:[#allocation45_spill] sm:$0xff]  ;;  %v10103_v26 = vld [vmem:[#allocation47_spill] sm:$0xff] }
 0x77b   :  { %7319 = vmatprep.subr.bf16.mxu0 %v10094_v11  ;;  %7346 = vmatprep.subr.bf16.mxu1 %v9815_v30  ;;  %v10102_v11 = vld [vmem:[#allocation50_spill] sm:$0xff] }
 0x77e   :  { %7321 = vmatpush1.bf16.msra.mxu0 %v10095_v3  ;;  %7348 = vmatpush3.bf16.msra.mxu1 %v10096_v51  ;;  %v10104_v51 = vld [vmem:[#allocation48_spill] sm:$0xff] }
 0x77f   :  { %7323 = vmatprep.subr.bf16.mxu0 %v10097_v44  ;;  %7349 = vmatprep.subr.bf16.mxu1 %v9815_v30  ;;  %v10105_v44 = vld [vmem:[#allocation51_spill] sm:$0xff]  ;;  %v10106_v3 = vld [vmem:[#allocation52_spill] sm:$0xff] }
 0x782   :  { %7325 = vmatpush1.bf16.msra.mxu0 %v10098_v63  ;;  %7351 = vmatpush3.bf16.msra.mxu1 %v10099_v12  ;;  %v10117_v12 = vld [vmem:[#allocation63_spill] sm:$0xff]  ;;  %v10118_v63 = vld [vmem:[#allocation64_spill] sm:$0xff] }
 0x783   :  { %7327 = vmatprep.subr.bf16.mxu0 %v10100_v61  ;;  %7352 = vmatprep.subr.bf16.mxu1 %v9815_v30  ;;  %v10107_v61 = vld [vmem:[#allocation53_spill] sm:$0xff] }
 0x786   :  { %7329 = vmatpush1.bf16.msra.mxu0 %v10101_v60  ;;  %7354 = vmatpush3.bf16.msra.mxu1 %v10102_v11  ;;  %v10108_v60 = vld [vmem:[#allocation54_spill] sm:$0xff]  ;;  %v10109_v11 = vld [vmem:[#allocation55_spill] sm:$0xff] }
 0x787   :  { %7331 = vmatprep.subr.bf16.mxu0 %v10103_v26  ;;  %7355 = vmatprep.subr.bf16.mxu1 %v9815_v30  ;;  %v10116_v26 = vld [vmem:[#allocation62_spill] sm:$0xff] }
 0x78a   :  { %7333 = vmatpush1.bf16.msra.mxu0 %v10104_v51  ;;  %7357 = vmatpush3.bf16.msra.mxu1 %v10105_v44  ;;  %v10111_v44 = vld [vmem:[#allocation57_spill] sm:$0xff]  ;;  %v10112_v51 = vld [vmem:[#allocation58_spill] sm:$0xff] }
 0x78b   :  { %7359 = vmatprep.subr.bf16.mxu0 %v10106_v3  ;;  %7390 = vmatprep.subr.bf16.mxu1 %v9815_v30  ;;  %v10110_v3 = vld [vmem:[#allocation56_spill] sm:$0xff] }
 0x78d   :  { %3613 = vmatmul.mubr.f32.vlgmr.msra.gmra.mrb[20].mxu0 %v9196_v34  ;;  %5914 = vmatmul.mubr.f32.vlgmr.msra.gmra.mrb[42].mxu1 %v9196_v34 }
 0x78e   :  { %7361 = vmatpush1.bf16.msra.mxu0 %v10107_v61  ;;  %7392 = vmatpush3.bf16.msra.mxu1 %v10108_v60  ;;  %v10113_v61 = vld [vmem:[#allocation59_spill] sm:$0xff]  ;;  %v10114_v60 = vld [vmem:[#allocation60_spill] sm:$0xff] }
 0x78f   :  { %7363 = vmatprep.subr.bf16.mxu0 %v10109_v11  ;;  %7393 = vmatprep.subr.bf16.mxu1 %v9815_v30  ;;  %v10115_v11 = vld [vmem:[#allocation61_spill] sm:$0xff] }
 0x790   :  { %3774 = vmatprep.mubr.f32.mxu0 %v9830_v40  ;;  %5948 = vmatprep.mubr.msk.f32.mxu1 %vm8082_vm0, %v9830_v40 }
 0x792   :  { %7365 = vmatpush1.bf16.msra.mxu0 %v10110_v3  ;;  %7395 = vmatpush3.bf16.msra.mxu1 %v10111_v44  ;;  %v10119_v44 = vld [vmem:[#allocation65_spill] sm:$0xff]  ;;  %v10121_v3 = vld [vmem:[#allocation67_spill] sm:$0xff] }
 0x793   :  { %7367 = vmatprep.subr.bf16.mxu0 %v10112_v51  ;;  %7396 = vmatprep.subr.bf16.mxu1 %v9815_v30  ;;  %v10120_v51 = vld [vmem:[#allocation66_spill] sm:$0xff] }
 0x796   :  { %7369 = vmatpush1.bf16.msra.mxu0 %v10113_v61  ;;  %7398 = vmatpush3.bf16.msra.mxu1 %v10114_v60  ;;  %v10122_v60 = vld [vmem:[#allocation68_spill] sm:$0xff]  ;;  %v10124_v61 = vld [vmem:[#allocation70_spill] sm:$0xff] }
 0x797   :  { %7371 = vmatprep.subr.bf16.mxu0 %v10115_v11  ;;  %7399 = vmatprep.subr.bf16.mxu1 %v9815_v30  ;;  %v10123_v11 = vld [vmem:[#allocation69_spill] sm:$0xff] }
 0x79a   :  { %7373 = vmatpush1.bf16.msra.mxu0 %v10116_v26  ;;  %7401 = vmatpush3.bf16.msra.mxu1 %v10117_v12  ;;  %v10125_v12 = vld [vmem:[#allocation71_spill] sm:$0xff]  ;;  %v10127_v26 = vld [vmem:[#allocation73_spill] sm:$0xff] }
 0x79b   :  { %7375 = vmatprep.subr.bf16.mxu0 %v10118_v63  ;;  %7402 = vmatprep.subr.bf16.mxu1 %v9815_v30  ;;  %v10126_v63 = vld [vmem:[#allocation72_spill] sm:$0xff] }
 0x79e   :  { %7377 = vmatpush1.bf16.msra.mxu0 %v10119_v44  ;;  %7404 = vmatpush3.bf16.msra.mxu1 %v10120_v51  ;;  %v10128_v51 = vld [vmem:[#allocation74_spill] sm:$0xff]  ;;  %v10130_v44 = vld [vmem:[#allocation76_spill] sm:$0xff] }
 0x79f   :  { %7379 = vmatprep.subr.bf16.mxu0 %v10121_v3  ;;  %7405 = vmatprep.subr.bf16.mxu1 %v9815_v30  ;;  %v10129_v3 = vld [vmem:[#allocation75_spill] sm:$0xff] }
 0x7a2   :  { %7381 = vmatpush1.bf16.msra.mxu0 %v10122_v60  ;;  %7407 = vmatpush3.bf16.msra.mxu1 %v10123_v11 }
 0x7a3   :  { %7383 = vmatprep.subr.bf16.mxu0 %v10124_v61  ;;  %7408 = vmatprep.subr.bf16.mxu1 %v9815_v30 }
 0x7a6   :  { %7385 = vmatpush1.bf16.msra.mxu0 %v10125_v12  ;;  %7410 = vmatpush3.bf16.msra.mxu1 %v10126_v63 }
 0x7a7   :  { %7387 = vmatprep.subr.bf16.mxu0 %v10127_v26  ;;  %7411 = vmatprep.subr.bf16.mxu1 %v9815_v30  ;;  %v10131_v26 = vld [vmem:[#allocation78_spill] sm:$0xff] }
 0x7aa   :  { %7389 = vmatpush1.bf16.msra.mxu0 %v10128_v51  ;;  %7413 = vmatpush3.bf16.msra.mxu1 %v10129_v3 }
 0x7ab   :  { %7415 = vmatprep.subr.bf16.mxu0 %v10130_v44  ;;  %7446 = vmatprep.subr.bf16.mxu1 %v9815_v30 }
 0x800   :  { %v3238_v11 = vpop.f32.mrb[36].mxu1 }
 0x801   :  { %v5810_v61 = vpop.f32.mrb[37].mxu1  ;;  %v3239_v59 = vadd.f32 %v3238_v11, %v8705_v1 }
 0x820   :  { %v3308_v60 = vpop.f32.mrb[18].mxu0  ;;  %v3379_v38 = vpop.f32.mrb[38].mxu1 }
 0x821   :  { %v7731_v12 = vadd.f32 %v9939_v62, %v3308_v60  ;;  %v3310_v25 = vpop.f32.mrb[19].mxu0  ;;  %v5845_v63 = vpop.f32.mrb[39].mxu1  ;;  %v3380_v41 = vadd.f32 %v3379_v38, %v10132_v7 }
 0x822   :  { %v7733_v18 = vadd.f32 %v10131_v26, %v3310_v25 }
 0x823   :  { %v4660_v53 = vmul.f32 -1.442695, %v7731_v12 }
 0x824   :  { %v4661_v28 = vmul.f32 -1.442695, %v7733_v18 }
 0x825   :  { %7881 = vpow2.f32 %v4660_v53 }
 0x826   :  { %7883 = vpow2.f32 %v4661_v28 }
 0x82f   :  { %v7882_v51 = vpop.eup %7881 }
 0x830   :  { %v3387_v3 = vadd.f32 1.0, %v7882_v51  ;;  %v7884_v44 = vpop.eup %7883 }
 0x831   :  { %v3394_v50 = vadd.f32 1.0, %v7884_v44 }
 0x832   :  { %7885 = vrcp.f32 %v3387_v3 }
 0x833   :  { %7887 = vrcp.f32 %v3394_v50 }
 0x83c   :  { %v7886_v61 = vpop.eup %7885 }
 0x83d   :  { %v3397_v22 = vmul.f32 %v7886_v61, %v3380_v41  ;;  %v7888_v25 = vpop.eup %7887 }
 0x83e   :  { %v3400_v53 = vsub.f32 1.0, %v7888_v25  ;;  %v3402_v51 = vmul.f32 %v7888_v25, %v9189_v45 }
 0x83f   :  { %v3398_v60 = vadd.f32 %v3397_v22, %v3239_v59 }
 0x840   :  { %v3544_v63 = vpop.f32.mrb[40].mxu1 }
 0x841   :  { %7889 = vtanh.f32 %v3398_v60  ;;  %v5880_v12 = vpop.f32.mrb[41].mxu1 }
 0x84b   :  { %v7890_v18 = vpop.eup %7889 }
 0x84c   :  { %v3401_v28 = vmul.f32 %v7890_v18, %v3400_v53  ;;  %v3545_v18 = vadd.f32 %v3544_v63, %v9880_v39  ;;  %v10146_v63 = vld [vmem:[#allocation27_spill] sm:$0xff] }
 0x84e   :  { %v9349_v3 = vadd.f32 %v3402_v51, %v3401_v28 }
 0x860   :  { %v3614_v44 = vpop.f32.mrb[20].mxu0  ;;  %v3685_v26 = vpop.f32.mrb[42].mxu1 }
 0x861   :  { %v7735_v38 = vadd.f32 %v9878_v6, %v3614_v44  ;;  %v3616_v7 = vpop.f32.mrb[21].mxu0  ;;  %v5915_v11 = vpop.f32.mrb[43].mxu1  ;;  %v3686_v25 = vadd.f32 %v3685_v26, %v8484_v0  ;;  %v10145_v26 = vld [vmem:[#allocation26_spill] sm:$0xff] }
 0x862   :  { %v7737_v22 = vadd.f32 %v9879_v2, %v3616_v7 }
 0x863   :  { %v4662_v41 = vmul.f32 -1.442695, %v7735_v38 }
 0x864   :  { %v4663_v59 = vmul.f32 -1.442695, %v7737_v22 }
 0x865   :  { %7891 = vpow2.f32 %v4662_v41 }
 0x866   :  { %7893 = vpow2.f32 %v4663_v59  ;;  %v10147_v59 = vld [vmem:[#allocation34_spill] sm:$0xff] }
 0x86f   :  { %v7892_v50 = vpop.eup %7891 }
 0x870   :  { %v3693_v61 = vadd.f32 1.0, %v7892_v50  ;;  %v7894_v60 = vpop.eup %7893  ;;  %v10148_v50 = vld [vmem:[#allocation29_spill] sm:$0xff] }
 0x871   :  { %v3700_v12 = vadd.f32 1.0, %v7894_v60  ;;  %v10150_v60 = vld [vmem:[#allocation37_spill] sm:$0xff] }
 0x872   :  { %7895 = vrcp.f32 %v3693_v61  ;;  %v10149_v61 = vld [vmem:[#allocation30_spill] sm:$0xff] }
 0x873   :  { %7897 = vrcp.f32 %v3700_v12  ;;  %v10151_v12 = vld [vmem:[#allocation32_spill] sm:$0xff] }
 0x87c   :  { %v7896_v53 = vpop.eup %7895 }
 0x87d   :  { %v3703_v28 = vmul.f32 %v7896_v53, %v3686_v25  ;;  %v7898_v44 = vpop.eup %7897  ;;  %v10152_v25 = vld [vmem:[#allocation33_spill] sm:$0xff]  ;;  %v10153_v53 = vld [vmem:[#allocation40_spill] sm:$0xff] }
 0x87e   :  { %v3706_v38 = vsub.f32 1.0, %v7898_v44  ;;  %v3708_v41 = vmul.f32 %v7898_v44, %v9196_v34  ;;  %v4015_v34 = vld [vmem:[#allocation2 + $0x30] sm:$0xff] }
 0x87f   :  { %v3704_v51 = vadd.f32 %v3703_v28, %v3545_v18  ;;  %v10154_v18 = vld [vmem:[#allocation35_spill] sm:$0xff]  ;;  %v10155_v28 = vld [vmem:[#allocation36_spill] sm:$0xff]  ;;  %v10157_v44 = vld [vmem:[#allocation38_spill] sm:$0xff] }
 0x881   :  { %7899 = vtanh.f32 %v3704_v51  ;;  %v10156_v51 = vld [vmem:[#allocation43_spill] sm:$0xff] }
 0x88b   :  { %v7900_v7 = vpop.eup %7899 }
 0x88c   :  { %v3707_v11 = vmul.f32 %v7900_v7, %v3706_v38  ;;  %v10158_v38 = vld [vmem:[#allocation39_spill] sm:$0xff]  ;;  %v10159_v7 = vld [vmem:[#allocation46_spill] sm:$0xff] }
 0x88e   :  { %v9356_v22 = vadd.f32 %v3708_v41, %v3707_v11  ;;  %v10160_v11 = vld [vmem:[#allocation41_spill] sm:$0xff]  ;;  %v10161_v41 = vld [vmem:[#allocation42_spill] sm:$0xff] }
 0x890   :  { %3775 = vmatmul.mubr.f32.vlgmr.msra.gmra.mrb[22].mxu0 %v9356_v22  ;;  %5949 = vmatmul.mubr.f32.vlgmr.msra.gmra.mrb[44].mxu1 %v9356_v22 }
 0x891   :  { %7417 = vmatpush1.bf16.msra.mxu0 %v8491_v17  ;;  %7448 = vmatpush3.bf16.msra.mxu1 %v9881_v37 }
 0x892   :  { %7419 = vmatprep.subr.bf16.mxu0 %v9882_v48  ;;  %7449 = vmatprep.subr.bf16.mxu1 %v9815_v30 }
 0x893   :  { %3915 = vmatprep.mubr.f32.mxu0 %v9830_v40  ;;  %5983 = vmatprep.mubr.msk.f32.mxu1 %vm8082_vm0, %v9830_v40 }
 0x895   :  { %7421 = vmatpush1.bf16.msra.mxu0 %v9883_v19  ;;  %7451 = vmatpush3.bf16.msra.mxu1 %v9884_v4 }
 0x896   :  { %7423 = vmatprep.subr.bf16.mxu0 %v9885_v54  ;;  %7452 = vmatprep.subr.bf16.mxu1 %v9815_v30 }
 0x899   :  { %7425 = vmatpush1.bf16.msra.mxu0 %v9886_v20  ;;  %7454 = vmatpush3.bf16.msra.mxu1 %v9887_v42 }
 0x89a   :  { %7427 = vmatprep.subr.bf16.mxu0 %v9888_v24  ;;  %7455 = vmatprep.subr.bf16.mxu1 %v9815_v30 }
 0x89d   :  { %7429 = vmatpush1.bf16.msra.mxu0 %v9889_v49  ;;  %7457 = vmatpush3.bf16.msra.mxu1 %v9890_v31 }
 0x89e   :  { %7431 = vmatprep.subr.bf16.mxu0 %v9891_v8  ;;  %7458 = vmatprep.subr.bf16.mxu1 %v9815_v30 }
 0x8a1   :  { %7433 = vmatpush1.bf16.msra.mxu0 %v8536_v27  ;;  %7460 = vmatpush3.bf16.msra.mxu1 %v8538_v14 }
 0x8a2   :  { %7435 = vmatprep.subr.bf16.mxu0 %v9892_v58  ;;  %7461 = vmatprep.subr.bf16.mxu1 %v9815_v30 }
 0x8a5   :  { %7437 = vmatpush1.bf16.msra.mxu0 %v9893_v36  ;;  %7463 = vmatpush3.bf16.msra.mxu1 %v8548_v47 }
 0x8a6   :  { %7439 = vmatprep.subr.bf16.mxu0 %v8552_v56  ;;  %7464 = vmatprep.subr.bf16.mxu1 %v9815_v30 }
 0x8a9   :  { %7441 = vmatpush1.bf16.msra.mxu0 %v8556_v57  ;;  %7466 = vmatpush3.bf16.msra.mxu1 %v8558_v13 }
 0x8aa   :  { %7443 = vmatprep.subr.bf16.mxu0 %v8562_v55  ;;  %7467 = vmatprep.subr.bf16.mxu1 %v9815_v30 }
 0x8ad   :  { %7445 = vmatpush1.bf16.msra.mxu0 %v8566_v46  ;;  %7469 = vmatpush3.bf16.msra.mxu1 %v8568_v35 }
 0x8ae   :  { %7471 = vmatprep.subr.bf16.mxu0 %v8210_v5  ;;  %7502 = vmatprep.subr.bf16.mxu1 %v9815_v30  ;;  %v10133_v5 = vld [vmem:[#allocation16_spill] sm:$0xff] }
 0x8b0   :  { %3916 = vmatmul.mubr.f32.vlgmr.msra.gmra.mrb[22].mxu0 %v9349_v3  ;;  %5984 = vmatmul.mubr.f32.vlgmr.msra.gmra.mrb[46].mxu1 %v9349_v3 }
 0x8b1   :  { %7473 = vmatpush1.bf16.msra.mxu0 %v8212_v9  ;;  %7504 = vmatpush3.bf16.msra.mxu1 %v8229_v29  ;;  %v10134_v9 = vld [vmem:[#allocation17_spill] sm:$0xff] }
 0x8b2   :  { %7475 = vmatprep.subr.bf16.mxu0 %v8214_v10  ;;  %7505 = vmatprep.subr.bf16.mxu1 %v9815_v30  ;;  %v10135_v10 = vld [vmem:[#allocation22_spill] sm:$0xff]  ;;  %v10140_v29 = vld [vmem:[#allocation21_spill] sm:$0xff] }
 0x8b3   :  { %4080 = vmatprep.mubr.f32.mxu0 %v9830_v40  ;;  %6018 = vmatprep.mubr.msk.f32.mxu1 %vm8082_vm0, %v9830_v40 }
 0x8b5   :  { %7477 = vmatpush1.bf16.msra.mxu0 %v8218_v15  ;;  %7507 = vmatpush3.bf16.msra.mxu1 %v8235_v33  ;;  %v10136_v15 = vld [vmem:[#allocation18_spill] sm:$0xff]  ;;  %v10142_v33 = vld [vmem:[#allocation23_spill] sm:$0xff] }
 0x8b6   :  { %7479 = vmatprep.subr.bf16.mxu0 %v8221_v16  ;;  %7508 = vmatprep.subr.bf16.mxu1 %v9815_v30  ;;  %v10137_v16 = vld [vmem:[#allocation19_spill] sm:$0xff] }
 0x8b9   :  { %7481 = vmatpush1.bf16.msra.mxu0 %v8224_v21  ;;  %7510 = vmatpush3.bf16.msra.mxu1 %v8245_v43  ;;  %v10138_v21 = vld [vmem:[#allocation25_spill] sm:$0xff]  ;;  %v10143_v43 = vld [vmem:[#allocation24_spill] sm:$0xff] }
 0x8ba   :  { %7483 = vmatprep.subr.bf16.mxu0 %v8227_v23  ;;  %7511 = vmatprep.subr.bf16.mxu1 %v9815_v30  ;;  %v10139_v23 = vld [vmem:[#allocation20_spill] sm:$0xff] }
 0x8bd   :  { %7485 = vmatpush1.bf16.msra.mxu0 %v8232_v32  ;;  %7513 = vmatpush3.bf16.msra.mxu1 %v8255_v52  ;;  %v10141_v32 = vld [vmem:[#allocation28_spill] sm:$0xff]  ;;  %v10144_v52 = vld [vmem:[#allocation31_spill] sm:$0xff] }
 0x8be   :  { %7487 = vmatprep.subr.bf16.mxu0 %v10133_v5  ;;  %7514 = vmatprep.subr.bf16.mxu1 %v9815_v30  ;;  %v10162_v5 = vld [vmem:[#allocation49_spill] sm:$0xff] }
 0x8c1   :  { %7489 = vmatpush1.bf16.msra.mxu0 %v10134_v9  ;;  %7516 = vmatpush3.bf16.msra.mxu1 %v10135_v10  ;;  %v10163_v9 = vld [vmem:[#allocation44_spill] sm:$0xff]  ;;  %v10164_v10 = vld [vmem:[#allocation45_spill] sm:$0xff] }
 0x8c2   :  { %7491 = vmatprep.subr.bf16.mxu0 %v10136_v15  ;;  %7517 = vmatprep.subr.bf16.mxu1 %v9815_v30  ;;  %v10165_v15 = vld [vmem:[#allocation50_spill] sm:$0xff] }
 0x8c5   :  { %7493 = vmatpush1.bf16.msra.mxu0 %v10137_v16  ;;  %7519 = vmatpush3.bf16.msra.mxu1 %v10138_v21  ;;  %v10166_v16 = vld [vmem:[#allocation47_spill] sm:$0xff]  ;;  %v10167_v21 = vld [vmem:[#allocation48_spill] sm:$0xff] }
 0x8c6   :  { %7495 = vmatprep.subr.bf16.mxu0 %v10139_v23  ;;  %7520 = vmatprep.subr.bf16.mxu1 %v9815_v30  ;;  %v10168_v23 = vld [vmem:[#allocation51_spill] sm:$0xff] }
 0x8c9   :  { %7497 = vmatpush1.bf16.msra.mxu0 %v10140_v29  ;;  %7522 = vmatpush3.bf16.msra.mxu1 %v10141_v32  ;;  %v10169_v29 = vld [vmem:[#allocation52_spill] sm:$0xff]  ;;  %v10170_v32 = vld [vmem:[#allocation53_spill] sm:$0xff] }
 0x8ca   :  { %7499 = vmatprep.subr.bf16.mxu0 %v10142_v33  ;;  %7523 = vmatprep.subr.bf16.mxu1 %v9815_v30  ;;  %v10171_v33 = vld [vmem:[#allocation54_spill] sm:$0xff] }
 0x8cd   :  { %7501 = vmatpush1.bf16.msra.mxu0 %v10143_v43  ;;  %7525 = vmatpush3.bf16.msra.mxu1 %v10144_v52  ;;  %v10172_v43 = vld [vmem:[#allocation55_spill] sm:$0xff]  ;;  %v10173_v52 = vld [vmem:[#allocation56_spill] sm:$0xff] }
 0x8ce   :  { %7527 = vmatprep.subr.bf16.mxu0 %v10145_v26  ;;  %7558 = vmatprep.subr.bf16.mxu1 %v9815_v30  ;;  %v10175_v26 = vld [vmem:[#allocation58_spill] sm:$0xff] }
 0x8d0   :  { %4081 = vmatmul.mubr.f32.vlgmr.msra.gmra.mrb[24].mxu0 %v4015_v34  ;;  %6019 = vmatmul.mubr.f32.vlgmr.msra.gmra.mrb[48].mxu1 %v4015_v34  ;;  %v10174_v34 = vld [vmem:[#allocation57_spill] sm:$0xff] }
 0x8d1   :  { %7529 = vmatpush1.bf16.msra.mxu0 %v10146_v63  ;;  %7560 = vmatpush3.bf16.msra.mxu1 %v10147_v59  ;;  %v10176_v63 = vld [vmem:[#allocation59_spill] sm:$0xff]  ;;  %v10177_v59 = vld [vmem:[#allocation60_spill] sm:$0xff] }
 0x8d2   :  { %7531 = vmatprep.subr.bf16.mxu0 %v10148_v50  ;;  %7561 = vmatprep.subr.bf16.mxu1 %v9815_v30  ;;  %v10178_v50 = vld [vmem:[#allocation61_spill] sm:$0xff] }
 0x8d3   :  { %4221 = vmatprep.mubr.f32.mxu0 %v9830_v40  ;;  %6053 = vmatprep.mubr.msk.f32.mxu1 %vm8082_vm0, %v9830_v40 }
 0x8d5   :  { %7533 = vmatpush1.bf16.msra.mxu0 %v10149_v61  ;;  %7563 = vmatpush3.bf16.msra.mxu1 %v10150_v60  ;;  %v10179_v61 = vld [vmem:[#allocation62_spill] sm:$0xff]  ;;  %v10180_v60 = vld [vmem:[#allocation63_spill] sm:$0xff] }
 0x8d6   :  { %7535 = vmatprep.subr.bf16.mxu0 %v10151_v12  ;;  %7564 = vmatprep.subr.bf16.mxu1 %v9815_v30  ;;  %v10181_v12 = vld [vmem:[#allocation64_spill] sm:$0xff] }
 0x8d9   :  { %7537 = vmatpush1.bf16.msra.mxu0 %v10152_v25  ;;  %7566 = vmatpush3.bf16.msra.mxu1 %v10153_v53  ;;  %v10182_v25 = vld [vmem:[#allocation65_spill] sm:$0xff]  ;;  %v10183_v53 = vld [vmem:[#allocation66_spill] sm:$0xff] }
 0x8da   :  { %7539 = vmatprep.subr.bf16.mxu0 %v10154_v18  ;;  %7567 = vmatprep.subr.bf16.mxu1 %v9815_v30  ;;  %v10184_v18 = vld [vmem:[#allocation67_spill] sm:$0xff] }
 0x8dd   :  { %7541 = vmatpush1.bf16.msra.mxu0 %v10155_v28  ;;  %7569 = vmatpush3.bf16.msra.mxu1 %v10156_v51  ;;  %v10185_v28 = vld [vmem:[#allocation68_spill] sm:$0xff]  ;;  %v10186_v51 = vld [vmem:[#allocation69_spill] sm:$0xff] }
 0x8de   :  { %7543 = vmatprep.subr.bf16.mxu0 %v10157_v44  ;;  %7570 = vmatprep.subr.bf16.mxu1 %v9815_v30  ;;  %v10187_v44 = vld [vmem:[#allocation70_spill] sm:$0xff] }
 0x8e1   :  { %7545 = vmatpush1.bf16.msra.mxu0 %v10158_v38  ;;  %7572 = vmatpush3.bf16.msra.mxu1 %v10159_v7  ;;  %v10188_v38 = vld [vmem:[#allocation71_spill] sm:$0xff]  ;;  %v10189_v7 = vld [vmem:[#allocation72_spill] sm:$0xff] }
 0x8e2   :  { %7547 = vmatprep.subr.bf16.mxu0 %v10160_v11  ;;  %7573 = vmatprep.subr.bf16.mxu1 %v9815_v30  ;;  %v10190_v11 = vld [vmem:[#allocation73_spill] sm:$0xff] }
 0x8e5   :  { %7549 = vmatpush1.bf16.msra.mxu0 %v10161_v41  ;;  %7575 = vmatpush3.bf16.msra.mxu1 %v10162_v5  ;;  %v10191_v41 = vld [vmem:[#allocation74_spill] sm:$0xff]  ;;  %v10192_v5 = vld [vmem:[#allocation75_spill] sm:$0xff] }
 0x8e6   :  { %7551 = vmatprep.subr.bf16.mxu0 %v10163_v9  ;;  %7576 = vmatprep.subr.bf16.mxu1 %v9815_v30  ;;  %v10193_v9 = vld [vmem:[#allocation76_spill] sm:$0xff] }
 0x8e9   :  { %7553 = vmatpush1.bf16.msra.mxu0 %v10164_v10  ;;  %7578 = vmatpush3.bf16.msra.mxu1 %v10165_v15 }
 0x8ea   :  { %7555 = vmatprep.subr.bf16.mxu0 %v10166_v16  ;;  %7579 = vmatprep.subr.bf16.mxu1 %v9815_v30 }
 0x8ed   :  { %7557 = vmatpush1.bf16.msra.mxu0 %v10167_v21  ;;  %7581 = vmatpush3.bf16.msra.mxu1 %v10168_v23 }
 0x8ee   :  { %7583 = vmatprep.subr.bf16.mxu0 %v10169_v29  ;;  %7614 = vmatprep.subr.bf16.mxu1 %v9815_v30 }
 0x8f0   :  { %4222 = vmatmul.mubr.f32.vlgmr.msra.gmra.mrb[24].mxu0 %v9356_v22  ;;  %6054 = vmatmul.mubr.f32.vlgmr.msra.gmra.mrb[50].mxu1 %v9356_v22 }
 0x8f1   :  { %7585 = vmatpush1.bf16.msra.mxu0 %v10170_v32  ;;  %7616 = vmatpush3.bf16.msra.mxu1 %v10171_v33 }
 0x8f2   :  { %7587 = vmatprep.subr.bf16.mxu0 %v10172_v43  ;;  %7617 = vmatprep.subr.bf16.mxu1 %v9815_v30  ;;  %v10194_v43 = vld [vmem:[#allocation78_spill] sm:$0xff] }
 0x8f3   :  { %4383 = vmatprep.mubr.f32.mxu0 %v9830_v40  ;;  %6088 = vmatprep.mubr.msk.f32.mxu1 %vm8082_vm0, %v9830_v40 }
 0x8f5   :  { %7589 = vmatpush1.bf16.msra.mxu0 %v10173_v52  ;;  %7619 = vmatpush3.bf16.msra.mxu1 %v10174_v34 }
 0x8f6   :  { %7591 = vmatprep.subr.bf16.mxu0 %v10175_v26  ;;  %7620 = vmatprep.subr.bf16.mxu1 %v9815_v30 }
 0x8f9   :  { %7593 = vmatpush1.bf16.msra.mxu0 %v10176_v63  ;;  %7622 = vmatpush3.bf16.msra.mxu1 %v10177_v59 }
 0x8fa   :  { %7595 = vmatprep.subr.bf16.mxu0 %v10178_v50  ;;  %7623 = vmatprep.subr.bf16.mxu1 %v9815_v30 }
 0x8fd   :  { %7597 = vmatpush1.bf16.msra.mxu0 %v10179_v61  ;;  %7625 = vmatpush3.bf16.msra.mxu1 %v10180_v60  ;;  %v10195_v61 = vld [vmem:[#allocation81_spill] sm:$0xff] }
 0x8fe   :  { %7599 = vmatprep.subr.bf16.mxu0 %v10181_v12  ;;  %7626 = vmatprep.subr.bf16.mxu1 %v9815_v30 }
 0x901   :  { %7601 = vmatpush1.bf16.msra.mxu0 %v10182_v25  ;;  %7628 = vmatpush3.bf16.msra.mxu1 %v10183_v53 }
 0x902   :  { %7603 = vmatprep.subr.bf16.mxu0 %v10184_v18  ;;  %7629 = vmatprep.subr.bf16.mxu1 %v9815_v30 }
 0x905   :  { %7605 = vmatpush1.bf16.msra.mxu0 %v10185_v28  ;;  %7631 = vmatpush3.bf16.msra.mxu1 %v10186_v51 }
 0x906   :  { %7607 = vmatprep.subr.bf16.mxu0 %v10187_v44  ;;  %7632 = vmatprep.subr.bf16.mxu1 %v9815_v30 }
 0x909   :  { %7609 = vmatpush1.bf16.msra.mxu0 %v10188_v38  ;;  %7634 = vmatpush3.bf16.msra.mxu1 %v10189_v7 }
 0x90a   :  { %7611 = vmatprep.subr.bf16.mxu0 %v10190_v11  ;;  %7635 = vmatprep.subr.bf16.mxu1 %v9815_v30 }
 0x90d   :  { %7613 = vmatpush1.bf16.msra.mxu0 %v10191_v41  ;;  %7637 = vmatpush3.bf16.msra.mxu1 %v10192_v5 }
 0x90e   :  { %7639 = vmatprep.subr.bf16.mxu0 %v10193_v9  ;;  %7670 = vmatprep.subr.bf16.mxu1 %v9815_v30 }
 0x963   :  { %v3847_v10 = vpop.f32.mrb[44].mxu1 }
 0x964   :  { %v5950_v15 = vpop.f32.mrb[45].mxu1  ;;  %v3848_v25 = vadd.f32 %v3847_v10, %v8705_v1 }
 0x983   :  { %v3917_v16 = vpop.f32.mrb[22].mxu0  ;;  %v3988_v21 = vpop.f32.mrb[46].mxu1 }
 0x984   :  { %v7739_v23 = vadd.f32 %v9939_v62, %v3917_v16  ;;  %v3919_v29 = vpop.f32.mrb[23].mxu0  ;;  %v5985_v32 = vpop.f32.mrb[47].mxu1  ;;  %v3989_v60 = vadd.f32 %v3988_v21, %v10195_v61 }
 0x985   :  { %v7741_v52 = vadd.f32 %v10194_v43, %v3919_v29 }
 0x986   :  { %v4664_v33 = vmul.f32 -1.442695, %v7739_v23 }
 0x987   :  { %v4665_v34 = vmul.f32 -1.442695, %v7741_v52 }
 0x988   :  { %7901 = vpow2.f32 %v4664_v33 }
 0x989   :  { %7903 = vpow2.f32 %v4665_v34 }
 0x992   :  { %v7902_v26 = vpop.eup %7901 }
 0x993   :  { %v3996_v63 = vadd.f32 1.0, %v7902_v26  ;;  %v7904_v59 = vpop.eup %7903 }
 0x994   :  { %v4003_v50 = vadd.f32 1.0, %v7904_v59 }
 0x995   :  { %7905 = vrcp.f32 %v3996_v63 }
 0x996   :  { %7907 = vrcp.f32 %v4003_v50 }
 0x99f   :  { %v7906_v12 = vpop.eup %7905 }
 0x9a0   :  { %v4006_v53 = vmul.f32 %v7906_v12, %v3989_v60  ;;  %v7908_v44 = vpop.eup %7907 }
 0x9a1   :  { %v4009_v38 = vsub.f32 1.0, %v7908_v44  ;;  %v4011_v41 = vmul.f32 %v7908_v44, %v9349_v3 }
 0x9a2   :  { %v4007_v18 = vadd.f32 %v4006_v53, %v3848_v25 }
 0x9a3   :  { %v4153_v28 = vpop.f32.mrb[48].mxu1 }
 0x9a4   :  { %7909 = vtanh.f32 %v4007_v18  ;;  %v6020_v51 = vpop.f32.mrb[49].mxu1  ;;  %v4154_v50 = vadd.f32 %v4153_v28, %v9880_v39 }
 0x9ae   :  { %v7910_v7 = vpop.eup %7909 }
 0x9af   :  { %v4010_v11 = vmul.f32 %v7910_v7, %v4009_v38 }
 0x9b1   :  { %v9509_v5 = vadd.f32 %v4011_v41, %v4010_v11 }
 0x9c3   :  { %v4223_v9 = vpop.f32.mrb[24].mxu0  ;;  %v4294_v15 = vpop.f32.mrb[50].mxu1 }
 0x9c4   :  { %v7743_v16 = vadd.f32 %v9878_v6, %v4223_v9  ;;  %v4225_v21 = vpop.f32.mrb[25].mxu0  ;;  %v6055_v10 = vpop.f32.mrb[51].mxu1  ;;  %v4295_v63 = vadd.f32 %v4294_v15, %v8484_v0 }
 0x9c5   :  { %v7745_v29 = vadd.f32 %v9879_v2, %v4225_v21 }
 0x9c6   :  { %v4666_v23 = vmul.f32 -1.442695, %v7743_v16 }
 0x9c7   :  { %v4667_v32 = vmul.f32 -1.442695, %v7745_v29 }
 0x9c8   :  { %7911 = vpow2.f32 %v4666_v23 }
 0x9c9   :  { %7913 = vpow2.f32 %v4667_v32 }
 0x9d2   :  { %v7912_v33 = vpop.eup %7911 }
 0x9d3   :  { %v4302_v52 = vadd.f32 1.0, %v7912_v33  ;;  %v7914_v34 = vpop.eup %7913 }
 0x9d4   :  { %v4309_v26 = vadd.f32 1.0, %v7914_v34 }
 0x9d5   :  { %7915 = vrcp.f32 %v4302_v52 }
 0x9d6   :  { %7917 = vrcp.f32 %v4309_v26 }
 0x9df   :  { %v7916_v59 = vpop.eup %7915 }
 0x9e0   :  { %v4312_v60 = vmul.f32 %v7916_v59, %v4295_v63  ;;  %v7918_v12 = vpop.eup %7917 }
 0x9e1   :  { %v4315_v25 = vsub.f32 1.0, %v7918_v12  ;;  %v4317_v18 = vmul.f32 %v7918_v12, %v9356_v22 }
 0x9e2   :  { %v4313_v6 = vadd.f32 %v4312_v60, %v4154_v50 }
 0x9e4   :  { %7919 = vtanh.f32 %v4313_v6 }
 0x9ee   :  { %v7920_v2 = vpop.eup %7919 }
 0x9ef   :  { %v4316_v53 = vmul.f32 %v7920_v2, %v4315_v25 }
 0x9f1   :  { %v4318_v51 = vadd.f32 %v4317_v18, %v4316_v53 }
 0x9f3   :  { %4384 = vmatmul.mubr.f32.vlgmr.msra.gmra.mrb[26].mxu0 %v4318_v51  ;;  %6089 = vmatmul.mubr.f32.vlgmr.msra.gmra.mrb[52].mxu1 %v4318_v51 }
 0x9f4   :  { %7641 = vmatpush1.bf16.msra.mxu0 %v8491_v17  ;;  %7672 = vmatpush3.bf16.msra.mxu1 %v9881_v37 }
 0x9f5   :  { %7643 = vmatprep.subr.bf16.mxu0 %v9882_v48  ;;  %7673 = vmatprep.subr.bf16.mxu1 %v9815_v30 }
 0x9f6   :  { %4524 = vmatprep.mubr.f32.mxu0 %v9830_v40  ;;  %6123 = vmatprep.mubr.msk.f32.mxu1 %vm8082_vm0, %v9830_v40 }
 0x9f8   :  { %7645 = vmatpush1.bf16.msra.mxu0 %v9883_v19  ;;  %7675 = vmatpush3.bf16.msra.mxu1 %v9884_v4 }
 0x9f9   :  { %7647 = vmatprep.subr.bf16.mxu0 %v9885_v54  ;;  %7676 = vmatprep.subr.bf16.mxu1 %v9815_v30  ;;  %v10196_v54 = vld [vmem:[#allocation96_spill] sm:$0xff] }
 0x9fc   :  { %7649 = vmatpush1.bf16.msra.mxu0 %v9886_v20  ;;  %7678 = vmatpush3.bf16.msra.mxu1 %v9887_v42  ;;  %v10197_v20 = vld [vmem:[#allocation79_spill] sm:$0xff] }
 0x9fd   :  { %7651 = vmatprep.subr.bf16.mxu0 %v9888_v24  ;;  %7679 = vmatprep.subr.bf16.mxu1 %v9815_v30  ;;  %v1577_v42 = vadd.f32 %v10197_v20, %v10196_v54 }
 0xa00   :  { %7653 = vmatpush1.bf16.msra.mxu0 %v9889_v49  ;;  %7681 = vmatpush3.bf16.msra.mxu1 %v9890_v31  ;;  %v10198_v49 = vld [vmem:[#allocation80_spill] sm:$0xff] }
 0xa01   :  { %7655 = vmatprep.subr.bf16.mxu0 %v9891_v8  ;;  %7682 = vmatprep.subr.bf16.mxu1 %v9815_v30  ;;  %v2186_v31 = vadd.f32 %v10198_v49, %v1577_v42 }
 0xa03   :  { %v2795_v8 = vadd.f32 %v9189_v45, %v2186_v31 }
 0xa04   :  { %7657 = vmatpush1.bf16.msra.mxu0 %v8536_v27  ;;  %7684 = vmatpush3.bf16.msra.mxu1 %v8538_v14 }
 0xa05   :  { %7659 = vmatprep.subr.bf16.mxu0 %v9892_v58  ;;  %7685 = vmatprep.subr.bf16.mxu1 %v9815_v30  ;;  %v3404_v22 = vadd.f32 %v9349_v3, %v2795_v8 }
 0xa08   :  { %7661 = vmatpush1.bf16.msra.mxu0 %v9893_v36  ;;  %7687 = vmatpush3.bf16.msra.mxu1 %v8548_v47 }
 0xa09   :  { %7663 = vmatprep.subr.bf16.mxu0 %v8552_v56  ;;  %7688 = vmatprep.subr.bf16.mxu1 %v9815_v30 }
 0xa0c   :  { %7665 = vmatpush1.bf16.msra.mxu0 %v8556_v57  ;;  %7690 = vmatpush3.bf16.msra.mxu1 %v8558_v13 }
 0xa0d   :  { %7667 = vmatprep.subr.bf16.mxu0 %v8562_v55  ;;  %7691 = vmatprep.subr.bf16.mxu1 %v9815_v30 }
 0xa10   :  { %7669 = vmatpush1.bf16.msra.mxu0 %v8566_v46  ;;  %7693 = vmatpush3.bf16.msra.mxu1 %v8568_v35 }
 0xa13   :  { %4525 = vmatmul.mubr.f32.vlgmr.msra.gmra.mrb[26].mxu0 %v9509_v5  ;;  %6124 = vmatmul.mubr.f32.vlgmr.msra.gmra.mrb[54].mxu1 %v9509_v5 }
 0xac6   :  { %v4456_v17 = vpop.f32.mrb[52].mxu1 }
 0xac7   :  { %v6090_v0 = vpop.f32.mrb[53].mxu1  ;;  %v4457_v19 = vadd.f32 %v4456_v17, %v8705_v1  ;;  %v4013_v1 = vadd.f32 %v9509_v5, %v3404_v22 }
 0xae6   :  { %v4526_v40 = vpop.f32.mrb[26].mxu0  ;;  %v4597_v27 = vpop.f32.mrb[54].mxu1 }
 0xae7   :  { %v7747_v14 = vadd.f32 %v9939_v62, %v4526_v40  ;;  %v4528_v47 = vpop.f32.mrb[27].mxu0  ;;  %v6125_v56 = vpop.f32.mrb[55].mxu1  ;;  %v4598_v37 = vadd.f32 %v4597_v27, %v10195_v61 }
 0xae8   :  { %v7749_v13 = vadd.f32 %v10194_v43, %v4528_v47 }
 0xae9   :  { %v4668_v57 = vmul.f32 -1.442695, %v7747_v14 }
 0xaea   :  { %v4669_v30 = vmul.f32 -1.442695, %v7749_v13 }
 0xaeb   :  { %7921 = vpow2.f32 %v4668_v57 }
 0xaec   :  { %7923 = vpow2.f32 %v4669_v30 }
 0xaf5   :  { %v7922_v46 = vpop.eup %7921 }
 0xaf6   :  { %v4605_v55 = vadd.f32 1.0, %v7922_v46  ;;  %v7924_v35 = vpop.eup %7923 }
 0xaf7   :  { %v4612_v39 = vadd.f32 1.0, %v7924_v35 }
 0xaf8   :  { %7925 = vrcp.f32 %v4605_v55 }
 0xaf9   :  { %7927 = vrcp.f32 %v4612_v39 }
 0xb02   :  { %v7926_v48 = vpop.eup %7925 }
 0xb03   :  { %v4615_v4 = vmul.f32 %v7926_v48, %v4598_v37  ;;  %v7928_v24 = vpop.eup %7927 }
 0xb04   :  { %v4618_v58 = vsub.f32 1.0, %v7928_v24  ;;  %v4620_v61 = vmul.f32 %v7928_v24, %v9509_v5 }
 0xb05   :  { %v4616_v62 = vadd.f32 %v4615_v4, %v4457_v19 }
 0xb07   :  { %7929 = vtanh.f32 %v4616_v62 }
 0xb11   :  { %v7930_v36 = vpop.eup %7929 }
 0xb12   :  { %v4619_v43 = vmul.f32 %v7930_v36, %v4618_v58 }
 0xb14   :  { %v4621_v28 = vadd.f32 %v4620_v61, %v4619_v43 }
 0xb16   :  { %v4622_v44 = vadd.f32 %v4621_v28, %v4013_v1 }
 0xb18   :  { %v4623_v38 = vmul.f32 0.14285715, %v4622_v44 }
 0xb1a   :  { %4624 = vst [vmem:[#allocation11] sm:$0xff] %v4623_v38 }
 0xb1b   :  { %8052 = shalt.err (!%p8049_p2)
}
 0xb1c   :  { %s8053_s14 = scalar_lea.hbm %s9583_s9, 128 }
 0xb1d   :  { %p8054_p3 = scmp.ne.s32.totalorder %s9583_s9, %s8053_s14  ;;  %p8057_p4 = scmp.lt.u32.totalorder %s8053_s14, %s9583_s9 }
 0xb1f   :  { %p8059_p5 = pnand %p8057_p4, %p8054_p3 }
 0xb21   :  { %8062 = shalt.err (!%p8059_p5)
}
 0xb22   :  { %4634 = dma.vmem_to_hbm [thread:$0]  %s4632_s8, 128, %s9583_s9, [#allocation4]  }
 0xb23   :  { %8069 = dma.done.wait [#allocation4], 128  }
 0xb24   :  { %8070 = vsyncadd [#allocation4], 4294967168 }
 0xb25   :  { %4638 = vsyncpa [#allocation3], 1 }
 0xb26   :  { %4639 = vsyncpa [#allocation6], 1 }
 0xb27   :  { %4640 = vsyncpa [#allocation9], 1 }
 0xb28   :  { %4641 = vsyncpa [#allocation4], 1 }

</bundles_post_ra>
